<compile_context>
chip_gen: v7x
topology: tpu7x:2x2x1
jax: 0.10.0
libtpu: 0.0.40
codegen_flags: <defaults>
</compile_context>

<pallas_src>
import numpy as np
import jax
import jax.numpy as jnp
from jax.experimental import pallas as pl
from jax.experimental.pallas import tpu as pltpu

# ----- static configuration -----
LAT = 8                 # latent_size
IN_DIM = 3              # input_dim
FDIM = 4                # feature_dim
FSIZE = 16              # feature_size
S = FSIZE + 1           # plane side (17)
P = S * S               # flattened plane size (289)
HID = 32                # hidden_dim
PAIRS = [(0, 1), (0, 2), (1, 2)]      # indim=3 -> 3 feature planes
NPLANES = len(PAIRS)
SDF_IN = NPLANES * FDIM + LAT + IN_DIM  # 23
XROWS = LAT + IN_DIM + 1                # 12: [latents, xyz, ones (for b1)]

TILE_N = 512            # query columns per grid step (even grid for v7x)


def sdfnet_kernel(xt_ref, planes_ref, eyt_ref, ext_ref, w1t_ref, w2t_ref,
                  b2_ref, w3r_ref, b3_ref, out_ref):
    xt = xt_ref[...]                                      # (XROWS, TN)

    # grid_sample(align_corners=True, padding_mode='border'): continuous source
    # index clamped to the plane extent.
    t = jnp.clip((xt[LAT:LAT + IN_DIM, :] + 1.0) * (0.5 * (S - 1)),
                 0.0, float(S - 1))                       # (3, TN)

    idx = jax.lax.broadcasted_iota(jnp.int32, (S, 1), 0).astype(jnp.float32)

    def hat(trow):                                        # (1, TN) -> (S, TN)
        # bilinear "hat": weight of grid node k is relu(1 - |k - t|)
        # (exactly (1-frac) at floor(t) and frac at floor(t)+1, 0 elsewhere).
        return jnp.maximum(1.0 - jnp.abs(idx - trow), 0.0)

    h0 = hat(t[0:1, :])    # coord 0 -> x-axis of planes 0, 1
    h1 = hat(t[1:2, :])    # coord 1 -> y-axis of plane 0, x-axis of plane 2
    h2 = hat(t[2:3, :])    # coord 2 -> y-axis of planes 1, 2

    eyt = eyt_ref[...]     # (P, S) 0/1: expand a hat over the plane-row index
    ext = ext_ref[...]     # (P, S) 0/1: expand a hat over the plane-col index

    # Four distinct (P, TN) expansions (shared between planes), on the MXU.
    wy_c1 = jnp.dot(eyt, h1, preferred_element_type=jnp.float32)
    wy_c2 = jnp.dot(eyt, h2, preferred_element_type=jnp.float32)
    wx_c0 = jnp.dot(ext, h0, preferred_element_type=jnp.float32)
    wx_c1 = jnp.dot(ext, h1, preferred_element_type=jnp.float32)

    # Layer 1 head: [latents, xyz, 1] (b1 folded into the ones row).
    h = jnp.dot(w1t_ref[...], xt, preferred_element_type=jnp.float32)  # (HID, TN)

    # Plane-sample contributions (w1 feature rows folded into planes_projT),
    # accumulated one plane slab at a time.
    plane_weights = ((wy_c1, wx_c0),    # plane 0: x=coord0, y=coord1
                     (wy_c2, wx_c0),    # plane 1: x=coord0, y=coord2
                     (wy_c2, wx_c1))    # plane 2: x=coord1, y=coord2
    for p, (wy, wx) in enumerate(plane_weights):
        h = h + jnp.dot(planes_ref[p * HID:(p + 1) * HID, :], wy * wx,
                        preferred_element_type=jnp.float32)
    h = jnp.maximum(h, 0.0)

    # Layer 2.
    h = jnp.dot(w2t_ref[...], h, preferred_element_type=jnp.float32) + b2_ref[...]
    h = jnp.maximum(h, 0.0)

    # Layer 3 (Linear(32, 1)) -> lane-dense (1, TN) row.
    out = jnp.dot(w3r_ref[...], h, preferred_element_type=jnp.float32)
    out_ref[...] = out + b3_ref[...]


def _expansion_mats():
    """Static 0/1 matrices expanding 17-wide hat weights to 289-wide slabs."""
    k = np.arange(P)
    ey = (k[:, None] // S == np.arange(S)[None, :]).astype(np.float32)  # (P, S)
    ex = (k[:, None] % S == np.arange(S)[None, :]).astype(np.float32)   # (P, S)
    return jnp.asarray(ey), jnp.asarray(ex)


def _pack_params(planes, w1, b1, w2, b2, w3, b3):
    # Fold the feature rows of w1 into the planes (offline reparameterization),
    # stored transposed so the kernel's matmuls are lane-dense in N.
    w1_feat = w1[LAT + IN_DIM:, :].reshape(NPLANES, FDIM, HID)
    planes_t = jnp.einsum('pkf,pfh->phk', planes, w1_feat).reshape(NPLANES * HID, P)
    # Layer-1 head with b1 folded in (ones row of xT), transposed to (HID, 12).
    w1_head = jnp.concatenate([w1[:LAT + IN_DIM, :], b1[None, :]], axis=0)
    w1t = w1_head.T                      # (HID, XROWS)
    w2t = w2.T                           # (HID, HID)
    b2c = b2[:, None]                    # (HID, 1)
    w3r = w3.T                           # (1, HID)
    b3m = jnp.reshape(b3, (1, 1))        # (1, 1)
    return planes_t, w1t, w2t, b2c, w3r, b3m


def sdfnet_forward(x, planes, w1, b1, w2, b2, w3, b3):
    n = x.shape[0]
    n_pad = ((n + TILE_N - 1) // TILE_N) * TILE_N
    # Lane-dense query layout: (12, N) = [latents(8); xyz(3); ones(1)].
    xt = jnp.concatenate([x.T, jnp.ones((1, n), jnp.float32)], axis=0)
    if n_pad != n:
        xt = jnp.pad(xt, ((0, 0), (0, n_pad - n)))
    planes_t, w1t, w2t, b2c, w3r, b3m = _pack_params(planes, w1, b1, w2, b2, w3, b3)
    eyt, ext = _expansion_mats()
    grid = (n_pad // TILE_N,)
    out = pl.pallas_call(
        sdfnet_kernel,
        out_shape=jax.ShapeDtypeStruct((1, n_pad), jnp.float32),
        grid=grid,
        in_specs=[
            pl.BlockSpec((XROWS, TILE_N), lambda i: (0, i)),        # xT tile
            pl.BlockSpec((NPLANES * HID, P), lambda i: (0, 0)),     # planes_projT
            pl.BlockSpec((P, S), lambda i: (0, 0)),                 # row expansion
            pl.BlockSpec((P, S), lambda i: (0, 0)),                 # col expansion
            pl.BlockSpec((HID, XROWS), lambda i: (0, 0)),           # w1 head^T (+b1)
            pl.BlockSpec((HID, HID), lambda i: (0, 0)),             # w2^T
            pl.BlockSpec((HID, 1), lambda i: (0, 0)),               # b2 column
            pl.BlockSpec((1, HID), lambda i: (0, 0)),               # w3^T row
            pl.BlockSpec((1, 1), lambda i: (0, 0)),                 # b3
        ],
        out_specs=pl.BlockSpec((1, TILE_N), lambda i: (0, i)),
        compiler_params=pltpu.CompilerParams(
            dimension_semantics=("parallel",)),
    )(xt, planes_t, eyt, ext, w1t, w2t, b2c, w3r, b3m)
    return out[0, :n]      # netOut.squeeze()


# ---------- pure-JAX reference (for correctness check only) ----------
def sdfnet_reference(x, planes, w1, b1, w2, b2, w3, b3):
    in_lat = x[:, :LAT]
    in_x = x[:, LAT:LAT + IN_DIM]
    feats = []
    for p, (i, j) in enumerate(PAIRS):
        cx, cy = in_x[:, i], in_x[:, j]
        ix = jnp.clip((cx + 1.0) * 0.5 * (S - 1), 0.0, S - 1.0)
        iy = jnp.clip((cy + 1.0) * 0.5 * (S - 1), 0.0, S - 1.0)
        x0 = jnp.clip(jnp.floor(ix), 0.0, S - 2.0)
        y0 = jnp.clip(jnp.floor(iy), 0.0, S - 2.0)
        wx, wy = ix - x0, iy - y0
        x0i, y0i = x0.astype(jnp.int32), y0.astype(jnp.int32)
        plane = planes[p]                                   # (P, FDIM)
        g = lambda yy, xx: plane[yy * S + xx]               # noqa: E731
        f = (((1 - wx) * (1 - wy))[:, None] * g(y0i, x0i) +
             (wx * (1 - wy))[:, None] * g(y0i, x0i + 1) +
             ((1 - wx) * wy)[:, None] * g(y0i + 1, x0i) +
             (wx * wy)[:, None] * g(y0i + 1, x0i + 1))
        feats.append(f)
    net_in = jnp.concatenate([in_lat, in_x] + feats, axis=1)
    h = jax.nn.relu(net_in @ w1 + b1)
    h = jax.nn.relu(h @ w2 + b2)
    return (h @ w3 + b3)[:, 0]


if __name__ == "__main__":
    key = jax.random.PRNGKey(0)
    ks = jax.random.split(key, 8)

    N = 1024   # batched query points (>=512 per invocation; grid=2 tiles)

    # Query points: latents ~ N(0,1), coordinates roughly in [-1, 1]
    x = jax.random.normal(ks[0], (N, LAT + IN_DIM), dtype=jnp.float32)
    x = x.at[:, LAT:].set(jnp.clip(x[:, LAT:], -1.2, 1.2))

    # FeaturePlanes: 3 planes, each torch.randn(1, fdim, S, S) * 0.01.
    # Stored flattened NHWC-style: planes[p, y*S + x, c].
    planes_nchw = jax.random.normal(ks[1], (NPLANES, FDIM, S, S),
                                    dtype=jnp.float32) * 0.01
    planes = jnp.transpose(planes_nchw, (0, 2, 3, 1)).reshape(NPLANES, P, FDIM)

    # MLP parameters (deterministic synthetic init), stored as (in, out).
    w1 = jax.random.normal(ks[2], (SDF_IN, HID), jnp.float32) * (1.0 / SDF_IN ** 0.5)
    b1 = jax.random.normal(ks[3], (HID,), jnp.float32) * 0.01
    w2 = jax.random.normal(ks[4], (HID, HID), jnp.float32) * (1.0 / HID ** 0.5)
    b2 = jax.random.normal(ks[5], (HID,), jnp.float32) * 0.01
    w3 = jax.random.normal(ks[6], (HID, 1), jnp.float32) * (1.0 / HID ** 0.5)
    b3 = jax.random.normal(ks[7], (), jnp.float32) * 0.01

    fwd = jax.jit(sdfnet_forward)
    out = jax.block_until_ready(fwd(x, planes, w1, b1, w2, b2, w3, b3))

    ref = sdfnet_reference(x, planes, w1, b1, w2, b2, w3, b3)
    assert out.shape == (N,)
    err = float(jnp.max(jnp.abs(out - ref)))
    assert jnp.allclose(out, ref, atol=1e-4, rtol=1e-4), f"max abs err {err}"

    print("KERNEL_OK")
</pallas_src>

<mosaic_0001>
module attributes {stable_mosaic.version = 11 : i64} {
  func.func @sdfnet_kernel(%arg0: i32, %arg1: memref<12x512xf32, #tpu.memory_space<vmem>>, %arg2: memref<96x289xf32, #tpu.memory_space<vmem>>, %arg3: memref<289x17xf32, #tpu.memory_space<vmem>>, %arg4: memref<289x17xf32, #tpu.memory_space<vmem>>, %arg5: memref<32x12xf32, #tpu.memory_space<vmem>>, %arg6: memref<32x32xf32, #tpu.memory_space<vmem>>, %arg7: memref<32x1xf32, #tpu.memory_space<vmem>>, %arg8: memref<1x32xf32, #tpu.memory_space<vmem>>, %arg9: memref<1x1xf32, #tpu.memory_space<vmem>>, %arg10: memref<1x512xf32, #tpu.memory_space<vmem>>) attributes {dimension_semantics = [#tpu.dimension_semantics<parallel>], iteration_bounds = array<i64: 2>, scalar_prefetch = 0 : i64, scratch_operands = 0 : i64, tpu.core_type = #tpu.core_type<tc>, window_params = [{transform_indices = @transform_0, window_bounds = array<i64: 12, 512>}, {pipeline_mode = #tpu.pipeline_mode<synchronous>, transform_indices = @transform_1, window_bounds = array<i64: 96, 289>}, {pipeline_mode = #tpu.pipeline_mode<synchronous>, transform_indices = @transform_2, window_bounds = array<i64: 289, 17>}, {pipeline_mode = #tpu.pipeline_mode<synchronous>, transform_indices = @transform_3, window_bounds = array<i64: 289, 17>}, {pipeline_mode = #tpu.pipeline_mode<synchronous>, transform_indices = @transform_4, window_bounds = array<i64: 32, 12>}, {pipeline_mode = #tpu.pipeline_mode<synchronous>, transform_indices = @transform_5, window_bounds = array<i64: 32, 32>}, {pipeline_mode = #tpu.pipeline_mode<synchronous>, transform_indices = @transform_6, window_bounds = array<i64: 32, 1>}, {pipeline_mode = #tpu.pipeline_mode<synchronous>, transform_indices = @transform_7, window_bounds = array<i64: 1, 32>}, {pipeline_mode = #tpu.pipeline_mode<synchronous>, transform_indices = @transform_8, window_bounds = array<i64: 1, 1>}, {transform_indices = @transform_9, window_bounds = array<i64: 1, 512>}]} {
    %c0 = arith.constant 0 : index
    %c0_0 = arith.constant 0 : index
    %0 = vector.load %arg1[%c0, %c0_0] : memref<12x512xf32, #tpu.memory_space<vmem>>, vector<12x512xf32>
    %1 = vector.extract_strided_slice %0 {offsets = [8, 0], sizes = [3, 512], strides = [1, 1]} : vector<12x512xf32> to vector<3x512xf32>
    %cst = arith.constant 1.000000e+00 : f32
    %2 = vector.broadcast %cst : f32 to vector<3x512xf32>
    %3 = arith.addf %1, %2 : vector<3x512xf32>
    %cst_1 = arith.constant 8.000000e+00 : f32
    %4 = vector.broadcast %cst_1 : f32 to vector<3x512xf32>
    %5 = arith.mulf %3, %4 : vector<3x512xf32>
    %cst_2 = arith.constant 0.000000e+00 : f32
    %cst_3 = arith.constant 1.600000e+01 : f32
    %6 = vector.broadcast %cst_2 : f32 to vector<3x512xf32>
    %7 = arith.maximumf %6, %5 : vector<3x512xf32>
    %8 = vector.broadcast %cst_3 : f32 to vector<3x512xf32>
    %9 = arith.minimumf %8, %7 : vector<3x512xf32>
    %10 = tpu.iota {dimensions = array<i32: 0>} : vector<17x1xi32>
    %11 = arith.sitofp %10 : vector<17x1xi32> to vector<17x1xf32>
    %12 = vector.extract_strided_slice %9 {offsets = [0, 0], sizes = [1, 512], strides = [1, 1]} : vector<3x512xf32> to vector<1x512xf32>
    %13 = vector.broadcast %11 : vector<17x1xf32> to vector<17x512xf32>
    %14 = vector.broadcast %12 : vector<1x512xf32> to vector<17x512xf32>
    %15 = arith.subf %13, %14 : vector<17x512xf32>
    %16 = math.absf %15 : vector<17x512xf32>
    %cst_4 = arith.constant 1.000000e+00 : f32
    %17 = vector.broadcast %cst_4 : f32 to vector<17x512xf32>
    %18 = arith.subf %17, %16 : vector<17x512xf32>
    %cst_5 = arith.constant 0.000000e+00 : f32
    %19 = vector.broadcast %cst_5 : f32 to vector<17x512xf32>
    %20 = arith.maximumf %18, %19 : vector<17x512xf32>
    %21 = vector.extract_strided_slice %9 {offsets = [1, 0], sizes = [1, 512], strides = [1, 1]} : vector<3x512xf32> to vector<1x512xf32>
    %22 = vector.broadcast %11 : vector<17x1xf32> to vector<17x512xf32>
    %23 = vector.broadcast %21 : vector<1x512xf32> to vector<17x512xf32>
    %24 = arith.subf %22, %23 : vector<17x512xf32>
    %25 = math.absf %24 : vector<17x512xf32>
    %cst_6 = arith.constant 1.000000e+00 : f32
    %26 = vector.broadcast %cst_6 : f32 to vector<17x512xf32>
    %27 = arith.subf %26, %25 : vector<17x512xf32>
    %cst_7 = arith.constant 0.000000e+00 : f32
    %28 = vector.broadcast %cst_7 : f32 to vector<17x512xf32>
    %29 = arith.maximumf %27, %28 : vector<17x512xf32>
    %30 = vector.extract_strided_slice %9 {offsets = [2, 0], sizes = [1, 512], strides = [1, 1]} : vector<3x512xf32> to vector<1x512xf32>
    %31 = vector.broadcast %11 : vector<17x1xf32> to vector<17x512xf32>
    %32 = vector.broadcast %30 : vector<1x512xf32> to vector<17x512xf32>
    %33 = arith.subf %31, %32 : vector<17x512xf32>
    %34 = math.absf %33 : vector<17x512xf32>
    %cst_8 = arith.constant 1.000000e+00 : f32
    %35 = vector.broadcast %cst_8 : f32 to vector<17x512xf32>
    %36 = arith.subf %35, %34 : vector<17x512xf32>
    %cst_9 = arith.constant 0.000000e+00 : f32
    %37 = vector.broadcast %cst_9 : f32 to vector<17x512xf32>
    %38 = arith.maximumf %36, %37 : vector<17x512xf32>
    %c0_10 = arith.constant 0 : index
    %c0_11 = arith.constant 0 : index
    %39 = vector.load %arg3[%c0_10, %c0_11] : memref<289x17xf32, #tpu.memory_space<vmem>>, vector<289x17xf32>
    %c0_12 = arith.constant 0 : index
    %c0_13 = arith.constant 0 : index
    %40 = vector.load %arg4[%c0_12, %c0_13] : memref<289x17xf32, #tpu.memory_space<vmem>>, vector<289x17xf32>
    %cst_14 = arith.constant dense<0.000000e+00> : vector<289x512xf32>
    %41 = tpu.matmul %39, %29, %cst_14 {dimension_numbers = #tpu.dot_dimension_numbers<[1], [0], [0], [1], [0, 0, 1, 1], [], []>} : vector<289x17xf32>, vector<17x512xf32>, vector<289x512xf32> -> vector<289x512xf32>
    %cst_15 = arith.constant dense<0.000000e+00> : vector<289x512xf32>
    %42 = tpu.matmul %39, %38, %cst_15 {dimension_numbers = #tpu.dot_dimension_numbers<[1], [0], [0], [1], [0, 0, 1, 1], [], []>} : vector<289x17xf32>, vector<17x512xf32>, vector<289x512xf32> -> vector<289x512xf32>
    %cst_16 = arith.constant dense<0.000000e+00> : vector<289x512xf32>
    %43 = tpu.matmul %40, %20, %cst_16 {dimension_numbers = #tpu.dot_dimension_numbers<[1], [0], [0], [1], [0, 0, 1, 1], [], []>} : vector<289x17xf32>, vector<17x512xf32>, vector<289x512xf32> -> vector<289x512xf32>
    %cst_17 = arith.constant dense<0.000000e+00> : vector<289x512xf32>
    %44 = tpu.matmul %40, %29, %cst_17 {dimension_numbers = #tpu.dot_dimension_numbers<[1], [0], [0], [1], [0, 0, 1, 1], [], []>} : vector<289x17xf32>, vector<17x512xf32>, vector<289x512xf32> -> vector<289x512xf32>
    %c0_18 = arith.constant 0 : index
    %c0_19 = arith.constant 0 : index
    %45 = vector.load %arg5[%c0_18, %c0_19] : memref<32x12xf32, #tpu.memory_space<vmem>>, vector<32x12xf32>
    %cst_20 = arith.constant dense<0.000000e+00> : vector<32x512xf32>
    %46 = tpu.matmul %45, %0, %cst_20 {dimension_numbers = #tpu.dot_dimension_numbers<[1], [0], [0], [1], [0, 0, 1, 1], [], []>} : vector<32x12xf32>, vector<12x512xf32>, vector<32x512xf32> -> vector<32x512xf32>
    %c0_21 = arith.constant 0 : index
    %c0_22 = arith.constant 0 : index
    %47 = vector.load %arg2[%c0_21, %c0_22] : memref<96x289xf32, #tpu.memory_space<vmem>>, vector<32x289xf32>
    %48 = arith.mulf %41, %43 : vector<289x512xf32>
    %cst_23 = arith.constant dense<0.000000e+00> : vector<32x512xf32>
    %49 = tpu.matmul %47, %48, %cst_23 {dimension_numbers = #tpu.dot_dimension_numbers<[1], [0], [0], [1], [0, 0, 1, 1], [], []>} : vector<32x289xf32>, vector<289x512xf32>, vector<32x512xf32> -> vector<32x512xf32>
    %50 = arith.addf %46, %49 : vector<32x512xf32>
    %c32 = arith.constant 32 : index
    %c0_24 = arith.constant 0 : index
    %51 = vector.load %arg2[%c32, %c0_24] : memref<96x289xf32, #tpu.memory_space<vmem>>, vector<32x289xf32>
    %52 = arith.mulf %42, %43 : vector<289x512xf32>
    %cst_25 = arith.constant dense<0.000000e+00> : vector<32x512xf32>
    %53 = tpu.matmul %51, %52, %cst_25 {dimension_numbers = #tpu.dot_dimension_numbers<[1], [0], [0], [1], [0, 0, 1, 1], [], []>} : vector<32x289xf32>, vector<289x512xf32>, vector<32x512xf32> -> vector<32x512xf32>
    %54 = arith.addf %50, %53 : vector<32x512xf32>
    %c64 = arith.constant 64 : index
    %c0_26 = arith.constant 0 : index
    %55 = vector.load %arg2[%c64, %c0_26] : memref<96x289xf32, #tpu.memory_space<vmem>>, vector<32x289xf32>
    %56 = arith.mulf %42, %44 : vector<289x512xf32>
    %cst_27 = arith.constant dense<0.000000e+00> : vector<32x512xf32>
    %57 = tpu.matmul %55, %56, %cst_27 {dimension_numbers = #tpu.dot_dimension_numbers<[1], [0], [0], [1], [0, 0, 1, 1], [], []>} : vector<32x289xf32>, vector<289x512xf32>, vector<32x512xf32> -> vector<32x512xf32>
    %58 = arith.addf %54, %57 : vector<32x512xf32>
    %cst_28 = arith.constant 0.000000e+00 : f32
    %59 = vector.broadcast %cst_28 : f32 to vector<32x512xf32>
    %60 = arith.maximumf %58, %59 : vector<32x512xf32>
    %c0_29 = arith.constant 0 : index
    %c0_30 = arith.constant 0 : index
    %61 = vector.load %arg6[%c0_29, %c0_30] : memref<32x32xf32, #tpu.memory_space<vmem>>, vector<32x32xf32>
    %cst_31 = arith.constant dense<0.000000e+00> : vector<32x512xf32>
    %62 = tpu.matmul %61, %60, %cst_31 {dimension_numbers = #tpu.dot_dimension_numbers<[1], [0], [0], [1], [0, 0, 1, 1], [], []>} : vector<32x32xf32>, vector<32x512xf32>, vector<32x512xf32> -> vector<32x512xf32>
    %c0_32 = arith.constant 0 : index
    %c0_33 = arith.constant 0 : index
    %63 = vector.load %arg7[%c0_32, %c0_33] : memref<32x1xf32, #tpu.memory_space<vmem>>, vector<32x1xf32>
    %64 = vector.broadcast %63 : vector<32x1xf32> to vector<32x512xf32>
    %65 = arith.addf %62, %64 : vector<32x512xf32>
    %cst_34 = arith.constant 0.000000e+00 : f32
    %66 = vector.broadcast %cst_34 : f32 to vector<32x512xf32>
    %67 = arith.maximumf %65, %66 : vector<32x512xf32>
    %c0_35 = arith.constant 0 : index
    %c0_36 = arith.constant 0 : index
    %68 = vector.load %arg8[%c0_35, %c0_36] : memref<1x32xf32, #tpu.memory_space<vmem>>, vector<1x32xf32>
    %cst_37 = arith.constant dense<0.000000e+00> : vector<1x512xf32>
    %69 = tpu.matmul %68, %67, %cst_37 {dimension_numbers = #tpu.dot_dimension_numbers<[1], [0], [0], [1], [0, 0, 1, 1], [], []>} : vector<1x32xf32>, vector<32x512xf32>, vector<1x512xf32> -> vector<1x512xf32>
    %c0_38 = arith.constant 0 : index
    %c0_39 = arith.constant 0 : index
    %70 = vector.load %arg9[%c0_38, %c0_39] : memref<1x1xf32, #tpu.memory_space<vmem>>, vector<1x1xf32>
    %71 = vector.broadcast %70 : vector<1x1xf32> to vector<1x512xf32>
    %72 = arith.addf %69, %71 : vector<1x512xf32>
    %c0_40 = arith.constant 0 : index
    %c0_41 = arith.constant 0 : index
    %73 = vector.load %arg10[%c0_40, %c0_41] : memref<1x512xf32, #tpu.memory_space<vmem>>, vector<1x512xf32>
    tpu.vector_store %arg10[%c0_40, %c0_41], %72 {strides = array<i32>} : memref<1x512xf32, #tpu.memory_space<vmem>>, vector<1x512xf32>,
    return
  }
  func.func @transform_0(%arg0: i32) -> (i32, i32) {
    %c0_i32 = arith.constant 0 : i32
    %c0_i32_0 = arith.constant 0 : i32
    return %c0_i32, %arg0 : i32, i32
  }
  func.func @transform_1(%arg0: i32) -> (i32, i32) {
    %c0_i32 = arith.constant 0 : i32
    %c0_i32_0 = arith.constant 0 : i32
    %c0_i32_1 = arith.constant 0 : i32
    return %c0_i32, %c0_i32_0 : i32, i32
  }
  func.func @transform_2(%arg0: i32) -> (i32, i32) {
    %c0_i32 = arith.constant 0 : i32
    %c0_i32_0 = arith.constant 0 : i32
    %c0_i32_1 = arith.constant 0 : i32
    return %c0_i32, %c0_i32_0 : i32, i32
  }
  func.func @transform_3(%arg0: i32) -> (i32, i32) {
    %c0_i32 = arith.constant 0 : i32
    %c0_i32_0 = arith.constant 0 : i32
    %c0_i32_1 = arith.constant 0 : i32
    return %c0_i32, %c0_i32_0 : i32, i32
  }
  func.func @transform_4(%arg0: i32) -> (i32, i32) {
    %c0_i32 = arith.constant 0 : i32
    %c0_i32_0 = arith.constant 0 : i32
    %c0_i32_1 = arith.constant 0 : i32
    return %c0_i32, %c0_i32_0 : i32, i32
  }
  func.func @transform_5(%arg0: i32) -> (i32, i32) {
    %c0_i32 = arith.constant 0 : i32
    %c0_i32_0 = arith.constant 0 : i32
    %c0_i32_1 = arith.constant 0 : i32
    return %c0_i32, %c0_i32_0 : i32, i32
  }
  func.func @transform_6(%arg0: i32) -> (i32, i32) {
    %c0_i32 = arith.constant 0 : i32
    %c0_i32_0 = arith.constant 0 : i32
    %c0_i32_1 = arith.constant 0 : i32
    return %c0_i32, %c0_i32_0 : i32, i32
  }
  func.func @transform_7(%arg0: i32) -> (i32, i32) {
    %c0_i32 = arith.constant 0 : i32
    %c0_i32_0 = arith.constant 0 : i32
    %c0_i32_1 = arith.constant 0 : i32
    return %c0_i32, %c0_i32_0 : i32, i32
  }
  func.func @transform_8(%arg0: i32) -> (i32, i32) {
    %c0_i32 = arith.constant 0 : i32
    %c0_i32_0 = arith.constant 0 : i32
    %c0_i32_1 = arith.constant 0 : i32
    return %c0_i32, %c0_i32_0 : i32, i32
  }
  func.func @transform_9(%arg0: i32) -> (i32, i32) {
    %c0_i32 = arith.constant 0 : i32
    %c0_i32_0 = arith.constant 0 : i32
    return %c0_i32, %arg0 : i32, i32
  }
}

</mosaic_0001>

<bundles_post_ra>
// kernel: sdfnet_forward.1
= control target key start
LH: loop header
LB: loop body
LE: loop exit
PB: predicated region body
PF: predicated region fallthrough
CT: control target
= control target key end

     0   :  { %s10902_s0 = inlined_call_operand.vmem [shape: f32[12,1024], index: 0, kind: input, shape index: {}]   ;;  %s10903_s1 = inlined_call_operand.vmem [shape: f32[96,289], index: 1, kind: input, shape index: {}]   ;;  %s10904_s2 = inlined_call_operand.vmem [shape: f32[289,17], index: 2, kind: input, shape index: {}]   ;;  %s10905_s3 = inlined_call_operand.vmem [shape: f32[289,17], index: 3, kind: input, shape index: {}]   ;;  %s10906_s4 = inlined_call_operand.vmem [shape: f32[32,12], index: 4, kind: input, shape index: {}]   ;;  %s10907_s5 = inlined_call_operand.vmem [shape: f32[32,32], index: 5, kind: input, shape index: {}]   ;;  %s10908_s6 = inlined_call_operand.vmem [shape: f32[32,1], index: 6, kind: input, shape index: {}]   ;;  %s10909_s7 = inlined_call_operand.vmem [shape: f32[1,32], index: 7, kind: input, shape index: {}]   ;;  %s10910_s8 = inlined_call_operand.<no memory space> [shape: f32[1,1], index: 8, kind: input, shape index: {}]   ;;  %s10911_s9 = inlined_call_operand.hbm [shape: f32[1,1024], index: 9, kind: output, shape index: {}]  }
   0x1   :  { %v14_v0 = vstv %s10910_s8 }
   0x2   :  { %15 = vst [vmem:[#allocation2] sm:$0x1] %v14_v0 }
   0x3   :  { %16 = vsyncpa [#allocation5], 0 }
   0x4   :  { %18 = vsyncpa [#allocation5 + $0x1], 0  ;;  %s6771_s11 = smov 0   ;;  %s6773_s12 = smov 0  }
   0x5   :  { %s6775_s13 = smov 0   ;;  %s6777_s14 = smov 0  }
   0x6 LB: > { %s5603_s8 = sadd.s32 4294967295, %s6711_s14   ;;  %s5604_s15 = sadd.s32 4294967294, %s6711_s14   ;;  %s6711_s14 = sphi %s6777_s14, %s12421_s14   ;;  %s6707_s13 = sphi %s6775_s13, %s12420_s13   ;;  %s6703_s12 = sphi %s6773_s12, %s12419_s12   ;;  %s6699_s11 = sphi %s6771_s11, %s12418_s11  }
   0x7   : > { %s6794_s16 = sadd.s32 1, %s6711_s14   ;;  %s31_s17 = sadd.s32 1, %s6707_s13 }
   0x8   : > { %s28_s18 = ssub.s32 %s6711_s14, %s6794_s16  ;;  %p38_p0 = scmp.ne.s32.totalorder %s6707_s13, %s6703_s12 }
   0x9   : > { %p29_p1 = scmp.eq.s32.totalorder %s28_s18, 0  ;;  %p39_p2 = scmp.eq.s32.totalorder %s6711_s14, 0 }
   0xa   : > { %p236_p3 = scmp.eq.s32.totalorder %s5603_s8, 1  ;;  %p241_p4 = scmp.ne.s32.totalorder %s6703_s12, %s6699_s11 }
   0xb   : > { %s6807_s19 = scalar_select %p29_p1, %s6707_s13, %s31_s17  }
   0xc   : > { %p40_p5 = por %p39_p2, %p38_p0  ;;  %p6809_p6 = por %p236_p3, %p38_p0 }
   0xd   : > { %p242_p7 = scmp.eq.s32.totalorder %s5604_s15, 1  ;;  %p5606_p9 = scmp.ge.s32.totalorder %s6711_s14, 2 }
   0xf   : > { %p6813_p8 = por %p242_p7, %p241_p4  ;;  %282 = sbr.rel (%p5606_p9) target bundleno = 30 (0x1e), region = 48 }
  0x16   : > { %285 = sbr.rel (!%p40_p5) target bundleno = 30 (0x1e), region = 52  ;;  %s287_s22 = sand.u32 (%p40_p5), 1, %s6707_s13  }
  0x17   : > { %s5988_s23 = sshll.u32 (%p40_p5), %s6711_s14, 5  ;;  %s5607_s24 = sshll.u32 (%p40_p5), %s287_s22, 6 }
  0x18   : > { %s292_s27 = scalar_lea.vmem (%p40_p5), %s10902_s0, %s5988_s23  ;;  %s289_s28 = scalar_lea.vmem (%p40_p5), [#allocation3], %s5607_s24 }
  0x19   : > { %v305_v1 = vld [vmem:[%s292_s27] sm:$0xff] (%p40_p5)  ;;  %v307_v2 = vld [vmem:[%s292_s27 + $0x8] sm:$0xff] (%p40_p5)  ;;  %v309_v3 = vld [vmem:[%s292_s27 + $0x10] sm:$0xff] (%p40_p5) }
  0x1a   : > { %306 = vst [vmem:[%s289_s28] sm:$0xff] (%p40_p5), %v305_v1  ;;  %308 = vst [vmem:[%s289_s28 + $0x8] sm:$0xff] (%p40_p5), %v307_v2  ;;  %v311_v4 = vld [vmem:[%s292_s27 + $0x18] sm:$0xff] (%p40_p5)  ;;  %v313_v5 = vld [vmem:[%s292_s27 + $0x40] sm:$0xff] (%p40_p5) }
  0x1b   : > { %310 = vst [vmem:[%s289_s28 + $0x10] sm:$0xff] (%p40_p5), %v309_v3  ;;  %v315_v6 = vld [vmem:[%s292_s27 + $0x48] sm:$0xff] (%p40_p5)  ;;  %312 = vst [vmem:[%s289_s28 + $0x18] sm:$0xff] (%p40_p5), %v311_v4  ;;  %v317_v7 = vld [vmem:[%s292_s27 + $0x50] sm:$0xff] (%p40_p5) }
  0x1c   : > { %314 = vst [vmem:[%s289_s28 + $0x20] sm:$0xff] (%p40_p5), %v313_v5  ;;  %316 = vst [vmem:[%s289_s28 + $0x28] sm:$0xff] (%p40_p5), %v315_v6  ;;  %v319_v8 = vld [vmem:[%s292_s27 + $0x58] sm:$0xff] (%p40_p5) }
  0x1d   : > { %318 = vst [vmem:[%s289_s28 + $0x30] sm:$0xff] %v317_v7  ;;  %320 = vst [vmem:[%s289_s28 + $0x38] sm:$0xff] %v319_v8 }
  0x1e PF: > { %p5610_p10 = scmp.ge.s32.totalorder %s6711_s14, 1  ;;  %p325_p11 = scmp.lt.s32.totalorder %s6711_s14, 3 }
  0x20   : > { %p326_p12 = pnand %p5610_p10, %p325_p11 }
  0x22   : > { %329 = sbr.rel (%p326_p12) target bundleno = 1626 (0x65a), region = 75 }
  0x29   : > { %s6828_s29 = sand.u32 1, %s6703_s12   ;;  %v10912_v9 = vlaneseq  ;;  %v10915_v10 = vmov 0.0   ;;  %vm778_vm0 = vcmask 1040384   ;;  %vm666_vm1 = vcmask 138240  }
  0x2a   : > { %s5611_s30 = sshll.u32 %s6828_s29, 6  ;;  %855 = vmatprep.mubr.f32.mxu0 %v10915_v10  ;;  %1142 = vmatprep.mubr.f32.mxu1 %v10915_v10  ;;  %vm3780_vm2 = vcmask 1043456   ;;  %vm3386_vm3 = vcmask 269312   ;;  %vm6714_vm4 = vmmov 1   ;;  %vm3767_vm6 = vcmask 97280   ;;  %s5612_s28 = sshll.u32 %s6828_s29, 2 }
  0x2b   : > { %v6834_v11 = vshrl.u32 %v10912_v9, 7  ;;  %s6836_s10 = scalar_lea.vmem [#allocation3], %s5611_s30  ;;  %vm9656_vm5 = vmpackc.low %vm3780_vm2, %vm6714_vm4  ;;  %vm5127_vm7 = vcmask 261120   ;;  %s5989_s30 = sshll.u32 %s5603_s8, 6 }
  0x2c   : > { %v374_v12 = vld [vmem:[%s6836_s10 + $0x28] sm:$0xf]  ;;  %v376_v13 = vld [vmem:[%s6836_s10 + $0x38] sm:$0xf]  ;;  %v373_v14 = vld [vmem:[%s6836_s10 + $0x20] sm:$0xf]  ;;  %s10858_s22 = scalar_lea.hbm %s10911_s9, %s5989_s30 }
  0x2d   : > { %11251 = vst [vmem:[#allocation7_spill] sm:$0xff] %v6834_v11  ;;  %v378_v15 = vadd.f32 1.0, %v374_v12  ;;  %v375_v16 = vld [vmem:[%s6836_s10 + $0x30] sm:$0xf]  ;;  %v380_v17 = vadd.f32 1.0, %v376_v13  ;;  %v377_v18 = vadd.f32 1.0, %v373_v14  ;;  %v6851_v33 = vcvt.s32.f32 %v6834_v11 }
  0x2e   : > { %v379_v19 = vadd.f32 1.0, %v375_v16  ;;  %v395_v21 = vadd.s32 8, %v6834_v11  ;;  %v396_v22 = vadd.s32 16, %v6834_v11  ;;  %v466_v27 = vsub.s32 1, %v6834_v11  ;;  %s366_s15 = scalar_lea.vmem [#allocation4], %s5612_s28  ;;  %s5525_s23 = scalar_lea.sflag [#allocation5], %s6828_s29 }
  0x2f   : > { %v382_v20 = vmul.f32 8.0, %v378_v15  ;;  %v384_v23 = vmul.f32 8.0, %v380_v17  ;;  %v381_v24 = vmul.f32 8.0, %v377_v18  ;;  %v6846_v28 = vsub.s32 2, %v6834_v11  ;;  %s5539_s17 = sshll.u32 %s366_s15, 4  ;;  %s6717_s8 = smov [#allocation4]   ;;  %s10860_s17 = int_to_ptr.vmem [resolvable:$true] %s5539_s17 }
  0x30   : > { %v383_v25 = vmul.f32 8.0, %v379_v19  ;;  %v6853_v34 = vcvt.s32.f32 %v395_v21  ;;  %v6855_v35 = vcvt.s32.f32 %v396_v22  ;;  %s6649_s24 = scalar_lea.vmem %s10860_s17, 64  ;;  %s6653_s25 = sshll.u32 %s6717_s8, 4  ;;  %s6654_s25 = int_to_ptr.vmem [resolvable:$false] %s6653_s25 }
  0x31   : > { %v386_v26 = vmax.f32 %v382_v20, 0.0  ;;  %v388_v29 = vmax.f32 %v384_v23, 0.0  ;;  %v385_v30 = vmax.f32 %v381_v24, 0.0  ;;  %p6650_p13 = scmp.ne.s32.totalorder %s10860_s17, %s6649_s24  ;;  %s6655_s26 = scalar_lea.vmem %s6654_s25, 128 }
  0x32   : > { %v387_v31 = vmax.f32 %v383_v25, 0.0  ;;  %p6656_p2 = scmp.lt.s32.totalorder %s10860_s17, %s6654_s25  ;;  %p6657_p3 = scmp.lt.s32.totalorder %s6655_s26, %s6649_s24 }
  0x33   : > { %v6848_v32 = vmin.f32 %v386_v26, 16.0  ;;  %v6857_v36 = vmin.f32 %v388_v29, 16.0  ;;  %v6859_v37 = vmin.f32 %v385_v30, 16.0  ;;  %p6651_p0 = pnand %p6650_p13, %p6809_p6 }
  0x34   : > { %v6861_v38 = vmin.f32 %v387_v31, 16.0  ;;  %p6658_p4 = por %p6657_p3, %p6656_p2 }
  0x35   : > { %v471_v39 = vrot.slane %v6848_v32, %v466_v27  ;;  %v6866_v40 = vrot.slane %v6848_v32, %v6846_v28  ;;  %v479_v41 = vrot.slane %v6857_v36, %v466_v27  ;;  %v467_v42 = vrot.slane %v6859_v37, %v466_v27  ;;  %p6652_p1 = pneg %p6651_p0 }
  0x36   : > { %v475_v43 = vrot.slane %v6861_v38, %v466_v27  ;;  %v6873_v44 = vrot.slane %v6857_v36, %v6846_v28 }
  0x37   : > { %v481_v45 = vsub.f32 %v6851_v33, %v471_v39  ;;  %v485_v46 = vsub.f32 %v6853_v34, %v471_v39  ;;  %v489_v47 = vsub.f32 %v6855_v35, %v471_v39  ;;  %v545_v48 = vsub.f32 %v6851_v33, %v6866_v40  ;;  %p6659_p5 = pnand %p6658_p4, %p6652_p1 }
  0x38   : > { %v483_v49 = vsub.f32 %v6851_v33, %v479_v41  ;;  %v487_v50 = vsub.f32 %v6853_v34, %v479_v41  ;;  %v480_v51 = vsub.f32 %v6851_v33, %v467_v42  ;;  %v484_v52 = vsub.f32 %v6853_v34, %v467_v42 }
  0x39   : > { %v493_v53 = vand.u32 2147483647, %v481_v45  ;;  %v497_v54 = vand.u32 2147483647, %v485_v46  ;;  %v482_v55 = vsub.f32 %v6851_v33, %v475_v43  ;;  %v486_v56 = vsub.f32 %v6853_v34, %v475_v43 }
  0x3a   : > { %v495_v57 = vand.u32 2147483647, %v483_v49  ;;  %v499_v58 = vand.u32 2147483647, %v487_v50  ;;  %v492_v59 = vand.u32 2147483647, %v480_v51  ;;  %v491_v60 = vsub.f32 %v6855_v35, %v479_v41 }
  0x3b   : > { %v505_v61 = vsub.f32 1.0, %v493_v53  ;;  %v509_v62 = vsub.f32 1.0, %v497_v54  ;;  %v496_v63 = vand.u32 2147483647, %v484_v52  ;;  %v494_v0 = vand.u32 2147483647, %v482_v55 }
  0x3c   : > { %v507_v1 = vsub.f32 1.0, %v495_v57  ;;  %v511_v2 = vsub.f32 1.0, %v499_v58  ;;  %v504_v3 = vsub.f32 1.0, %v492_v59  ;;  %v498_v4 = vand.u32 2147483647, %v486_v56  ;;  %v6922_v55 = vld [vmem:[%s10904_s2] sm:$0xff] }
  0x3d   : > { %v517_v5 = vmax.f32 %v505_v61, 0.0  ;;  %v521_v6 = vmax.f32 %v509_v62, 0.0  ;;  %v508_v7 = vsub.f32 1.0, %v496_v63  ;;  %v506_v8 = vsub.f32 1.0, %v494_v0 }
  0x3e   : > { %v519_v12 = vmax.f32 %v507_v1, 0.0  ;;  %v523_v13 = vmax.f32 %v511_v2, 0.0  ;;  %v516_v14 = vmax.f32 %v504_v3, 0.0  ;;  %v510_v15 = vsub.f32 1.0, %v498_v4 }
  0x3f   : > { %v6887_v16 = vpack.c.bf16 %v521_v6, %v517_v5  ;;  %v520_v17 = vmax.f32 %v508_v7, 0.0  ;;  %v518_v18 = vmax.f32 %v506_v8, 0.0  ;;  %v501_v19 = vand.u32 2147483647, %v489_v47  ;;  %v6946_v6 = vld [vmem:[%s10904_s2 + $0x8] sm:$0xff] }
  0x40   : > { %v6889_v20 = vpack.c.bf16 %v523_v13, %v519_v12  ;;  %v522_v21 = vmax.f32 %v510_v15, 0.0  ;;  %v503_v22 = vand.u32 2147483647, %v491_v60  ;;  %v488_v23 = vsub.f32 %v6855_v35, %v467_v42 }
  0x41   : > { %5991 = vmatprep.subr.bf16.mxu0 %v6887_v16  ;;  %v6893_v24 = vpack.c.bf16 %v520_v17, %v516_v14  ;;  %v513_v25 = vsub.f32 1.0, %v501_v19  ;;  %v490_v26 = vsub.f32 %v6855_v35, %v475_v43  ;;  %v549_v27 = vsub.f32 %v6853_v34, %v6866_v40 }
  0x42   : > { %5995 = vmatprep.subr.bf16.mxu1 %v6889_v20  ;;  %v6899_v29 = vpack.c.bf16 %v522_v21, %v518_v18  ;;  %v515_v30 = vsub.f32 1.0, %v503_v22  ;;  %v500_v31 = vand.u32 2147483647, %v488_v23  ;;  %v557_v39 = vand.u32 2147483647, %v545_v48 }
  0x43   : > { %5993 = vmatpush1.bf16.msra.mxu0 %v6893_v24  ;;  %v6902_v41 = vmax.f32 %v513_v25, 0.0  ;;  %v502_v42 = vand.u32 2147483647, %v490_v26  ;;  %v561_v45 = vand.u32 2147483647, %v549_v27  ;;  %v547_v46 = vsub.f32 %v6851_v33, %v6873_v44 }
  0x44   : > { %5997 = vmatpush1.bf16.msra.mxu1 %v6899_v29  ;;  %v6907_v43 = vmax.f32 %v515_v30, 0.0  ;;  %v512_v47 = vsub.f32 1.0, %v500_v31  ;;  %v569_v49 = vsub.f32 1.0, %v557_v39  ;;  %v551_v50 = vsub.f32 %v6853_v34, %v6873_v44 }
  0x45   : > { %5613 = vmatprep.subr.msk.mxu0 %vm778_vm0, %v6902_v41  ;;  %v514_v48 = vsub.f32 1.0, %v502_v42  ;;  %v573_v51 = vsub.f32 1.0, %v561_v45  ;;  %v559_v52 = vand.u32 2147483647, %v547_v46  ;;  %v531_v53 = vrot.slane %v6859_v37, %v6846_v28 }
  0x46   : > { %5652 = vmatprep.subr.msk.mxu1 %vm778_vm0, %v6907_v43  ;;  %v6917_v54 = vmax.f32 %v512_v47, 0.0  ;;  %v581_v56 = vmax.f32 %v569_v49, 0.0  ;;  %v563_v57 = vand.u32 2147483647, %v551_v50  ;;  %v539_v58 = vrot.slane %v6861_v38, %v6846_v28 }
  0x47   : > { %v6926_v59 = vmax.f32 %v514_v48, 0.0  ;;  %v585_v60 = vmax.f32 %v573_v51, 0.0  ;;  %v571_v61 = vsub.f32 1.0, %v559_v52  ;;  %v544_v62 = vsub.f32 %v6851_v33, %v531_v53  ;;  %v6972_v52 = vld [vmem:[%s10904_s2 + $0x18] sm:$0xff] }
  0x48   : > { %5614 = vmatpush1.msk.msra.mxu0 %vm778_vm0, %v6917_v54  ;;  %v575_v63 = vsub.f32 1.0, %v563_v57  ;;  %v548_v0 = vsub.f32 %v6853_v34, %v531_v53  ;;  %v546_v1 = vsub.f32 %v6851_v33, %v539_v58  ;;  %v550_v2 = vsub.f32 %v6853_v34, %v539_v58 }
  0x49   : > { %5653 = vmatpush1.msk.msra.mxu1 %vm778_vm0, %v6926_v59  ;;  %5615 = vmatmul.mubr.msk.f32.vlgmr.msra.gmra.mrb[0].mxu0 %vm666_vm1, %v6922_v55  ;;  %v5998_v28 = vpack.c.bf16 %v585_v60, %v581_v56  ;;  %v583_v3 = vmax.f32 %v571_v61, 0.0  ;;  %v556_v4 = vand.u32 2147483647, %v544_v62  ;;  %v553_v5 = vsub.f32 %v6855_v35, %v6866_v40  ;;  %v6998_v60 = vld [vmem:[%s10904_s2 + $0x28] sm:$0xff]  ;;  %v7009_v61 = vld [vmem:[%s10904_s2 + $0x30] sm:$0xff]  ;;  %v7020_v62 = vld [vmem:[%s10904_s2 + $0x38] sm:$0xff] }
  0x4a   : > { %5654 = vmatmul.mubr.msk.f32.vlgmr.msra.gmra.mrb[0].mxu1 %vm666_vm1, %v6922_v55  ;;  %861 = vmatprep.mubr.f32.mxu0 %v10915_v10  ;;  %v587_v7 = vmax.f32 %v575_v63, 0.0  ;;  %v560_v8 = vand.u32 2147483647, %v548_v0  ;;  %v558_v12 = vand.u32 2147483647, %v546_v1  ;;  %v555_v13 = vsub.f32 %v6855_v35, %v6873_v44  ;;  %v6960_v44 = vld [vmem:[%s10904_s2 + $0x10] sm:$0xff] }
  0x4b   : > { %1148 = vmatprep.mubr.f32.mxu1 %v10915_v10  ;;  %5999 = vmatprep.subr.bf16.mxu0 %v5998_v28  ;;  %v568_v40 = vsub.f32 1.0, %v556_v4  ;;  %v562_v14 = vand.u32 2147483647, %v550_v2  ;;  %v565_v15 = vand.u32 2147483647, %v553_v5  ;;  %v552_v17 = vsub.f32 %v6855_v35, %v531_v53  ;;  %v7031_v63 = vld [vmem:[%s10904_s2 + $0x40] sm:$0xff] }
  0x4c   : > { %v6002_v18 = vpack.c.bf16 %v587_v7, %v583_v3  ;;  %v572_v19 = vsub.f32 1.0, %v560_v8  ;;  %v570_v21 = vsub.f32 1.0, %v558_v12  ;;  %v567_v22 = vand.u32 2147483647, %v555_v13  ;;  %v7042_v0 = vld [vmem:[%s10904_s2 + $0x48] sm:$0xff]  ;;  %v7053_v1 = vld [vmem:[%s10904_s2 + $0x50] sm:$0xff] }
  0x4d   : > { %5616 = vmatmul.mubr.msk.f32.gmra.mrb[2].mxu0 %vm666_vm1, %v6946_v6  ;;  %v580_v23 = vmax.f32 %v568_v40, 0.0  ;;  %v574_v25 = vsub.f32 1.0, %v562_v14  ;;  %v577_v26 = vsub.f32 1.0, %v565_v15  ;;  %v564_v27 = vand.u32 2147483647, %v552_v17  ;;  %v7064_v2 = vld [vmem:[%s10904_s2 + $0x58] sm:$0xff] }
  0x4e   : > { %5655 = vmatmul.mubr.msk.f32.gmra.mrb[2].mxu1 %vm666_vm1, %v6946_v6  ;;  %867 = vmatprep.mubr.f32.mxu0 %v10915_v10  ;;  %v584_v30 = vmax.f32 %v572_v19, 0.0  ;;  %v582_v31 = vmax.f32 %v570_v21, 0.0  ;;  %v579_v39 = vsub.f32 1.0, %v567_v22  ;;  %v554_v42 = vsub.f32 %v6855_v35, %v539_v58  ;;  %v6985_v58 = vld [vmem:[%s10904_s2 + $0x20] sm:$0xff] }
  0x4f   : > { %1154 = vmatprep.mubr.f32.mxu1 %v10915_v10  ;;  %6003 = vmatprep.subr.bf16.mxu1 %v6002_v18  ;;  %v586_v45 = vmax.f32 %v574_v25, 0.0  ;;  %v576_v46 = vsub.f32 1.0, %v564_v27  ;;  %v589_v49 = vmax.f32 %v577_v26, 0.0  ;;  %v7067_v28 = vsub.s32 0, %v6834_v11 }
  0x50   : > { %v6000_v47 = vpack.c.bf16 %v584_v30, %v580_v23  ;;  %v566_v50 = vand.u32 2147483647, %v554_v42  ;;  %v591_v51 = vmax.f32 %v579_v39, 0.0 }
  0x51   : > { %5617 = vmatmul.mubr.msk.f32.gmra.mrb[4].mxu0 %vm666_vm1, %v6960_v44  ;;  %v6004_v48 = vpack.c.bf16 %v586_v45, %v582_v31  ;;  %v588_v56 = vmax.f32 %v576_v46, 0.0  ;;  %11252 = vst [vmem:[#allocation8_spill] sm:$0xff] %v7067_v28  ;;  %v7072_v3 = vrot.slane %v6848_v32, %v7067_v28  ;;  %v7076_v4 = vrot.slane %v6857_v36, %v7067_v28  ;;  %v7094_v32 = vld [vmem:[%s10904_s2 + $0x60] sm:$0xff] }
  0x52   : > { %5656 = vmatmul.mubr.msk.f32.gmra.mrb[4].mxu1 %vm666_vm1, %v6960_v44  ;;  %873 = vmatprep.mubr.f32.mxu0 %v10915_v10  ;;  %v578_v53 = vsub.f32 1.0, %v566_v50  ;;  %v7080_v5 = vrot.slane %v6859_v37, %v7067_v28  ;;  %v7084_v7 = vrot.slane %v6861_v38, %v7067_v28 }
  0x53   : > { %1160 = vmatprep.mubr.f32.mxu1 %v10915_v10  ;;  %6001 = vmatpush1.bf16.msra.mxu0 %v6000_v47  ;;  %v417_v36 = vsub.f32 %v6851_v33, %v7072_v3  ;;  %v421_v37 = vsub.f32 %v6853_v34, %v7072_v3  ;;  %v419_v38 = vsub.f32 %v6851_v33, %v7076_v4 }
  0x54   : > { %6005 = vmatpush1.bf16.msra.mxu1 %v6004_v48  ;;  %5691 = vmatprep.subr.msk.mxu0 %vm778_vm0, %v589_v49  ;;  %v590_v57 = vmax.f32 %v578_v53, 0.0  ;;  %v423_v8 = vsub.f32 %v6853_v34, %v7076_v4  ;;  %v416_v12 = vsub.f32 %v6851_v33, %v7080_v5  ;;  %v420_v13 = vsub.f32 %v6853_v34, %v7080_v5  ;;  %v7136_v53 = vld [vmem:[%s10904_s2 + $0x70] sm:$0xff] }
  0x55   : > { %5618 = vmatmul.mubr.msk.f32.gmra.mrb[6].mxu0 %vm666_vm1, %v6972_v52  ;;  %5730 = vmatprep.subr.msk.mxu1 %vm778_vm0, %v591_v51  ;;  %v418_v40 = vsub.f32 %v6851_v33, %v7084_v7  ;;  %v429_v14 = vand.u32 2147483647, %v417_v36  ;;  %v433_v15 = vand.u32 2147483647, %v421_v37  ;;  %v431_v17 = vand.u32 2147483647, %v419_v38 }
  0x56   : > { %5657 = vmatmul.mubr.msk.f32.gmra.mrb[6].mxu1 %vm666_vm1, %v6972_v52  ;;  %879 = vmatprep.mubr.f32.mxu0 %v10915_v10  ;;  %v422_v18 = vsub.f32 %v6853_v34, %v7084_v7  ;;  %v435_v19 = vand.u32 2147483647, %v423_v8  ;;  %v428_v21 = vand.u32 2147483647, %v416_v12  ;;  %v432_v22 = vand.u32 2147483647, %v420_v13 }
  0x57   : > { %1166 = vmatprep.mubr.f32.mxu1 %v10915_v10  ;;  %5692 = vmatpush1.msk.msra.mxu0 %vm778_vm0, %v588_v56  ;;  %v7121_v33 = vld [vmem:[%s10904_s2 + $0x68] sm:$0xff]  ;;  %v441_v23 = vsub.f32 1.0, %v429_v14  ;;  %v445_v25 = vsub.f32 1.0, %v433_v15  ;;  %v443_v26 = vsub.f32 1.0, %v431_v17  ;;  %v430_v34 = vand.u32 2147483647, %v418_v40 }
  0x58   : > { %5731 = vmatpush1.msk.msra.mxu1 %vm778_vm0, %v590_v57  ;;  %v447_v27 = vsub.f32 1.0, %v435_v19  ;;  %v440_v30 = vsub.f32 1.0, %v428_v21  ;;  %v444_v31 = vsub.f32 1.0, %v432_v22  ;;  %v434_v39 = vand.u32 2147483647, %v422_v18  ;;  %v7155_v12 = vld [vmem:[%s10904_s2 + $0x78] sm:$0xff] }
  0x59   : > { %5619 = vmatmul.mubr.msk.f32.gmra.mrb[8].mxu0 %vm666_vm1, %v6985_v58  ;;  %v453_v42 = vmax.f32 %v441_v23, 0.0  ;;  %v457_v45 = vmax.f32 %v445_v25, 0.0  ;;  %v455_v46 = vmax.f32 %v443_v26, 0.0  ;;  %v442_v47 = vsub.f32 1.0, %v430_v34  ;;  %v7166_v13 = vld [vmem:[%s10904_s2 + $0x80] sm:$0xff]  ;;  %v7177_v40 = vld [vmem:[%s10904_s2 + $0x88] sm:$0xff] }
  0x5a   : > { %5658 = vmatmul.mubr.msk.f32.gmra.mrb[8].mxu1 %vm666_vm1, %v6985_v58  ;;  %885 = vmatprep.mubr.f32.mxu0 %v10915_v10  ;;  %v459_v49 = vmax.f32 %v447_v27, 0.0  ;;  %v7126_v50 = vmax.f32 %v440_v30, 0.0  ;;  %v7128_v48 = vmax.f32 %v444_v31, 0.0  ;;  %v446_v51 = vsub.f32 1.0, %v434_v39  ;;  %v7188_v14 = vld [vmem:[%s10904_s2 + $0x90] sm:$0xff]  ;;  %v7199_v15 = vld [vmem:[%s10904_s2 + $0x98] sm:$0xff] }
  0x5b   : > { %1172 = vmatprep.mubr.f32.mxu1 %v10915_v10  ;;  %v6006_v56 = vpack.c.bf16 %v457_v45, %v453_v42  ;;  %v7138_v57 = vmax.f32 %v442_v47, 0.0  ;;  %v7210_v17 = vld [vmem:[%s10904_s2 + $0xa0] sm:$0xff]  ;;  %v7221_v18 = vld [vmem:[%s10904_s2 + $0xa8] sm:$0xff]  ;;  %v7232_v19 = vld [vmem:[%s10904_s2 + $0xb0] sm:$0xff]  ;;  %v427_v47 = vsub.f32 %v6855_v35, %v7076_v4 }
  0x5c   : > { %v6010_v36 = vpack.c.bf16 %v459_v49, %v455_v46  ;;  %v6008_v37 = vpack.c.bf16 %v7128_v48, %v7126_v50  ;;  %v7143_v38 = vmax.f32 %v446_v51, 0.0  ;;  %v7243_v21 = vld [vmem:[%s10904_s2 + $0xb8] sm:$0xff]  ;;  %v7254_v22 = vld [vmem:[%s10904_s2 + $0xc0] sm:$0xff]  ;;  %v7265_v23 = vld [vmem:[%s10904_s2 + $0xc8] sm:$0xff]  ;;  %v425_v46 = vsub.f32 %v6855_v35, %v7072_v3 }
  0x5d   : > { %5620 = vmatmul.mubr.msk.f32.gmra.mrb[10].mxu0 %vm666_vm1, %v6998_v60  ;;  %6007 = vmatprep.subr.bf16.mxu0 %v6006_v56  ;;  %v7276_v25 = vld [vmem:[%s10904_s2 + $0xd0] sm:$0xff]  ;;  %v7287_v26 = vld [vmem:[%s10904_s2 + $0xd8] sm:$0xff]  ;;  %v7298_v34 = vld [vmem:[%s10904_s2 + $0xe0] sm:$0xff]  ;;  %v424_v3 = vsub.f32 %v6855_v35, %v7080_v5  ;;  %v426_v56 = vsub.f32 %v6855_v35, %v7084_v7  ;;  %v439_v4 = vand.u32 2147483647, %v427_v47 }
  0x5e   : > { %5659 = vmatmul.mubr.msk.f32.gmra.mrb[10].mxu1 %vm666_vm1, %v6998_v60  ;;  %891 = vmatprep.mubr.f32.mxu0 %v10915_v10  ;;  %v7309_v27 = vld [vmem:[%s10904_s2 + $0xe8] sm:$0xff]  ;;  %v7320_v30 = vld [vmem:[%s10904_s2 + $0xf0] sm:$0xff]  ;;  %v7331_v31 = vld [vmem:[%s10904_s2 + $0xf8] sm:$0xff]  ;;  %v437_v51 = vand.u32 2147483647, %v425_v46 }
  0x5f   : > { %1178 = vmatprep.mubr.f32.mxu1 %v10915_v10  ;;  %6011 = vmatprep.subr.bf16.mxu1 %v6010_v36  ;;  %v7342_v39 = vld [vmem:[%s10904_s2 + $0x100] sm:$0xff]  ;;  %v7353_v42 = vld [vmem:[%s10904_s2 + $0x108] sm:$0xff]  ;;  %v7364_v45 = vld [vmem:[%s10904_s2 + $0x110] sm:$0xff]  ;;  %v436_v5 = vand.u32 2147483647, %v424_v3  ;;  %v451_v35 = vsub.f32 1.0, %v439_v4 }
  0x60   : > { %v7379_v49 = vld [vmem:[%s10904_s2 + $0x118] sm:$0xff]  ;;  %v7394_v36 = vld [vmem:[%s10904_s2 + $0x120] sm:$0x1]  ;;  %v449_v46 = vsub.f32 1.0, %v437_v51  ;;  %v438_v9 = vand.u32 2147483647, %v426_v56  ;;  %v11253_v56 = vpack.c.bf16 %v7143_v38, %v7138_v57 }
  0x61   : > { %5621 = vmatmul.mubr.msk.f32.gmra.mrb[12].mxu0 %vm666_vm1, %v7009_v61  ;;  %v448_v7 = vsub.f32 1.0, %v436_v5  ;;  %v463_v3 = vmax.f32 %v451_v35, 0.0 }
  0x62   : > { %5660 = vmatmul.mubr.msk.f32.gmra.mrb[12].mxu1 %vm666_vm1, %v7009_v61  ;;  %897 = vmatprep.mubr.f32.mxu0 %v10915_v10  ;;  %v461_v47 = vmax.f32 %v449_v46, 0.0  ;;  %v450_v8 = vsub.f32 1.0, %v438_v9 }
  0x63   : > { %1184 = vmatprep.mubr.f32.mxu1 %v10915_v10  ;;  %v460_v51 = vmax.f32 %v448_v7, 0.0 }
  0x64   : > { %v462_v9 = vmax.f32 %v450_v8, 0.0 }
  0x65   : > { %5622 = vmatmul.mubr.msk.f32.gmra.mrb[14].mxu0 %vm666_vm1, %v7020_v62 }
  0x66   : > { %5661 = vmatmul.mubr.msk.f32.gmra.mrb[14].mxu1 %vm666_vm1, %v7020_v62  ;;  %903 = vmatprep.mubr.f32.mxu0 %v10915_v10 }
  0x67   : > { %1190 = vmatprep.mubr.f32.mxu1 %v10915_v10 }
  0x69   : > { %5623 = vmatmul.mubr.msk.f32.gmra.mrb[16].mxu0 %vm666_vm1, %v7031_v63 }
  0x6a   : > { %5662 = vmatmul.mubr.msk.f32.gmra.mrb[16].mxu1 %vm666_vm1, %v7031_v63  ;;  %909 = vmatprep.mubr.f32.mxu0 %v10915_v10 }
  0x6b   : > { %1196 = vmatprep.mubr.f32.mxu1 %v10915_v10 }
  0x6d   : > { %5624 = vmatmul.mubr.msk.f32.gmra.mrb[18].mxu0 %vm666_vm1, %v7042_v0 }
  0x6e   : > { %5663 = vmatmul.mubr.msk.f32.gmra.mrb[18].mxu1 %vm666_vm1, %v7042_v0  ;;  %915 = vmatprep.mubr.f32.mxu0 %v10915_v10 }
  0x6f   : > { %1202 = vmatprep.mubr.f32.mxu1 %v10915_v10 }
  0x71   : > { %5625 = vmatmul.mubr.msk.f32.gmra.mrb[20].mxu0 %vm666_vm1, %v7053_v1 }
  0x72   : > { %5664 = vmatmul.mubr.msk.f32.gmra.mrb[20].mxu1 %vm666_vm1, %v7053_v1  ;;  %921 = vmatprep.mubr.f32.mxu0 %v10915_v10 }
  0x73   : > { %1208 = vmatprep.mubr.f32.mxu1 %v10915_v10 }
  0x75   : > { %5626 = vmatmul.mubr.msk.f32.gmra.mrb[22].mxu0 %vm666_vm1, %v7064_v2 }
  0x76   : > { %5665 = vmatmul.mubr.msk.f32.gmra.mrb[22].mxu1 %vm666_vm1, %v7064_v2  ;;  %927 = vmatprep.mubr.f32.mxu0 %v10915_v10 }
  0x77   : > { %1214 = vmatprep.mubr.f32.mxu1 %v10915_v10 }
  0x79   : > { %5627 = vmatmul.mubr.msk.f32.gmra.mrb[24].mxu0 %vm666_vm1, %v7094_v32 }
  0x7a   : > { %5666 = vmatmul.mubr.msk.f32.gmra.mrb[24].mxu1 %vm666_vm1, %v7094_v32  ;;  %933 = vmatprep.mubr.f32.mxu0 %v10915_v10 }
  0x7b   : > { %1220 = vmatprep.mubr.f32.mxu1 %v10915_v10 }
  0x7d   : > { %5628 = vmatmul.mubr.msk.f32.gmra.mrb[26].mxu0 %vm666_vm1, %v7121_v33 }
  0x7e   : > { %5667 = vmatmul.mubr.msk.f32.gmra.mrb[26].mxu1 %vm666_vm1, %v7121_v33  ;;  %939 = vmatprep.mubr.f32.mxu0 %v10915_v10 }
  0x7f   : > { %1226 = vmatprep.mubr.f32.mxu1 %v10915_v10 }
  0x81   : > { %5629 = vmatmul.mubr.msk.f32.gmra.mrb[28].mxu0 %vm666_vm1, %v7136_v53 }
  0x82   : > { %5668 = vmatmul.mubr.msk.f32.gmra.mrb[28].mxu1 %vm666_vm1, %v7136_v53  ;;  %945 = vmatprep.mubr.f32.mxu0 %v10915_v10 }
  0x83   : > { %1232 = vmatprep.mubr.f32.mxu1 %v10915_v10 }
  0x85   : > { %5630 = vmatmul.mubr.msk.f32.gmra.mrb[30].mxu0 %vm666_vm1, %v7155_v12 }
  0x86   : > { %5669 = vmatmul.mubr.msk.f32.gmra.mrb[30].mxu1 %vm666_vm1, %v7155_v12  ;;  %951 = vmatprep.mubr.f32.mxu0 %v10915_v10 }
  0x87   : > { %1238 = vmatprep.mubr.f32.mxu1 %v10915_v10 }
  0x89   : > { %5631 = vmatmul.mubr.msk.f32.gmra.mrb[32].mxu0 %vm666_vm1, %v7166_v13 }
  0x8a   : > { %5670 = vmatmul.mubr.msk.f32.gmra.mrb[32].mxu1 %vm666_vm1, %v7166_v13  ;;  %957 = vmatprep.mubr.f32.mxu0 %v10915_v10 }
  0x8b   : > { %1244 = vmatprep.mubr.f32.mxu1 %v10915_v10 }
  0x8d   : > { %5632 = vmatmul.mubr.msk.f32.gmra.mrb[34].mxu0 %vm666_vm1, %v7177_v40 }
  0x8e   : > { %5671 = vmatmul.mubr.msk.f32.gmra.mrb[34].mxu1 %vm666_vm1, %v7177_v40  ;;  %963 = vmatprep.mubr.f32.mxu0 %v10915_v10 }
  0x8f   : > { %1250 = vmatprep.mubr.f32.mxu1 %v10915_v10 }
  0x91   : > { %5633 = vmatmul.mubr.msk.f32.gmra.mrb[36].mxu0 %vm666_vm1, %v7188_v14 }
  0x92   : > { %5672 = vmatmul.mubr.msk.f32.gmra.mrb[36].mxu1 %vm666_vm1, %v7188_v14  ;;  %969 = vmatprep.mubr.f32.mxu0 %v10915_v10 }
  0x93   : > { %1256 = vmatprep.mubr.f32.mxu1 %v10915_v10 }
  0x95   : > { %5634 = vmatmul.mubr.msk.f32.gmra.mrb[38].mxu0 %vm666_vm1, %v7199_v15 }
  0x96   : > { %5673 = vmatmul.mubr.msk.f32.gmra.mrb[38].mxu1 %vm666_vm1, %v7199_v15  ;;  %975 = vmatprep.mubr.f32.mxu0 %v10915_v10 }
  0x97   : > { %1262 = vmatprep.mubr.f32.mxu1 %v10915_v10 }
  0x99   : > { %5635 = vmatmul.mubr.msk.f32.gmra.mrb[40].mxu0 %vm666_vm1, %v7210_v17 }
  0x9a   : > { %5674 = vmatmul.mubr.msk.f32.gmra.mrb[40].mxu1 %vm666_vm1, %v7210_v17  ;;  %981 = vmatprep.mubr.f32.mxu0 %v10915_v10 }
  0x9b   : > { %1268 = vmatprep.mubr.f32.mxu1 %v10915_v10 }
  0x9d   : > { %5636 = vmatmul.mubr.msk.f32.gmra.mrb[42].mxu0 %vm666_vm1, %v7221_v18 }
  0x9e   : > { %5675 = vmatmul.mubr.msk.f32.gmra.mrb[42].mxu1 %vm666_vm1, %v7221_v18  ;;  %987 = vmatprep.mubr.f32.mxu0 %v10915_v10 }
  0x9f   : > { %1274 = vmatprep.mubr.f32.mxu1 %v10915_v10 }
  0xa1   : > { %5637 = vmatmul.mubr.msk.f32.gmra.mrb[44].mxu0 %vm666_vm1, %v7232_v19 }
  0xa2   : > { %5676 = vmatmul.mubr.msk.f32.gmra.mrb[44].mxu1 %vm666_vm1, %v7232_v19  ;;  %993 = vmatprep.mubr.f32.mxu0 %v10915_v10 }
  0xa3   : > { %1280 = vmatprep.mubr.f32.mxu1 %v10915_v10 }
  0xa5   : > { %5638 = vmatmul.mubr.msk.f32.gmra.mrb[46].mxu0 %vm666_vm1, %v7243_v21 }
  0xa6   : > { %5677 = vmatmul.mubr.msk.f32.gmra.mrb[46].mxu1 %vm666_vm1, %v7243_v21  ;;  %999 = vmatprep.mubr.f32.mxu0 %v10915_v10 }
  0xa7   : > { %1286 = vmatprep.mubr.f32.mxu1 %v10915_v10 }
  0xa9   : > { %5639 = vmatmul.mubr.msk.f32.gmra.mrb[48].mxu0 %vm666_vm1, %v7254_v22 }
  0xaa   : > { %5678 = vmatmul.mubr.msk.f32.gmra.mrb[48].mxu1 %vm666_vm1, %v7254_v22  ;;  %1005 = vmatprep.mubr.f32.mxu0 %v10915_v10 }
  0xab   : > { %1292 = vmatprep.mubr.f32.mxu1 %v10915_v10 }
  0xad   : > { %5640 = vmatmul.mubr.msk.f32.gmra.mrb[50].mxu0 %vm666_vm1, %v7265_v23 }
  0xae   : > { %5679 = vmatmul.mubr.msk.f32.gmra.mrb[50].mxu1 %vm666_vm1, %v7265_v23  ;;  %1011 = vmatprep.mubr.f32.mxu0 %v10915_v10 }
  0xaf   : > { %1298 = vmatprep.mubr.f32.mxu1 %v10915_v10 }
  0xb1   : > { %5641 = vmatmul.mubr.msk.f32.gmra.mrb[52].mxu0 %vm666_vm1, %v7276_v25 }
  0xb2   : > { %5680 = vmatmul.mubr.msk.f32.gmra.mrb[52].mxu1 %vm666_vm1, %v7276_v25  ;;  %1017 = vmatprep.mubr.f32.mxu0 %v10915_v10 }
  0xb3   : > { %1304 = vmatprep.mubr.f32.mxu1 %v10915_v10 }
  0xb5   : > { %5642 = vmatmul.mubr.msk.f32.gmra.mrb[54].mxu0 %vm666_vm1, %v7287_v26 }
  0xb6   : > { %5681 = vmatmul.mubr.msk.f32.gmra.mrb[54].mxu1 %vm666_vm1, %v7287_v26  ;;  %1023 = vmatprep.mubr.f32.mxu0 %v10915_v10 }
  0xb7   : > { %1310 = vmatprep.mubr.f32.mxu1 %v10915_v10 }
  0xb9   : > { %5643 = vmatmul.mubr.msk.f32.gmra.mrb[56].mxu0 %vm666_vm1, %v7298_v34 }
  0xba   : > { %5682 = vmatmul.mubr.msk.f32.gmra.mrb[56].mxu1 %vm666_vm1, %v7298_v34  ;;  %1029 = vmatprep.mubr.f32.mxu0 %v10915_v10 }
  0xbb   : > { %1316 = vmatprep.mubr.f32.mxu1 %v10915_v10 }
  0xbd   : > { %5644 = vmatmul.mubr.msk.f32.gmra.mrb[58].mxu0 %vm666_vm1, %v7309_v27 }
  0xbe   : > { %5683 = vmatmul.mubr.msk.f32.gmra.mrb[58].mxu1 %vm666_vm1, %v7309_v27  ;;  %1035 = vmatprep.mubr.f32.mxu0 %v10915_v10 }
  0xbf   : > { %1322 = vmatprep.mubr.f32.mxu1 %v10915_v10 }
  0xc1   : > { %5645 = vmatmul.mubr.msk.f32.gmra.mrb[60].mxu0 %vm666_vm1, %v7320_v30 }
  0xc2   : > { %5684 = vmatmul.mubr.msk.f32.gmra.mrb[60].mxu1 %vm666_vm1, %v7320_v30  ;;  %1041 = vmatprep.mubr.f32.mxu0 %v10915_v10 }
  0xc3   : > { %1328 = vmatprep.mubr.f32.mxu1 %v10915_v10 }
  0xc5   : > { %5646 = vmatmul.mubr.msk.f32.gmra.mrb[62].mxu0 %vm666_vm1, %v7331_v31 }
  0xc6   : > { %5685 = vmatmul.mubr.msk.f32.gmra.mrb[62].mxu1 %vm666_vm1, %v7331_v31  ;;  %1047 = vmatprep.mubr.f32.mxu0 %v10915_v10 }
  0xc7   : > { %1334 = vmatprep.mubr.f32.mxu1 %v10915_v10 }
  0xc9   : > { %5647 = vmatmul.mubr.msk.f32.gmra.mrb[64].mxu0 %vm666_vm1, %v7342_v39 }
  0xca   : > { %5686 = vmatmul.mubr.msk.f32.gmra.mrb[64].mxu1 %vm666_vm1, %v7342_v39  ;;  %1053 = vmatprep.mubr.f32.mxu0 %v10915_v10 }
  0xcb   : > { %1340 = vmatprep.mubr.f32.mxu1 %v10915_v10 }
  0xcd   : > { %5648 = vmatmul.mubr.msk.f32.gmra.mrb[66].mxu0 %vm666_vm1, %v7353_v42 }
  0xce   : > { %5687 = vmatmul.mubr.msk.f32.gmra.mrb[66].mxu1 %vm666_vm1, %v7353_v42  ;;  %1059 = vmatprep.mubr.f32.mxu0 %v10915_v10 }
  0xcf   : > { %1346 = vmatprep.mubr.f32.mxu1 %v10915_v10 }
  0xd1   : > { %5649 = vmatmul.mubr.msk.f32.gmra.mrb[68].mxu0 %vm666_vm1, %v7364_v45 }
  0xd2   : > { %5688 = vmatmul.mubr.msk.f32.gmra.mrb[68].mxu1 %vm666_vm1, %v7364_v45  ;;  %1065 = vmatprep.mubr.f32.mxu0 %v10915_v10 }
  0xd3   : > { %1352 = vmatprep.mubr.f32.mxu1 %v10915_v10 }
  0xd5   : > { %5650 = vmatmul.mubr.msk.f32.gmra.mrb[70].mxu0 %vm666_vm1, %v7379_v49 }
  0xd6   : > { %5689 = vmatmul.mubr.msk.f32.gmra.mrb[70].mxu1 %vm666_vm1, %v7379_v49  ;;  %1071 = vmatprep.mubr.f32.mxu0 %v10915_v10 }
  0xd7   : > { %1358 = vmatprep.mubr.f32.mxu1 %v10915_v10 }
  0xd9   : > { %5651 = vmatmul.mubr.msk.f32.gmra.mrb[72].mxu0 %vm666_vm1, %v7394_v36 }
  0xda   : > { %5690 = vmatmul.mubr.msk.f32.gmra.mrb[72].mxu1 %vm666_vm1, %v7394_v36  ;;  %1441 = vmatprep.mubr.f32.mxu0 %v10915_v10 }
  0xdb   : > { %1728 = vmatprep.mubr.f32.mxu1 %v10915_v10 }
  0xdd   : > { %5693 = vmatmul.mubr.msk.f32.vlgmr.msra.gmra.mrb[74].mxu0 %vm666_vm1, %v6922_v55 }
  0xde   : > { %5732 = vmatmul.mubr.msk.f32.vlgmr.msra.gmra.mrb[74].mxu1 %vm666_vm1, %v6922_v55  ;;  %1447 = vmatprep.mubr.f32.mxu0 %v10915_v10 }
  0xdf   : > { %1734 = vmatprep.mubr.f32.mxu1 %v10915_v10  ;;  %6009 = vmatpush1.bf16.msra.mxu0 %v6008_v37 }
  0xe0   : > { %6013 = vmatpush1.bf16.msra.mxu1 %v11253_v56  ;;  %5769 = vmatprep.subr.msk.mxu0 %vm778_vm0, %v461_v47 }
  0xe1   : > { %5694 = vmatmul.mubr.msk.f32.gmra.mrb[76].mxu0 %vm666_vm1, %v6946_v6  ;;  %5808 = vmatprep.subr.msk.mxu1 %vm778_vm0, %v463_v3 }
  0xe2   : > { %5733 = vmatmul.mubr.msk.f32.gmra.mrb[76].mxu1 %vm666_vm1, %v6946_v6  ;;  %1453 = vmatprep.mubr.f32.mxu0 %v10915_v10 }
  0xe3   : > { %1740 = vmatprep.mubr.f32.mxu1 %v10915_v10  ;;  %5770 = vmatpush1.msk.msra.mxu0 %vm778_vm0, %v460_v51 }
  0xe4   : > { %5809 = vmatpush1.msk.msra.mxu1 %vm778_vm0, %v462_v9  ;;  %6015 = vmatprep.subr.bf16.mxu0 %v6887_v16 }
  0xe5   : > { %5695 = vmatmul.mubr.msk.f32.gmra.mrb[78].mxu0 %vm666_vm1, %v6960_v44  ;;  %6019 = vmatprep.subr.bf16.mxu1 %v6889_v20 }
  0xe6   : > { %5734 = vmatmul.mubr.msk.f32.gmra.mrb[78].mxu1 %vm666_vm1, %v6960_v44  ;;  %1459 = vmatprep.mubr.f32.mxu0 %v10915_v10 }
  0xe7   : > { %1746 = vmatprep.mubr.f32.mxu1 %v10915_v10 }
  0xe9   : > { %5696 = vmatmul.mubr.msk.f32.gmra.mrb[80].mxu0 %vm666_vm1, %v6972_v52 }
  0xea   : > { %5735 = vmatmul.mubr.msk.f32.gmra.mrb[80].mxu1 %vm666_vm1, %v6972_v52  ;;  %1465 = vmatprep.mubr.f32.mxu0 %v10915_v10 }
  0xeb   : > { %1752 = vmatprep.mubr.f32.mxu1 %v10915_v10 }
  0xed   : > { %5697 = vmatmul.mubr.msk.f32.gmra.mrb[82].mxu0 %vm666_vm1, %v6985_v58 }
  0xee   : > { %5736 = vmatmul.mubr.msk.f32.gmra.mrb[82].mxu1 %vm666_vm1, %v6985_v58  ;;  %1471 = vmatprep.mubr.f32.mxu0 %v10915_v10 }
  0xef   : > { %1758 = vmatprep.mubr.f32.mxu1 %v10915_v10 }
  0xf1   : > { %5698 = vmatmul.mubr.msk.f32.gmra.mrb[84].mxu0 %vm666_vm1, %v6998_v60 }
  0xf2   : > { %5737 = vmatmul.mubr.msk.f32.gmra.mrb[84].mxu1 %vm666_vm1, %v6998_v60  ;;  %1477 = vmatprep.mubr.f32.mxu0 %v10915_v10 }
  0xf3   : > { %1764 = vmatprep.mubr.f32.mxu1 %v10915_v10 }
  0xf5   : > { %5699 = vmatmul.mubr.msk.f32.gmra.mrb[86].mxu0 %vm666_vm1, %v7009_v61 }
  0xf6   : > { %5738 = vmatmul.mubr.msk.f32.gmra.mrb[86].mxu1 %vm666_vm1, %v7009_v61  ;;  %1483 = vmatprep.mubr.f32.mxu0 %v10915_v10 }
  0xf7   : > { %1770 = vmatprep.mubr.f32.mxu1 %v10915_v10 }
  0xf9   : > { %5700 = vmatmul.mubr.msk.f32.gmra.mrb[88].mxu0 %vm666_vm1, %v7020_v62 }
  0xfa   : > { %5739 = vmatmul.mubr.msk.f32.gmra.mrb[88].mxu1 %vm666_vm1, %v7020_v62  ;;  %1489 = vmatprep.mubr.f32.mxu0 %v10915_v10 }
  0xfb   : > { %1776 = vmatprep.mubr.f32.mxu1 %v10915_v10 }
  0xfd   : > { %5701 = vmatmul.mubr.msk.f32.gmra.mrb[90].mxu0 %vm666_vm1, %v7031_v63 }
  0xfe   : > { %5740 = vmatmul.mubr.msk.f32.gmra.mrb[90].mxu1 %vm666_vm1, %v7031_v63  ;;  %1495 = vmatprep.mubr.f32.mxu0 %v10915_v10 }
  0xff   : > { %1782 = vmatprep.mubr.f32.mxu1 %v10915_v10 }
 0x101   : > { %5702 = vmatmul.mubr.msk.f32.gmra.mrb[92].mxu0 %vm666_vm1, %v7042_v0 }
 0x102   : > { %5741 = vmatmul.mubr.msk.f32.gmra.mrb[92].mxu1 %vm666_vm1, %v7042_v0  ;;  %1501 = vmatprep.mubr.f32.mxu0 %v10915_v10 }
 0x103   : > { %1788 = vmatprep.mubr.f32.mxu1 %v10915_v10 }
 0x105   : > { %5703 = vmatmul.mubr.msk.f32.gmra.mrb[94].mxu0 %vm666_vm1, %v7053_v1 }
 0x106   : > { %5742 = vmatmul.mubr.msk.f32.gmra.mrb[94].mxu1 %vm666_vm1, %v7053_v1  ;;  %1507 = vmatprep.mubr.f32.mxu0 %v10915_v10 }
 0x107   : > { %1794 = vmatprep.mubr.f32.mxu1 %v10915_v10 }
 0x109   : > { %5704 = vmatmul.mubr.msk.f32.gmra.mrb[96].mxu0 %vm666_vm1, %v7064_v2 }
 0x10a   : > { %5743 = vmatmul.mubr.msk.f32.gmra.mrb[96].mxu1 %vm666_vm1, %v7064_v2  ;;  %1513 = vmatprep.mubr.f32.mxu0 %v10915_v10 }
 0x10b   : > { %1800 = vmatprep.mubr.f32.mxu1 %v10915_v10 }
 0x10d   : > { %5705 = vmatmul.mubr.msk.f32.gmra.mrb[98].mxu0 %vm666_vm1, %v7094_v32 }
 0x10e   : > { %5744 = vmatmul.mubr.msk.f32.gmra.mrb[98].mxu1 %vm666_vm1, %v7094_v32  ;;  %1519 = vmatprep.mubr.f32.mxu0 %v10915_v10 }
 0x10f   : > { %1806 = vmatprep.mubr.f32.mxu1 %v10915_v10 }
 0x111   : > { %5706 = vmatmul.mubr.msk.f32.gmra.mrb[100].mxu0 %vm666_vm1, %v7121_v33 }
 0x112   : > { %5745 = vmatmul.mubr.msk.f32.gmra.mrb[100].mxu1 %vm666_vm1, %v7121_v33  ;;  %1525 = vmatprep.mubr.f32.mxu0 %v10915_v10 }
 0x113   : > { %1812 = vmatprep.mubr.f32.mxu1 %v10915_v10 }
 0x115   : > { %5707 = vmatmul.mubr.msk.f32.gmra.mrb[102].mxu0 %vm666_vm1, %v7136_v53 }
 0x116   : > { %5746 = vmatmul.mubr.msk.f32.gmra.mrb[102].mxu1 %vm666_vm1, %v7136_v53  ;;  %1531 = vmatprep.mubr.f32.mxu0 %v10915_v10 }
 0x117   : > { %1818 = vmatprep.mubr.f32.mxu1 %v10915_v10 }
 0x119   : > { %5708 = vmatmul.mubr.msk.f32.gmra.mrb[104].mxu0 %vm666_vm1, %v7155_v12 }
 0x11a   : > { %5747 = vmatmul.mubr.msk.f32.gmra.mrb[104].mxu1 %vm666_vm1, %v7155_v12  ;;  %1537 = vmatprep.mubr.f32.mxu0 %v10915_v10 }
 0x11b   : > { %1824 = vmatprep.mubr.f32.mxu1 %v10915_v10 }
 0x11c   : > { %v7511_v16 = vpop.f32.mrb[0].mxu0 }
 0x11d   : > { %v7513_v20 = vpop.f32.mrb[0].mxu1  ;;  %v7515_v55 = vpop.f32.mrb[1].mxu0  ;;  %5709 = vmatmul.mubr.msk.f32.gmra.mrb[106].mxu0 %vm666_vm1, %v7166_v13 }
 0x11e   : > { %v7519_v6 = vpop.f32.mrb[1].mxu1  ;;  %5748 = vmatmul.mubr.msk.f32.gmra.mrb[106].mxu1 %vm666_vm1, %v7166_v13  ;;  %1543 = vmatprep.mubr.f32.mxu0 %v10915_v10 }
 0x11f   : > { %1830 = vmatprep.mubr.f32.mxu1 %v10915_v10 }
 0x120   : > { %v7525_v44 = vpop.f32.mrb[2].mxu0 }
 0x121   : > { %v7527_v52 = vpop.f32.mrb[2].mxu1  ;;  %v7529_v58 = vpop.f32.mrb[3].mxu0  ;;  %5710 = vmatmul.mubr.msk.f32.gmra.mrb[108].mxu0 %vm666_vm1, %v7177_v40 }
 0x122   : > { %v7533_v60 = vpop.f32.mrb[3].mxu1  ;;  %5749 = vmatmul.mubr.msk.f32.gmra.mrb[108].mxu1 %vm666_vm1, %v7177_v40  ;;  %1549 = vmatprep.mubr.f32.mxu0 %v10915_v10 }
 0x123   : > { %1836 = vmatprep.mubr.f32.mxu1 %v10915_v10 }
 0x124   : > { %v7539_v61 = vpop.f32.mrb[4].mxu0 }
 0x125   : > { %v7541_v62 = vpop.f32.mrb[4].mxu1  ;;  %v7543_v63 = vpop.f32.mrb[5].mxu0  ;;  %5711 = vmatmul.mubr.msk.f32.gmra.mrb[110].mxu0 %vm666_vm1, %v7188_v14 }
 0x126   : > { %v7547_v0 = vpop.f32.mrb[5].mxu1  ;;  %5750 = vmatmul.mubr.msk.f32.gmra.mrb[110].mxu1 %vm666_vm1, %v7188_v14  ;;  %1555 = vmatprep.mubr.f32.mxu0 %v10915_v10 }
 0x127   : > { %1842 = vmatprep.mubr.f32.mxu1 %v10915_v10 }
 0x128   : > { %v7553_v1 = vpop.f32.mrb[6].mxu0 }
 0x129   : > { %v7555_v2 = vpop.f32.mrb[6].mxu1  ;;  %v7557_v32 = vpop.f32.mrb[7].mxu0  ;;  %5712 = vmatmul.mubr.msk.f32.gmra.mrb[112].mxu0 %vm666_vm1, %v7199_v15 }
 0x12a   : > { %v7561_v33 = vpop.f32.mrb[7].mxu1  ;;  %5751 = vmatmul.mubr.msk.f32.gmra.mrb[112].mxu1 %vm666_vm1, %v7199_v15  ;;  %1561 = vmatprep.mubr.f32.mxu0 %v10915_v10 }
 0x12b   : > { %1848 = vmatprep.mubr.f32.mxu1 %v10915_v10 }
 0x12c   : > { %v7567_v50 = vpop.f32.mrb[8].mxu0 }
 0x12d   : > { %v7569_v48 = vpop.f32.mrb[8].mxu1  ;;  %v7571_v53 = vpop.f32.mrb[9].mxu0  ;;  %5713 = vmatmul.mubr.msk.f32.gmra.mrb[114].mxu0 %vm666_vm1, %v7210_v17 }
 0x12e   : > { %11254 = vst [vmem:[#allocation9_spill] sm:$0xff] %v7571_v53  ;;  %v7575_v57 = vpop.f32.mrb[9].mxu1  ;;  %5752 = vmatmul.mubr.msk.f32.gmra.mrb[114].mxu1 %vm666_vm1, %v7210_v17  ;;  %1567 = vmatprep.mubr.f32.mxu0 %v10915_v10 }
 0x12f   : > { %11255 = vst [vmem:[#allocation10_spill] sm:$0xff] %v7575_v57  ;;  %1854 = vmatprep.mubr.f32.mxu1 %v10915_v10 }
 0x130   : > { %v7581_v37 = vpop.f32.mrb[10].mxu0 }
 0x131   : > { %11256 = vst [vmem:[#allocation11_spill] sm:$0xff] %v7581_v37  ;;  %v7583_v38 = vpop.f32.mrb[10].mxu1  ;;  %v7585_v8 = vpop.f32.mrb[11].mxu0  ;;  %5714 = vmatmul.mubr.msk.f32.gmra.mrb[116].mxu0 %vm666_vm1, %v7221_v18 }
 0x132   : > { %11257 = vst [vmem:[#allocation12_spill] sm:$0xff] %v7583_v38  ;;  %11258 = vst [vmem:[#allocation13_spill] sm:$0xff] %v7585_v8  ;;  %v7589_v12 = vpop.f32.mrb[11].mxu1  ;;  %5753 = vmatmul.mubr.msk.f32.gmra.mrb[116].mxu1 %vm666_vm1, %v7221_v18  ;;  %1573 = vmatprep.mubr.f32.mxu0 %v10915_v10  ;;  %v8216_v38 = vld [vmem:[%s10905_s3 + $0xa8] sm:$0xff] }
 0x133   : > { %11259 = vst [vmem:[#allocation14_spill] sm:$0xff] %v7589_v12  ;;  %1860 = vmatprep.mubr.f32.mxu1 %v10915_v10  ;;  %11394 = vst [vmem:[#allocation148_spill] sm:$0xff] %v8216_v38 }
 0x134   : > { %v7595_v13 = vpop.f32.mrb[12].mxu0 }
 0x135   : > { %11260 = vst [vmem:[#allocation15_spill] sm:$0xff] %v7595_v13  ;;  %v7597_v40 = vpop.f32.mrb[12].mxu1  ;;  %v7599_v14 = vpop.f32.mrb[13].mxu0  ;;  %5715 = vmatmul.mubr.msk.f32.gmra.mrb[118].mxu0 %vm666_vm1, %v7232_v19 }
 0x136   : > { %11261 = vst [vmem:[#allocation16_spill] sm:$0xff] %v7597_v40  ;;  %11262 = vst [vmem:[#allocation17_spill] sm:$0xff] %v7599_v14  ;;  %v7603_v15 = vpop.f32.mrb[13].mxu1  ;;  %5754 = vmatmul.mubr.msk.f32.gmra.mrb[118].mxu1 %vm666_vm1, %v7232_v19  ;;  %1579 = vmatprep.mubr.f32.mxu0 %v10915_v10  ;;  %v8197_v14 = vld [vmem:[%s10905_s3 + $0xa0] sm:$0xff] }
 0x137   : > { %11263 = vst [vmem:[#allocation18_spill] sm:$0xff] %v7603_v15  ;;  %1866 = vmatprep.mubr.f32.mxu1 %v10915_v10  ;;  %11390 = vst [vmem:[#allocation144_spill] sm:$0xff] %v8197_v14 }
 0x138   : > { %v7609_v17 = vpop.f32.mrb[14].mxu0 }
 0x139   : > { %11264 = vst [vmem:[#allocation19_spill] sm:$0xff] %v7609_v17  ;;  %v7611_v18 = vpop.f32.mrb[14].mxu1  ;;  %v7613_v4 = vpop.f32.mrb[15].mxu0  ;;  %5716 = vmatmul.mubr.msk.f32.gmra.mrb[120].mxu0 %vm666_vm1, %v7243_v21 }
 0x13a   : > { %11265 = vst [vmem:[#allocation20_spill] sm:$0xff] %v7611_v18  ;;  %11266 = vst [vmem:[#allocation21_spill] sm:$0xff] %v7613_v4  ;;  %v7617_v5 = vpop.f32.mrb[15].mxu1  ;;  %5755 = vmatmul.mubr.msk.f32.gmra.mrb[120].mxu1 %vm666_vm1, %v7243_v21  ;;  %1585 = vmatprep.mubr.f32.mxu0 %v10915_v10 }
 0x13b   : > { %11267 = vst [vmem:[#allocation22_spill] sm:$0xff] %v7617_v5  ;;  %1872 = vmatprep.mubr.f32.mxu1 %v10915_v10  ;;  %v8178_v5 = vld [vmem:[%s10905_s3 + $0x98] sm:$0xff] }
 0x13c   : > { %v7623_v19 = vpop.f32.mrb[16].mxu0 }
 0x13d   : > { %11268 = vst [vmem:[#allocation23_spill] sm:$0xff] %v7623_v19  ;;  %v7625_v46 = vpop.f32.mrb[16].mxu1  ;;  %v7627_v35 = vpop.f32.mrb[17].mxu0  ;;  %5717 = vmatmul.mubr.msk.f32.gmra.mrb[122].mxu0 %vm666_vm1, %v7254_v22 }
 0x13e   : > { %11269 = vst [vmem:[#allocation24_spill] sm:$0xff] %v7625_v46  ;;  %11270 = vst [vmem:[#allocation25_spill] sm:$0xff] %v7627_v35  ;;  %v7631_v7 = vpop.f32.mrb[17].mxu1  ;;  %5756 = vmatmul.mubr.msk.f32.gmra.mrb[122].mxu1 %vm666_vm1, %v7254_v22  ;;  %1591 = vmatprep.mubr.f32.mxu0 %v10915_v10 }
 0x13f   : > { %11271 = vst [vmem:[#allocation26_spill] sm:$0xff] %v7631_v7  ;;  %1878 = vmatprep.mubr.f32.mxu1 %v10915_v10 }
 0x140   : > { %v7637_v21 = vpop.f32.mrb[18].mxu0 }
 0x141   : > { %11272 = vst [vmem:[#allocation27_spill] sm:$0xff] %v7637_v21  ;;  %v7639_v47 = vpop.f32.mrb[18].mxu1  ;;  %v7641_v3 = vpop.f32.mrb[19].mxu0  ;;  %5718 = vmatmul.mubr.msk.f32.gmra.mrb[124].mxu0 %vm666_vm1, %v7265_v23  ;;  %v8159_v21 = vld [vmem:[%s10905_s3 + $0x90] sm:$0xff] }
 0x142   : > { %11273 = vst [vmem:[#allocation28_spill] sm:$0xff] %v7639_v47  ;;  %11274 = vst [vmem:[#allocation29_spill] sm:$0xff] %v7641_v3  ;;  %v7645_v51 = vpop.f32.mrb[19].mxu1  ;;  %5757 = vmatmul.mubr.msk.f32.gmra.mrb[124].mxu1 %vm666_vm1, %v7265_v23  ;;  %1597 = vmatprep.mubr.f32.mxu0 %v10915_v10 }
 0x143   : > { %11275 = vst [vmem:[#allocation30_spill] sm:$0xff] %v7645_v51  ;;  %1884 = vmatprep.mubr.f32.mxu1 %v10915_v10 }
 0x144   : > { %v7651_v22 = vpop.f32.mrb[20].mxu0 }
 0x145   : > { %11276 = vst [vmem:[#allocation31_spill] sm:$0xff] %v7651_v22  ;;  %v7653_v56 = vpop.f32.mrb[20].mxu1  ;;  %v7655_v9 = vpop.f32.mrb[21].mxu0  ;;  %5719 = vmatmul.mubr.msk.f32.gmra.mrb[126].mxu0 %vm666_vm1, %v7276_v25 }
 0x146   : > { %11277 = vst [vmem:[#allocation32_spill] sm:$0xff] %v7653_v56  ;;  %11278 = vst [vmem:[#allocation33_spill] sm:$0xff] %v7655_v9  ;;  %v7659_v11 = vpop.f32.mrb[21].mxu1  ;;  %5758 = vmatmul.mubr.msk.f32.gmra.mrb[126].mxu1 %vm666_vm1, %v7276_v25  ;;  %1603 = vmatprep.mubr.f32.mxu0 %v10915_v10 }
 0x147   : > { %11279 = vst [vmem:[#allocation34_spill] sm:$0xff] %v7659_v11  ;;  %1890 = vmatprep.mubr.f32.mxu1 %v10915_v10 }
 0x148   : > { %v7665_v23 = vpop.f32.mrb[22].mxu0 }
 0x149   : > { %11280 = vst [vmem:[#allocation35_spill] sm:$0xff] %v7665_v23  ;;  %v7667_v28 = vpop.f32.mrb[22].mxu1  ;;  %v7669_v22 = vpop.f32.mrb[23].mxu0  ;;  %5720 = vmatmul.mubr.msk.f32.gmra.mrb[128].mxu0 %vm666_vm1, %v7287_v26 }
 0x14a   : > { %11281 = vst [vmem:[#allocation36_spill] sm:$0xff] %v7667_v28  ;;  %11282 = vst [vmem:[#allocation37_spill] sm:$0xff] %v7669_v22  ;;  %v7673_v9 = vpop.f32.mrb[23].mxu1  ;;  %5759 = vmatmul.mubr.msk.f32.gmra.mrb[128].mxu1 %vm666_vm1, %v7287_v26  ;;  %1609 = vmatprep.mubr.f32.mxu0 %v10915_v10  ;;  %v8140_v28 = vld [vmem:[%s10905_s3 + $0x88] sm:$0xff] }
 0x14b   : > { %11283 = vst [vmem:[#allocation38_spill] sm:$0xff] %v7673_v9  ;;  %1896 = vmatprep.mubr.f32.mxu1 %v10915_v10 }
 0x14c   : > { %v7679_v25 = vpop.f32.mrb[24].mxu0 }
 0x14d   : > { %11284 = vst [vmem:[#allocation39_spill] sm:$0xff] %v7679_v25  ;;  %v7681_v11 = vpop.f32.mrb[24].mxu1  ;;  %v7683_v23 = vpop.f32.mrb[25].mxu0  ;;  %5721 = vmatmul.mubr.msk.f32.gmra.mrb[130].mxu0 %vm666_vm1, %v7298_v34 }
 0x14e   : > { %11285 = vst [vmem:[#allocation40_spill] sm:$0xff] %v7681_v11  ;;  %11286 = vst [vmem:[#allocation41_spill] sm:$0xff] %v7683_v23  ;;  %v7687_v22 = vpop.f32.mrb[25].mxu1  ;;  %5760 = vmatmul.mubr.msk.f32.gmra.mrb[130].mxu1 %vm666_vm1, %v7298_v34  ;;  %1615 = vmatprep.mubr.f32.mxu0 %v10915_v10  ;;  %v8121_v11 = vld [vmem:[%s10905_s3 + $0x80] sm:$0xff] }
 0x14f   : > { %11287 = vst [vmem:[#allocation42_spill] sm:$0xff] %v7687_v22  ;;  %1902 = vmatprep.mubr.f32.mxu1 %v10915_v10 }
 0x150   : > { %v7693_v26 = vpop.f32.mrb[26].mxu0 }
 0x151   : > { %11288 = vst [vmem:[#allocation43_spill] sm:$0xff] %v7693_v26  ;;  %v7695_v9 = vpop.f32.mrb[26].mxu1  ;;  %v7697_v25 = vpop.f32.mrb[27].mxu0  ;;  %5722 = vmatmul.mubr.msk.f32.gmra.mrb[132].mxu0 %vm666_vm1, %v7309_v27 }
 0x152   : > { %11289 = vst [vmem:[#allocation44_spill] sm:$0xff] %v7695_v9  ;;  %11290 = vst [vmem:[#allocation45_spill] sm:$0xff] %v7697_v25  ;;  %v7701_v23 = vpop.f32.mrb[27].mxu1  ;;  %5761 = vmatmul.mubr.msk.f32.gmra.mrb[132].mxu1 %vm666_vm1, %v7309_v27  ;;  %1621 = vmatprep.mubr.f32.mxu0 %v10915_v10  ;;  %v8102_v9 = vld [vmem:[%s10905_s3 + $0x78] sm:$0xff] }
 0x153   : > { %11291 = vst [vmem:[#allocation46_spill] sm:$0xff] %v7701_v23  ;;  %1908 = vmatprep.mubr.f32.mxu1 %v10915_v10 }
 0x154   : > { %v7707_v34 = vpop.f32.mrb[28].mxu0 }
 0x155   : > { %11292 = vst [vmem:[#allocation47_spill] sm:$0xff] %v7707_v34  ;;  %v7709_v22 = vpop.f32.mrb[28].mxu1  ;;  %v7711_v26 = vpop.f32.mrb[29].mxu0  ;;  %5723 = vmatmul.mubr.msk.f32.gmra.mrb[134].mxu0 %vm666_vm1, %v7320_v30 }
 0x156   : > { %11293 = vst [vmem:[#allocation48_spill] sm:$0xff] %v7709_v22  ;;  %11294 = vst [vmem:[#allocation49_spill] sm:$0xff] %v7711_v26  ;;  %v7715_v25 = vpop.f32.mrb[29].mxu1  ;;  %5762 = vmatmul.mubr.msk.f32.gmra.mrb[134].mxu1 %vm666_vm1, %v7320_v30  ;;  %1627 = vmatprep.mubr.f32.mxu0 %v10915_v10  ;;  %v8083_v22 = vld [vmem:[%s10905_s3 + $0x70] sm:$0xff] }
 0x157   : > { %11295 = vst [vmem:[#allocation50_spill] sm:$0xff] %v7715_v25  ;;  %1914 = vmatprep.mubr.f32.mxu1 %v10915_v10 }
 0x158   : > { %v7721_v27 = vpop.f32.mrb[30].mxu0 }
 0x159   : > { %11296 = vst [vmem:[#allocation51_spill] sm:$0xff] %v7721_v27  ;;  %v7723_v23 = vpop.f32.mrb[30].mxu1  ;;  %v7725_v34 = vpop.f32.mrb[31].mxu0  ;;  %5724 = vmatmul.mubr.msk.f32.gmra.mrb[136].mxu0 %vm666_vm1, %v7331_v31 }
 0x15a   : > { %11297 = vst [vmem:[#allocation52_spill] sm:$0xff] %v7723_v23  ;;  %11298 = vst [vmem:[#allocation53_spill] sm:$0xff] %v7725_v34  ;;  %v7729_v26 = vpop.f32.mrb[31].mxu1  ;;  %5763 = vmatmul.mubr.msk.f32.gmra.mrb[136].mxu1 %vm666_vm1, %v7331_v31  ;;  %1633 = vmatprep.mubr.f32.mxu0 %v10915_v10  ;;  %v8064_v23 = vld [vmem:[%s10905_s3 + $0x68] sm:$0xff] }
 0x15b   : > { %11299 = vst [vmem:[#allocation54_spill] sm:$0xff] %v7729_v26  ;;  %1920 = vmatprep.mubr.f32.mxu1 %v10915_v10 }
 0x15c   : > { %v7735_v30 = vpop.f32.mrb[32].mxu0 }
 0x15d   : > { %11300 = vst [vmem:[#allocation55_spill] sm:$0xff] %v7735_v30  ;;  %v7737_v25 = vpop.f32.mrb[32].mxu1  ;;  %v7739_v27 = vpop.f32.mrb[33].mxu0  ;;  %5725 = vmatmul.mubr.msk.f32.gmra.mrb[138].mxu0 %vm666_vm1, %v7342_v39 }
 0x15e   : > { %11301 = vst [vmem:[#allocation56_spill] sm:$0xff] %v7737_v25  ;;  %11302 = vst [vmem:[#allocation57_spill] sm:$0xff] %v7739_v27  ;;  %v7743_v34 = vpop.f32.mrb[33].mxu1  ;;  %5764 = vmatmul.mubr.msk.f32.gmra.mrb[138].mxu1 %vm666_vm1, %v7342_v39  ;;  %1639 = vmatprep.mubr.f32.mxu0 %v10915_v10  ;;  %v8045_v25 = vld [vmem:[%s10905_s3 + $0x60] sm:$0xff] }
 0x15f   : > { %11303 = vst [vmem:[#allocation58_spill] sm:$0xff] %v7743_v34  ;;  %1926 = vmatprep.mubr.f32.mxu1 %v10915_v10 }
 0x160   : > { %v7749_v31 = vpop.f32.mrb[34].mxu0 }
 0x161   : > { %11304 = vst [vmem:[#allocation59_spill] sm:$0xff] %v7749_v31  ;;  %v7751_v26 = vpop.f32.mrb[34].mxu1  ;;  %v7753_v30 = vpop.f32.mrb[35].mxu0  ;;  %5726 = vmatmul.mubr.msk.f32.gmra.mrb[140].mxu0 %vm666_vm1, %v7353_v42 }
 0x162   : > { %11305 = vst [vmem:[#allocation60_spill] sm:$0xff] %v7751_v26  ;;  %11306 = vst [vmem:[#allocation61_spill] sm:$0xff] %v7753_v30  ;;  %v7757_v27 = vpop.f32.mrb[35].mxu1  ;;  %5765 = vmatmul.mubr.msk.f32.gmra.mrb[140].mxu1 %vm666_vm1, %v7353_v42  ;;  %1645 = vmatprep.mubr.f32.mxu0 %v10915_v10  ;;  %v8026_v26 = vld [vmem:[%s10905_s3 + $0x58] sm:$0xff] }
 0x163   : > { %11307 = vst [vmem:[#allocation62_spill] sm:$0xff] %v7757_v27  ;;  %1932 = vmatprep.mubr.f32.mxu1 %v10915_v10 }
 0x164   : > { %v7763_v39 = vpop.f32.mrb[36].mxu0 }
 0x165   : > { %11308 = vst [vmem:[#allocation63_spill] sm:$0xff] %v7763_v39  ;;  %v7765_v34 = vpop.f32.mrb[36].mxu1  ;;  %v7767_v31 = vpop.f32.mrb[37].mxu0  ;;  %5727 = vmatmul.mubr.msk.f32.gmra.mrb[142].mxu0 %vm666_vm1, %v7364_v45 }
 0x166   : > { %11309 = vst [vmem:[#allocation64_spill] sm:$0xff] %v7765_v34  ;;  %11310 = vst [vmem:[#allocation65_spill] sm:$0xff] %v7767_v31  ;;  %v7771_v30 = vpop.f32.mrb[37].mxu1  ;;  %5766 = vmatmul.mubr.msk.f32.gmra.mrb[142].mxu1 %vm666_vm1, %v7364_v45  ;;  %1651 = vmatprep.mubr.f32.mxu0 %v10915_v10  ;;  %v8007_v34 = vld [vmem:[%s10905_s3 + $0x50] sm:$0xff] }
 0x167   : > { %11311 = vst [vmem:[#allocation66_spill] sm:$0xff] %v7771_v30  ;;  %1938 = vmatprep.mubr.f32.mxu1 %v10915_v10 }
 0x168   : > { %v7777_v42 = vpop.f32.mrb[38].mxu0 }
 0x169   : > { %11312 = vst [vmem:[#allocation67_spill] sm:$0xff] %v7777_v42  ;;  %v7779_v27 = vpop.f32.mrb[38].mxu1  ;;  %v7781_v39 = vpop.f32.mrb[39].mxu0  ;;  %5728 = vmatmul.mubr.msk.f32.gmra.mrb[144].mxu0 %vm666_vm1, %v7379_v49 }
 0x16a   : > { %11313 = vst [vmem:[#allocation68_spill] sm:$0xff] %v7779_v27  ;;  %11314 = vst [vmem:[#allocation69_spill] sm:$0xff] %v7781_v39  ;;  %v7785_v31 = vpop.f32.mrb[39].mxu1  ;;  %5767 = vmatmul.mubr.msk.f32.gmra.mrb[144].mxu1 %vm666_vm1, %v7379_v49  ;;  %1657 = vmatprep.mubr.f32.mxu0 %v10915_v10  ;;  %v7807_v49 = vld [vmem:[%s10905_s3] sm:$0xff]  ;;  %v7988_v27 = vld [vmem:[%s10905_s3 + $0x48] sm:$0xff] }
 0x16b   : > { %11315 = vst [vmem:[#allocation70_spill] sm:$0xff] %v7785_v31  ;;  %1944 = vmatprep.mubr.f32.mxu1 %v10915_v10  ;;  %v7969_v31 = vld [vmem:[%s10905_s3 + $0x40] sm:$0xff] }
 0x16c   : > { %v7791_v45 = vpop.f32.mrb[40].mxu0 }
 0x16d   : > { %11316 = vst [vmem:[#allocation71_spill] sm:$0xff] %v7791_v45  ;;  %v7793_v30 = vpop.f32.mrb[40].mxu1  ;;  %v7795_v42 = vpop.f32.mrb[41].mxu0  ;;  %5729 = vmatmul.mubr.msk.f32.gmra.mrb[146].mxu0 %vm666_vm1, %v7394_v36 }
 0x16e   : > { %11317 = vst [vmem:[#allocation72_spill] sm:$0xff] %v7793_v30  ;;  %11318 = vst [vmem:[#allocation73_spill] sm:$0xff] %v7795_v42  ;;  %v7799_v39 = vpop.f32.mrb[41].mxu1  ;;  %5768 = vmatmul.mubr.msk.f32.gmra.mrb[146].mxu1 %vm666_vm1, %v7394_v36  ;;  %2138 = vmatprep.mubr.f32.mxu0 %v10915_v10  ;;  %v7826_v36 = vld [vmem:[%s10905_s3 + $0x8] sm:$0xff] }
 0x16f   : > { %11319 = vst [vmem:[#allocation74_spill] sm:$0xff] %v7799_v39  ;;  %2425 = vmatprep.mubr.f32.mxu1 %v10915_v10 }
 0x170   : > { %v7810_v30 = vpop.f32.mrb[42].mxu0 }
 0x171   : > { %11320 = vst [vmem:[#allocation75_spill] sm:$0xff] %v7810_v30  ;;  %v7812_v42 = vpop.f32.mrb[42].mxu1  ;;  %v7814_v45 = vpop.f32.mrb[43].mxu0  ;;  %5771 = vmatmul.mubr.msk.f32.vlgmr.msra.gmra.mrb[148].mxu0 %vm666_vm1, %v7807_v49  ;;  %v7950_v30 = vld [vmem:[%s10905_s3 + $0x38] sm:$0xff] }
 0x172   : > { %11321 = vst [vmem:[#allocation76_spill] sm:$0xff] %v7812_v42  ;;  %11322 = vst [vmem:[#allocation77_spill] sm:$0xff] %v7814_v45  ;;  %v7818_v39 = vpop.f32.mrb[43].mxu1  ;;  %5810 = vmatmul.mubr.msk.f32.vlgmr.msra.gmra.mrb[148].mxu1 %vm666_vm1, %v7807_v49  ;;  %2144 = vmatprep.mubr.f32.mxu0 %v10915_v10 }
 0x173   : > { %11323 = vst [vmem:[#allocation78_spill] sm:$0xff] %v7818_v39  ;;  %2431 = vmatprep.mubr.f32.mxu1 %v10915_v10  ;;  %6017 = vmatpush1.bf16.msra.mxu0 %v6893_v24  ;;  %v11328_v24 = vmov 0.0  }
 0x174   : > { %v7830_v45 = vpop.f32.mrb[44].mxu0  ;;  %6021 = vmatpush1.bf16.msra.mxu1 %v6899_v29  ;;  %5847 = vmatprep.subr.msk.mxu0 %vm778_vm0, %v6902_v41  ;;  %v7851_v29 = vld [vmem:[%s10905_s3 + $0x10] sm:$0xff] }
 0x175   : > { %11324 = vst [vmem:[#allocation79_spill] sm:$0xff] %v7830_v45  ;;  %v7835_v39 = vpop.f32.mrb[44].mxu1  ;;  %v7837_v42 = vpop.f32.mrb[45].mxu0  ;;  %5772 = vmatmul.mubr.msk.f32.gmra.mrb[150].mxu0 %vm666_vm1, %v7826_v36  ;;  %5886 = vmatprep.subr.msk.mxu1 %vm778_vm0, %v6907_v43  ;;  %v7931_v45 = vld [vmem:[%s10905_s3 + $0x30] sm:$0xff] }
 0x176   : > { %11325 = vst [vmem:[#allocation80_spill] sm:$0xff] %v7835_v39  ;;  %11326 = vst [vmem:[#allocation81_spill] sm:$0xff] %v7837_v42  ;;  %v7843_v10 = vpop.f32.mrb[45].mxu1  ;;  %5811 = vmatmul.mubr.msk.f32.gmra.mrb[150].mxu1 %vm666_vm1, %v7826_v36  ;;  %2150 = vmatprep.mubr.f32.mxu0 %v11328_v24  ;;  %v7912_v39 = vld [vmem:[%s10905_s3 + $0x28] sm:$0xff] }
 0x177   : > { %11327 = vst [vmem:[#allocation82_spill] sm:$0xff] %v7843_v10  ;;  %2437 = vmatprep.mubr.f32.mxu1 %v11328_v24  ;;  %5848 = vmatpush1.msk.msra.mxu0 %vm778_vm0, %v6917_v54  ;;  %v7874_v54 = vld [vmem:[%s10905_s3 + $0x18] sm:$0xff] }
 0x178   : > { %v7856_v41 = vpop.f32.mrb[46].mxu0  ;;  %5887 = vmatpush1.msk.msra.mxu1 %vm778_vm0, %v6926_v59 }
 0x179   : > { %11329 = vst [vmem:[#allocation83_spill] sm:$0xff] %v7856_v41  ;;  %v7860_v43 = vpop.f32.mrb[46].mxu1  ;;  %v7862_v10 = vpop.f32.mrb[47].mxu0  ;;  %5773 = vmatmul.mubr.msk.f32.gmra.mrb[152].mxu0 %vm666_vm1, %v7851_v29  ;;  %v7893_v41 = vld [vmem:[%s10905_s3 + $0x20] sm:$0xff] }
 0x17a   : > { %11330 = vst [vmem:[#allocation84_spill] sm:$0xff] %v7860_v43  ;;  %11331 = vst [vmem:[#allocation85_spill] sm:$0xff] %v7862_v10  ;;  %v7866_v42 = vpop.f32.mrb[47].mxu1  ;;  %5812 = vmatmul.mubr.msk.f32.gmra.mrb[152].mxu1 %vm666_vm1, %v7851_v29  ;;  %2156 = vmatprep.mubr.f32.mxu0 %v11328_v24 }
 0x17b   : > { %11332 = vst [vmem:[#allocation86_spill] sm:$0xff] %v7866_v42  ;;  %2443 = vmatprep.mubr.f32.mxu1 %v11328_v24 }
 0x17c   : > { %v7877_v59 = vpop.f32.mrb[48].mxu0 }
 0x17d   : > { %11333 = vst [vmem:[#allocation87_spill] sm:$0xff] %v7877_v59  ;;  %v7879_v10 = vpop.f32.mrb[48].mxu1  ;;  %v7881_v43 = vpop.f32.mrb[49].mxu0  ;;  %5774 = vmatmul.mubr.msk.f32.gmra.mrb[154].mxu0 %vm666_vm1, %v7874_v54 }
 0x17e   : > { %11334 = vst [vmem:[#allocation88_spill] sm:$0xff] %v7879_v10  ;;  %11335 = vst [vmem:[#allocation89_spill] sm:$0xff] %v7881_v43  ;;  %v7885_v42 = vpop.f32.mrb[49].mxu1  ;;  %5813 = vmatmul.mubr.msk.f32.gmra.mrb[154].mxu1 %vm666_vm1, %v7874_v54  ;;  %2162 = vmatprep.mubr.f32.mxu0 %v11328_v24 }
 0x17f   : > { %11336 = vst [vmem:[#allocation90_spill] sm:$0xff] %v7885_v42  ;;  %2449 = vmatprep.mubr.f32.mxu1 %v11328_v24 }
 0x180   : > { %v7896_v10 = vpop.f32.mrb[50].mxu0 }
 0x181   : > { %11337 = vst [vmem:[#allocation91_spill] sm:$0xff] %v7896_v10  ;;  %v7898_v43 = vpop.f32.mrb[50].mxu1  ;;  %v7900_v59 = vpop.f32.mrb[51].mxu0  ;;  %5775 = vmatmul.mubr.msk.f32.gmra.mrb[156].mxu0 %vm666_vm1, %v7893_v41 }
 0x182   : > { %11338 = vst [vmem:[#allocation92_spill] sm:$0xff] %v7898_v43  ;;  %11339 = vst [vmem:[#allocation93_spill] sm:$0xff] %v7900_v59  ;;  %v7904_v42 = vpop.f32.mrb[51].mxu1  ;;  %5814 = vmatmul.mubr.msk.f32.gmra.mrb[156].mxu1 %vm666_vm1, %v7893_v41  ;;  %2168 = vmatprep.mubr.f32.mxu0 %v11328_v24 }
 0x183   : > { %11340 = vst [vmem:[#allocation94_spill] sm:$0xff] %v7904_v42  ;;  %2455 = vmatprep.mubr.f32.mxu1 %v11328_v24 }
 0x184   : > { %v7915_v43 = vpop.f32.mrb[52].mxu0 }
 0x185   : > { %11341 = vst [vmem:[#allocation95_spill] sm:$0xff] %v7915_v43  ;;  %v7917_v59 = vpop.f32.mrb[52].mxu1  ;;  %v7919_v10 = vpop.f32.mrb[53].mxu0  ;;  %5776 = vmatmul.mubr.msk.f32.gmra.mrb[158].mxu0 %vm666_vm1, %v7912_v39 }
 0x186   : > { %11342 = vst [vmem:[#allocation96_spill] sm:$0xff] %v7917_v59  ;;  %11343 = vst [vmem:[#allocation97_spill] sm:$0xff] %v7919_v10  ;;  %v7923_v42 = vpop.f32.mrb[53].mxu1  ;;  %5815 = vmatmul.mubr.msk.f32.gmra.mrb[158].mxu1 %vm666_vm1, %v7912_v39  ;;  %2174 = vmatprep.mubr.f32.mxu0 %v11328_v24 }
 0x187   : > { %11344 = vst [vmem:[#allocation98_spill] sm:$0xff] %v7923_v42  ;;  %2461 = vmatprep.mubr.f32.mxu1 %v11328_v24 }
 0x188   : > { %v7934_v59 = vpop.f32.mrb[54].mxu0 }
 0x189   : > { %11345 = vst [vmem:[#allocation99_spill] sm:$0xff] %v7934_v59  ;;  %v7936_v10 = vpop.f32.mrb[54].mxu1  ;;  %v7938_v43 = vpop.f32.mrb[55].mxu0  ;;  %5777 = vmatmul.mubr.msk.f32.gmra.mrb[160].mxu0 %vm666_vm1, %v7931_v45 }
 0x18a   : > { %11346 = vst [vmem:[#allocation100_spill] sm:$0xff] %v7936_v10  ;;  %11347 = vst [vmem:[#allocation101_spill] sm:$0xff] %v7938_v43  ;;  %v7942_v42 = vpop.f32.mrb[55].mxu1  ;;  %5816 = vmatmul.mubr.msk.f32.gmra.mrb[160].mxu1 %vm666_vm1, %v7931_v45  ;;  %2180 = vmatprep.mubr.f32.mxu0 %v11328_v24 }
 0x18b   : > { %11348 = vst [vmem:[#allocation102_spill] sm:$0xff] %v7942_v42  ;;  %2467 = vmatprep.mubr.f32.mxu1 %v11328_v24 }
 0x18c   : > { %v7953_v10 = vpop.f32.mrb[56].mxu0 }
 0x18d   : > { %11349 = vst [vmem:[#allocation103_spill] sm:$0xff] %v7953_v10  ;;  %v7955_v43 = vpop.f32.mrb[56].mxu1  ;;  %v7957_v59 = vpop.f32.mrb[57].mxu0  ;;  %5778 = vmatmul.mubr.msk.f32.gmra.mrb[162].mxu0 %vm666_vm1, %v7950_v30 }
 0x18e   : > { %11350 = vst [vmem:[#allocation104_spill] sm:$0xff] %v7955_v43  ;;  %11351 = vst [vmem:[#allocation105_spill] sm:$0xff] %v7957_v59  ;;  %v7961_v42 = vpop.f32.mrb[57].mxu1  ;;  %5817 = vmatmul.mubr.msk.f32.gmra.mrb[162].mxu1 %vm666_vm1, %v7950_v30  ;;  %2186 = vmatprep.mubr.f32.mxu0 %v11328_v24 }
 0x18f   : > { %11352 = vst [vmem:[#allocation106_spill] sm:$0xff] %v7961_v42  ;;  %2473 = vmatprep.mubr.f32.mxu1 %v11328_v24 }
 0x190   : > { %v7972_v43 = vpop.f32.mrb[58].mxu0 }
 0x191   : > { %11353 = vst [vmem:[#allocation107_spill] sm:$0xff] %v7972_v43  ;;  %v7974_v59 = vpop.f32.mrb[58].mxu1  ;;  %v7976_v10 = vpop.f32.mrb[59].mxu0  ;;  %5779 = vmatmul.mubr.msk.f32.gmra.mrb[164].mxu0 %vm666_vm1, %v7969_v31 }
 0x192   : > { %11354 = vst [vmem:[#allocation108_spill] sm:$0xff] %v7974_v59  ;;  %11355 = vst [vmem:[#allocation109_spill] sm:$0xff] %v7976_v10  ;;  %v7980_v42 = vpop.f32.mrb[59].mxu1  ;;  %5818 = vmatmul.mubr.msk.f32.gmra.mrb[164].mxu1 %vm666_vm1, %v7969_v31  ;;  %2192 = vmatprep.mubr.f32.mxu0 %v11328_v24 }
 0x193   : > { %11356 = vst [vmem:[#allocation110_spill] sm:$0xff] %v7980_v42  ;;  %2479 = vmatprep.mubr.f32.mxu1 %v11328_v24 }
 0x194   : > { %v7991_v59 = vpop.f32.mrb[60].mxu0 }
 0x195   : > { %11357 = vst [vmem:[#allocation111_spill] sm:$0xff] %v7991_v59  ;;  %v7993_v10 = vpop.f32.mrb[60].mxu1  ;;  %v7995_v43 = vpop.f32.mrb[61].mxu0  ;;  %5780 = vmatmul.mubr.msk.f32.gmra.mrb[166].mxu0 %vm666_vm1, %v7988_v27 }
 0x196   : > { %11358 = vst [vmem:[#allocation112_spill] sm:$0xff] %v7993_v10  ;;  %11359 = vst [vmem:[#allocation113_spill] sm:$0xff] %v7995_v43  ;;  %v7999_v42 = vpop.f32.mrb[61].mxu1  ;;  %5819 = vmatmul.mubr.msk.f32.gmra.mrb[166].mxu1 %vm666_vm1, %v7988_v27  ;;  %2198 = vmatprep.mubr.f32.mxu0 %v11328_v24 }
 0x197   : > { %11360 = vst [vmem:[#allocation114_spill] sm:$0xff] %v7999_v42  ;;  %2485 = vmatprep.mubr.f32.mxu1 %v11328_v24 }
 0x198   : > { %v8010_v10 = vpop.f32.mrb[62].mxu0 }
 0x199   : > { %11361 = vst [vmem:[#allocation115_spill] sm:$0xff] %v8010_v10  ;;  %v8012_v43 = vpop.f32.mrb[62].mxu1  ;;  %v8014_v59 = vpop.f32.mrb[63].mxu0  ;;  %5781 = vmatmul.mubr.msk.f32.gmra.mrb[168].mxu0 %vm666_vm1, %v8007_v34 }
 0x19a   : > { %11362 = vst [vmem:[#allocation116_spill] sm:$0xff] %v8012_v43  ;;  %11363 = vst [vmem:[#allocation117_spill] sm:$0xff] %v8014_v59  ;;  %v8018_v42 = vpop.f32.mrb[63].mxu1  ;;  %5820 = vmatmul.mubr.msk.f32.gmra.mrb[168].mxu1 %vm666_vm1, %v8007_v34  ;;  %2204 = vmatprep.mubr.f32.mxu0 %v11328_v24 }
 0x19b   : > { %11364 = vst [vmem:[#allocation118_spill] sm:$0xff] %v8018_v42  ;;  %2491 = vmatprep.mubr.f32.mxu1 %v11328_v24 }
 0x19c   : > { %v8029_v43 = vpop.f32.mrb[64].mxu0 }
 0x19d   : > { %11365 = vst [vmem:[#allocation119_spill] sm:$0xff] %v8029_v43  ;;  %v8031_v59 = vpop.f32.mrb[64].mxu1  ;;  %v8033_v10 = vpop.f32.mrb[65].mxu0  ;;  %5782 = vmatmul.mubr.msk.f32.gmra.mrb[170].mxu0 %vm666_vm1, %v8026_v26 }
 0x19e   : > { %11366 = vst [vmem:[#allocation120_spill] sm:$0xff] %v8031_v59  ;;  %11367 = vst [vmem:[#allocation121_spill] sm:$0xff] %v8033_v10  ;;  %v8037_v42 = vpop.f32.mrb[65].mxu1  ;;  %5821 = vmatmul.mubr.msk.f32.gmra.mrb[170].mxu1 %vm666_vm1, %v8026_v26  ;;  %2210 = vmatprep.mubr.f32.mxu0 %v11328_v24 }
 0x19f   : > { %11368 = vst [vmem:[#allocation122_spill] sm:$0xff] %v8037_v42  ;;  %2497 = vmatprep.mubr.f32.mxu1 %v11328_v24 }
 0x1a0   : > { %v8048_v59 = vpop.f32.mrb[66].mxu0 }
 0x1a1   : > { %11369 = vst [vmem:[#allocation123_spill] sm:$0xff] %v8048_v59  ;;  %v8050_v10 = vpop.f32.mrb[66].mxu1  ;;  %v8052_v43 = vpop.f32.mrb[67].mxu0  ;;  %5783 = vmatmul.mubr.msk.f32.gmra.mrb[172].mxu0 %vm666_vm1, %v8045_v25 }
 0x1a2   : > { %11370 = vst [vmem:[#allocation124_spill] sm:$0xff] %v8050_v10  ;;  %11371 = vst [vmem:[#allocation125_spill] sm:$0xff] %v8052_v43  ;;  %v8056_v42 = vpop.f32.mrb[67].mxu1  ;;  %5822 = vmatmul.mubr.msk.f32.gmra.mrb[172].mxu1 %vm666_vm1, %v8045_v25  ;;  %2216 = vmatprep.mubr.f32.mxu0 %v11328_v24 }
 0x1a3   : > { %11372 = vst [vmem:[#allocation126_spill] sm:$0xff] %v8056_v42  ;;  %2503 = vmatprep.mubr.f32.mxu1 %v11328_v24 }
 0x1a4   : > { %v8067_v10 = vpop.f32.mrb[68].mxu0 }
 0x1a5   : > { %11373 = vst [vmem:[#allocation127_spill] sm:$0xff] %v8067_v10  ;;  %v8069_v43 = vpop.f32.mrb[68].mxu1  ;;  %v8071_v59 = vpop.f32.mrb[69].mxu0  ;;  %5784 = vmatmul.mubr.msk.f32.gmra.mrb[174].mxu0 %vm666_vm1, %v8064_v23 }
 0x1a6   : > { %11374 = vst [vmem:[#allocation128_spill] sm:$0xff] %v8069_v43  ;;  %11375 = vst [vmem:[#allocation129_spill] sm:$0xff] %v8071_v59  ;;  %v8075_v42 = vpop.f32.mrb[69].mxu1  ;;  %5823 = vmatmul.mubr.msk.f32.gmra.mrb[174].mxu1 %vm666_vm1, %v8064_v23  ;;  %2222 = vmatprep.mubr.f32.mxu0 %v11328_v24 }
 0x1a7   : > { %11376 = vst [vmem:[#allocation130_spill] sm:$0xff] %v8075_v42  ;;  %2509 = vmatprep.mubr.f32.mxu1 %v11328_v24 }
 0x1a8   : > { %v8086_v43 = vpop.f32.mrb[70].mxu0 }
 0x1a9   : > { %11377 = vst [vmem:[#allocation131_spill] sm:$0xff] %v8086_v43  ;;  %v8088_v59 = vpop.f32.mrb[70].mxu1  ;;  %v8090_v10 = vpop.f32.mrb[71].mxu0  ;;  %5785 = vmatmul.mubr.msk.f32.gmra.mrb[176].mxu0 %vm666_vm1, %v8083_v22 }
 0x1aa   : > { %11378 = vst [vmem:[#allocation132_spill] sm:$0xff] %v8088_v59  ;;  %11379 = vst [vmem:[#allocation133_spill] sm:$0xff] %v8090_v10  ;;  %v8094_v42 = vpop.f32.mrb[71].mxu1  ;;  %5824 = vmatmul.mubr.msk.f32.gmra.mrb[176].mxu1 %vm666_vm1, %v8083_v22  ;;  %2228 = vmatprep.mubr.f32.mxu0 %v11328_v24 }
 0x1ab   : > { %11380 = vst [vmem:[#allocation134_spill] sm:$0xff] %v8094_v42  ;;  %2515 = vmatprep.mubr.f32.mxu1 %v11328_v24 }
 0x1ac   : > { %v8105_v59 = vpop.f32.mrb[72].mxu0 }
 0x1ad   : > { %11381 = vst [vmem:[#allocation135_spill] sm:$0xff] %v8105_v59  ;;  %v8107_v10 = vpop.f32.mrb[72].mxu1  ;;  %v8109_v43 = vpop.f32.mrb[73].mxu0  ;;  %5786 = vmatmul.mubr.msk.f32.gmra.mrb[178].mxu0 %vm666_vm1, %v8102_v9 }
 0x1ae   : > { %11382 = vst [vmem:[#allocation136_spill] sm:$0xff] %v8107_v10  ;;  %11383 = vst [vmem:[#allocation137_spill] sm:$0xff] %v8109_v43  ;;  %v8113_v42 = vpop.f32.mrb[73].mxu1  ;;  %5825 = vmatmul.mubr.msk.f32.gmra.mrb[178].mxu1 %vm666_vm1, %v8102_v9  ;;  %2234 = vmatprep.mubr.f32.mxu0 %v11328_v24 }
 0x1af   : > { %11384 = vst [vmem:[#allocation138_spill] sm:$0xff] %v8113_v42  ;;  %2521 = vmatprep.mubr.f32.mxu1 %v11328_v24 }
 0x1b0   : > { %v8124_v10 = vpop.f32.mrb[74].mxu0 }
 0x1b1   : > { %v8126_v43 = vpop.f32.mrb[74].mxu1  ;;  %v8128_v59 = vpop.f32.mrb[75].mxu0  ;;  %5787 = vmatmul.mubr.msk.f32.gmra.mrb[180].mxu0 %vm666_vm1, %v8121_v11 }
 0x1b2   : > { %11385 = vst [vmem:[#allocation139_spill] sm:$0xff] %v8126_v43  ;;  %11386 = vst [vmem:[#allocation140_spill] sm:$0xff] %v8128_v59  ;;  %v8132_v42 = vpop.f32.mrb[75].mxu1  ;;  %5826 = vmatmul.mubr.msk.f32.gmra.mrb[180].mxu1 %vm666_vm1, %v8121_v11  ;;  %2240 = vmatprep.mubr.f32.mxu0 %v11328_v24 }
 0x1b3   : > { %11387 = vst [vmem:[#allocation141_spill] sm:$0xff] %v8132_v42  ;;  %2527 = vmatprep.mubr.f32.mxu1 %v11328_v24 }
 0x1b4   : > { %v8143_v56 = vpop.f32.mrb[76].mxu0 }
 0x1b5   : > { %11388 = vst [vmem:[#allocation142_spill] sm:$0xff] %v8143_v56  ;;  %v8145_v51 = vpop.f32.mrb[76].mxu1  ;;  %v8147_v3 = vpop.f32.mrb[77].mxu0  ;;  %5788 = vmatmul.mubr.msk.f32.gmra.mrb[182].mxu0 %vm666_vm1, %v8140_v28 }
 0x1b6   : > { %11389 = vst [vmem:[#allocation143_spill] sm:$0xff] %v8147_v3  ;;  %v8151_v47 = vpop.f32.mrb[77].mxu1  ;;  %5827 = vmatmul.mubr.msk.f32.gmra.mrb[182].mxu1 %vm666_vm1, %v8140_v28  ;;  %2246 = vmatprep.mubr.f32.mxu0 %v11328_v24 }
 0x1b7   : > { %2533 = vmatprep.mubr.f32.mxu1 %v11328_v24 }
 0x1b8   : > { %v8162_v7 = vpop.f32.mrb[78].mxu0 }
 0x1b9   : > { %v8164_v35 = vpop.f32.mrb[78].mxu1  ;;  %v8166_v46 = vpop.f32.mrb[79].mxu0  ;;  %5789 = vmatmul.mubr.msk.f32.gmra.mrb[184].mxu0 %vm666_vm1, %v8159_v21 }
 0x1ba   : > { %v8170_v19 = vpop.f32.mrb[79].mxu1  ;;  %5828 = vmatmul.mubr.msk.f32.gmra.mrb[184].mxu1 %vm666_vm1, %v8159_v21  ;;  %2252 = vmatprep.mubr.f32.mxu0 %v11328_v24 }
 0x1bb   : > { %2539 = vmatprep.mubr.f32.mxu1 %v11328_v24 }
 0x1bc   : > { %v8181_v4 = vpop.f32.mrb[80].mxu0 }
 0x1bd   : > { %v8183_v18 = vpop.f32.mrb[80].mxu1  ;;  %v8185_v17 = vpop.f32.mrb[81].mxu0  ;;  %5790 = vmatmul.mubr.msk.f32.gmra.mrb[186].mxu0 %vm666_vm1, %v8178_v5 }
 0x1be   : > { %v8189_v15 = vpop.f32.mrb[81].mxu1  ;;  %5829 = vmatmul.mubr.msk.f32.gmra.mrb[186].mxu1 %vm666_vm1, %v8178_v5  ;;  %2258 = vmatprep.mubr.f32.mxu0 %v11328_v24 }
 0x1bf   : > { %2545 = vmatprep.mubr.f32.mxu1 %v11328_v24 }
 0x1c0   : > { %v8200_v40 = vpop.f32.mrb[82].mxu0 }
 0x1c1   : > { %v8202_v13 = vpop.f32.mrb[82].mxu1  ;;  %v8204_v12 = vpop.f32.mrb[83].mxu0  ;;  %5791 = vmatmul.mubr.msk.f32.gmra.mrb[188].mxu0 %vm666_vm1, %v8197_v14 }
 0x1c2   : > { %11391 = vst [vmem:[#allocation145_spill] sm:$0xff] %v8202_v13  ;;  %11392 = vst [vmem:[#allocation146_spill] sm:$0xff] %v8204_v12  ;;  %v8208_v8 = vpop.f32.mrb[83].mxu1  ;;  %5830 = vmatmul.mubr.msk.f32.gmra.mrb[188].mxu1 %vm666_vm1, %v8197_v14  ;;  %2264 = vmatprep.mubr.f32.mxu0 %v11328_v24  ;;  %v8235_v14 = vld [vmem:[%s10905_s3 + $0xb0] sm:$0xff] }
 0x1c3   : > { %11393 = vst [vmem:[#allocation147_spill] sm:$0xff] %v8208_v8  ;;  %2551 = vmatprep.mubr.f32.mxu1 %v11328_v24  ;;  %11399 = vst [vmem:[#allocation153_spill] sm:$0xff] %v8235_v14 }
 0x1c4   : > { %v8219_v37 = vpop.f32.mrb[84].mxu0 }
 0x1c5   : > { %11395 = vst [vmem:[#allocation149_spill] sm:$0xff] %v8219_v37  ;;  %v8221_v57 = vpop.f32.mrb[84].mxu1  ;;  %v8223_v12 = vpop.f32.mrb[85].mxu0  ;;  %5792 = vmatmul.mubr.msk.f32.gmra.mrb[190].mxu0 %vm666_vm1, %v8216_v38 }
 0x1c6   : > { %11396 = vst [vmem:[#allocation150_spill] sm:$0xff] %v8221_v57  ;;  %11397 = vst [vmem:[#allocation151_spill] sm:$0xff] %v8223_v12  ;;  %v8227_v8 = vpop.f32.mrb[85].mxu1  ;;  %5831 = vmatmul.mubr.msk.f32.gmra.mrb[190].mxu1 %vm666_vm1, %v8216_v38  ;;  %2270 = vmatprep.mubr.f32.mxu0 %v11328_v24  ;;  %v8254_v38 = vld [vmem:[%s10905_s3 + $0xb8] sm:$0xff] }
 0x1c7   : > { %11398 = vst [vmem:[#allocation152_spill] sm:$0xff] %v8227_v8  ;;  %2557 = vmatprep.mubr.f32.mxu1 %v11328_v24  ;;  %11404 = vst [vmem:[#allocation158_spill] sm:$0xff] %v8254_v38 }
 0x1c8   : > { %v8238_v57 = vpop.f32.mrb[86].mxu0 }
 0x1c9   : > { %11400 = vst [vmem:[#allocation154_spill] sm:$0xff] %v8238_v57  ;;  %v8240_v12 = vpop.f32.mrb[86].mxu1  ;;  %v8242_v37 = vpop.f32.mrb[87].mxu0  ;;  %5793 = vmatmul.mubr.msk.f32.gmra.mrb[192].mxu0 %vm666_vm1, %v8235_v14 }
 0x1ca   : > { %11401 = vst [vmem:[#allocation155_spill] sm:$0xff] %v8240_v12  ;;  %11402 = vst [vmem:[#allocation156_spill] sm:$0xff] %v8242_v37  ;;  %v8246_v8 = vpop.f32.mrb[87].mxu1  ;;  %5832 = vmatmul.mubr.msk.f32.gmra.mrb[192].mxu1 %vm666_vm1, %v8235_v14  ;;  %2276 = vmatprep.mubr.f32.mxu0 %v11328_v24  ;;  %v8273_v14 = vld [vmem:[%s10905_s3 + $0xc0] sm:$0xff] }
 0x1cb   : > { %11403 = vst [vmem:[#allocation157_spill] sm:$0xff] %v8246_v8  ;;  %2563 = vmatprep.mubr.f32.mxu1 %v11328_v24  ;;  %11409 = vst [vmem:[#allocation163_spill] sm:$0xff] %v8273_v14 }
 0x1cc   : > { %v8257_v12 = vpop.f32.mrb[88].mxu0 }
 0x1cd   : > { %11405 = vst [vmem:[#allocation159_spill] sm:$0xff] %v8257_v12  ;;  %v8259_v37 = vpop.f32.mrb[88].mxu1  ;;  %v8261_v57 = vpop.f32.mrb[89].mxu0  ;;  %5794 = vmatmul.mubr.msk.f32.gmra.mrb[194].mxu0 %vm666_vm1, %v8254_v38 }
 0x1ce   : > { %11406 = vst [vmem:[#allocation160_spill] sm:$0xff] %v8259_v37  ;;  %11407 = vst [vmem:[#allocation161_spill] sm:$0xff] %v8261_v57  ;;  %v8265_v8 = vpop.f32.mrb[89].mxu1  ;;  %5833 = vmatmul.mubr.msk.f32.gmra.mrb[194].mxu1 %vm666_vm1, %v8254_v38  ;;  %2282 = vmatprep.mubr.f32.mxu0 %v11328_v24  ;;  %v8292_v38 = vld [vmem:[%s10905_s3 + $0xc8] sm:$0xff] }
 0x1cf   : > { %11408 = vst [vmem:[#allocation162_spill] sm:$0xff] %v8265_v8  ;;  %2569 = vmatprep.mubr.f32.mxu1 %v11328_v24  ;;  %11414 = vst [vmem:[#allocation168_spill] sm:$0xff] %v8292_v38 }
 0x1d0   : > { %v8276_v37 = vpop.f32.mrb[90].mxu0 }
 0x1d1   : > { %11410 = vst [vmem:[#allocation164_spill] sm:$0xff] %v8276_v37  ;;  %v8278_v57 = vpop.f32.mrb[90].mxu1  ;;  %v8280_v12 = vpop.f32.mrb[91].mxu0  ;;  %5795 = vmatmul.mubr.msk.f32.gmra.mrb[196].mxu0 %vm666_vm1, %v8273_v14 }
 0x1d2   : > { %11411 = vst [vmem:[#allocation165_spill] sm:$0xff] %v8278_v57  ;;  %11412 = vst [vmem:[#allocation166_spill] sm:$0xff] %v8280_v12  ;;  %v8284_v8 = vpop.f32.mrb[91].mxu1  ;;  %5834 = vmatmul.mubr.msk.f32.gmra.mrb[196].mxu1 %vm666_vm1, %v8273_v14  ;;  %2288 = vmatprep.mubr.f32.mxu0 %v11328_v24  ;;  %v8311_v14 = vld [vmem:[%s10905_s3 + $0xd0] sm:$0xff] }
 0x1d3   : > { %11413 = vst [vmem:[#allocation167_spill] sm:$0xff] %v8284_v8  ;;  %2575 = vmatprep.mubr.f32.mxu1 %v11328_v24  ;;  %11419 = vst [vmem:[#allocation173_spill] sm:$0xff] %v8311_v14 }
 0x1d4   : > { %v8295_v57 = vpop.f32.mrb[92].mxu0 }
 0x1d5   : > { %11415 = vst [vmem:[#allocation169_spill] sm:$0xff] %v8295_v57  ;;  %v8297_v12 = vpop.f32.mrb[92].mxu1  ;;  %v8299_v37 = vpop.f32.mrb[93].mxu0  ;;  %5796 = vmatmul.mubr.msk.f32.gmra.mrb[198].mxu0 %vm666_vm1, %v8292_v38 }
 0x1d6   : > { %11416 = vst [vmem:[#allocation170_spill] sm:$0xff] %v8297_v12  ;;  %11417 = vst [vmem:[#allocation171_spill] sm:$0xff] %v8299_v37  ;;  %v8303_v8 = vpop.f32.mrb[93].mxu1  ;;  %5835 = vmatmul.mubr.msk.f32.gmra.mrb[198].mxu1 %vm666_vm1, %v8292_v38  ;;  %2294 = vmatprep.mubr.f32.mxu0 %v11328_v24  ;;  %v8330_v38 = vld [vmem:[%s10905_s3 + $0xd8] sm:$0xff] }
 0x1d7   : > { %11418 = vst [vmem:[#allocation172_spill] sm:$0xff] %v8303_v8  ;;  %2581 = vmatprep.mubr.f32.mxu1 %v11328_v24  ;;  %11424 = vst [vmem:[#allocation178_spill] sm:$0xff] %v8330_v38 }
 0x1d8   : > { %v8314_v12 = vpop.f32.mrb[94].mxu0 }
 0x1d9   : > { %11420 = vst [vmem:[#allocation174_spill] sm:$0xff] %v8314_v12  ;;  %v8316_v37 = vpop.f32.mrb[94].mxu1  ;;  %v8318_v57 = vpop.f32.mrb[95].mxu0  ;;  %5797 = vmatmul.mubr.msk.f32.gmra.mrb[200].mxu0 %vm666_vm1, %v8311_v14 }
 0x1da   : > { %11421 = vst [vmem:[#allocation175_spill] sm:$0xff] %v8316_v37  ;;  %11422 = vst [vmem:[#allocation176_spill] sm:$0xff] %v8318_v57  ;;  %v8322_v8 = vpop.f32.mrb[95].mxu1  ;;  %5836 = vmatmul.mubr.msk.f32.gmra.mrb[200].mxu1 %vm666_vm1, %v8311_v14  ;;  %2300 = vmatprep.mubr.f32.mxu0 %v11328_v24  ;;  %v8349_v14 = vld [vmem:[%s10905_s3 + $0xe0] sm:$0xff] }
 0x1db   : > { %11423 = vst [vmem:[#allocation177_spill] sm:$0xff] %v8322_v8  ;;  %2587 = vmatprep.mubr.f32.mxu1 %v11328_v24  ;;  %11429 = vst [vmem:[#allocation183_spill] sm:$0xff] %v8349_v14 }
 0x1dc   : > { %v8333_v37 = vpop.f32.mrb[96].mxu0 }
 0x1dd   : > { %11425 = vst [vmem:[#allocation179_spill] sm:$0xff] %v8333_v37  ;;  %v8335_v57 = vpop.f32.mrb[96].mxu1  ;;  %v8337_v12 = vpop.f32.mrb[97].mxu0  ;;  %5798 = vmatmul.mubr.msk.f32.gmra.mrb[202].mxu0 %vm666_vm1, %v8330_v38 }
 0x1de   : > { %11426 = vst [vmem:[#allocation180_spill] sm:$0xff] %v8335_v57  ;;  %11427 = vst [vmem:[#allocation181_spill] sm:$0xff] %v8337_v12  ;;  %v8341_v8 = vpop.f32.mrb[97].mxu1  ;;  %5837 = vmatmul.mubr.msk.f32.gmra.mrb[202].mxu1 %vm666_vm1, %v8330_v38  ;;  %2306 = vmatprep.mubr.f32.mxu0 %v11328_v24  ;;  %v8368_v38 = vld [vmem:[%s10905_s3 + $0xe8] sm:$0xff] }
 0x1df   : > { %11428 = vst [vmem:[#allocation182_spill] sm:$0xff] %v8341_v8  ;;  %2593 = vmatprep.mubr.f32.mxu1 %v11328_v24  ;;  %11434 = vst [vmem:[#allocation188_spill] sm:$0xff] %v8368_v38 }
 0x1e0   : > { %v8352_v57 = vpop.f32.mrb[98].mxu0 }
 0x1e1   : > { %11430 = vst [vmem:[#allocation184_spill] sm:$0xff] %v8352_v57  ;;  %v8354_v12 = vpop.f32.mrb[98].mxu1  ;;  %v8356_v37 = vpop.f32.mrb[99].mxu0  ;;  %5799 = vmatmul.mubr.msk.f32.gmra.mrb[204].mxu0 %vm666_vm1, %v8349_v14 }
 0x1e2   : > { %11431 = vst [vmem:[#allocation185_spill] sm:$0xff] %v8354_v12  ;;  %11432 = vst [vmem:[#allocation186_spill] sm:$0xff] %v8356_v37  ;;  %v8360_v8 = vpop.f32.mrb[99].mxu1  ;;  %5838 = vmatmul.mubr.msk.f32.gmra.mrb[204].mxu1 %vm666_vm1, %v8349_v14  ;;  %2312 = vmatprep.mubr.f32.mxu0 %v11328_v24  ;;  %v8387_v14 = vld [vmem:[%s10905_s3 + $0xf0] sm:$0xff] }
 0x1e3   : > { %11433 = vst [vmem:[#allocation187_spill] sm:$0xff] %v8360_v8  ;;  %2599 = vmatprep.mubr.f32.mxu1 %v11328_v24  ;;  %11439 = vst [vmem:[#allocation193_spill] sm:$0xff] %v8387_v14 }
 0x1e4   : > { %v8371_v12 = vpop.f32.mrb[100].mxu0 }
 0x1e5   : > { %11435 = vst [vmem:[#allocation189_spill] sm:$0xff] %v8371_v12  ;;  %v8373_v37 = vpop.f32.mrb[100].mxu1  ;;  %v8375_v57 = vpop.f32.mrb[101].mxu0  ;;  %5800 = vmatmul.mubr.msk.f32.gmra.mrb[206].mxu0 %vm666_vm1, %v8368_v38 }
 0x1e6   : > { %11436 = vst [vmem:[#allocation190_spill] sm:$0xff] %v8373_v37  ;;  %11437 = vst [vmem:[#allocation191_spill] sm:$0xff] %v8375_v57  ;;  %v8379_v8 = vpop.f32.mrb[101].mxu1  ;;  %5839 = vmatmul.mubr.msk.f32.gmra.mrb[206].mxu1 %vm666_vm1, %v8368_v38  ;;  %2318 = vmatprep.mubr.f32.mxu0 %v11328_v24  ;;  %v660_v38 = vld [vmem:[%s10905_s3 + $0xf8] sm:$0xff] }
 0x1e7   : > { %11438 = vst [vmem:[#allocation192_spill] sm:$0xff] %v8379_v8  ;;  %2605 = vmatprep.mubr.f32.mxu1 %v11328_v24 }
 0x1e8   : > { %v8390_v37 = vpop.f32.mrb[102].mxu0 }
 0x1e9   : > { %11440 = vst [vmem:[#allocation194_spill] sm:$0xff] %v8390_v37  ;;  %v8392_v57 = vpop.f32.mrb[102].mxu1  ;;  %v8394_v12 = vpop.f32.mrb[103].mxu0  ;;  %5801 = vmatmul.mubr.msk.f32.gmra.mrb[208].mxu0 %vm666_vm1, %v8387_v14 }
 0x1ea   : > { %11441 = vst [vmem:[#allocation195_spill] sm:$0xff] %v8392_v57  ;;  %11442 = vst [vmem:[#allocation196_spill] sm:$0xff] %v8394_v12  ;;  %v8398_v8 = vpop.f32.mrb[103].mxu1  ;;  %5840 = vmatmul.mubr.msk.f32.gmra.mrb[208].mxu1 %vm666_vm1, %v8387_v14  ;;  %2324 = vmatprep.mubr.f32.mxu0 %v11328_v24  ;;  %v661_v14 = vld [vmem:[%s10905_s3 + $0x100] sm:$0xff] }
 0x1eb   : > { %11443 = vst [vmem:[#allocation197_spill] sm:$0xff] %v8398_v8  ;;  %2611 = vmatprep.mubr.f32.mxu1 %v11328_v24 }
 0x1ec   : > { %v8407_v37 = vpop.f32.mrb[104].mxu0 }
 0x1ed   : > { %11444 = vst [vmem:[#allocation198_spill] sm:$0xff] %v8407_v37  ;;  %v8409_v57 = vpop.f32.mrb[104].mxu1  ;;  %v8411_v12 = vpop.f32.mrb[105].mxu0  ;;  %5802 = vmatmul.mubr.msk.f32.gmra.mrb[210].mxu0 %vm666_vm1, %v660_v38 }
 0x1ee   : > { %11445 = vst [vmem:[#allocation199_spill] sm:$0xff] %v8409_v57  ;;  %11446 = vst [vmem:[#allocation200_spill] sm:$0xff] %v8411_v12  ;;  %v8414_v8 = vpop.f32.mrb[105].mxu1  ;;  %5841 = vmatmul.mubr.msk.f32.gmra.mrb[210].mxu1 %vm666_vm1, %v660_v38  ;;  %2330 = vmatprep.mubr.f32.mxu0 %v11328_v24  ;;  %v662_v38 = vld [vmem:[%s10905_s3 + $0x108] sm:$0xff] }
 0x1ef   : > { %11447 = vst [vmem:[#allocation201_spill] sm:$0xff] %v8414_v8  ;;  %2617 = vmatprep.mubr.f32.mxu1 %v11328_v24 }
 0x1f0   : > { %v8422_v53 = vpop.f32.mrb[106].mxu0 }
 0x1f1   : > { %11448 = vst [vmem:[#allocation202_spill] sm:$0xff] %v8422_v53  ;;  %v8424_v37 = vpop.f32.mrb[106].mxu1  ;;  %v8426_v57 = vpop.f32.mrb[107].mxu0  ;;  %5803 = vmatmul.mubr.msk.f32.gmra.mrb[212].mxu0 %vm666_vm1, %v661_v14 }
 0x1f2   : > { %11449 = vst [vmem:[#allocation203_spill] sm:$0xff] %v8424_v37  ;;  %11450 = vst [vmem:[#allocation204_spill] sm:$0xff] %v8426_v57  ;;  %v8429_v12 = vpop.f32.mrb[107].mxu1  ;;  %5842 = vmatmul.mubr.msk.f32.gmra.mrb[212].mxu1 %vm666_vm1, %v661_v14  ;;  %2336 = vmatprep.mubr.f32.mxu0 %v11328_v24  ;;  %v663_v14 = vld [vmem:[%s10905_s3 + $0x110] sm:$0xff] }
 0x1f3   : > { %11451 = vst [vmem:[#allocation205_spill] sm:$0xff] %v8429_v12  ;;  %2623 = vmatprep.mubr.f32.mxu1 %v11328_v24 }
 0x1f4   : > { %v8437_v8 = vpop.f32.mrb[108].mxu0 }
 0x1f5   : > { %11452 = vst [vmem:[#allocation206_spill] sm:$0xff] %v8437_v8  ;;  %v8439_v53 = vpop.f32.mrb[108].mxu1  ;;  %v8441_v37 = vpop.f32.mrb[109].mxu0  ;;  %5804 = vmatmul.mubr.msk.f32.gmra.mrb[214].mxu0 %vm666_vm1, %v662_v38 }
 0x1f6   : > { %11453 = vst [vmem:[#allocation207_spill] sm:$0xff] %v8439_v53  ;;  %11454 = vst [vmem:[#allocation208_spill] sm:$0xff] %v8441_v37  ;;  %v8444_v57 = vpop.f32.mrb[109].mxu1  ;;  %5843 = vmatmul.mubr.msk.f32.gmra.mrb[214].mxu1 %vm666_vm1, %v662_v38  ;;  %2342 = vmatprep.mubr.f32.mxu0 %v11328_v24  ;;  %v664_v38 = vld [vmem:[%s10905_s3 + $0x118] sm:$0xff] }
 0x1f7   : > { %11455 = vst [vmem:[#allocation209_spill] sm:$0xff] %v8444_v57  ;;  %2629 = vmatprep.mubr.f32.mxu1 %v11328_v24 }
 0x1f8   : > { %v8452_v12 = vpop.f32.mrb[110].mxu0 }
 0x1f9   : > { %11456 = vst [vmem:[#allocation210_spill] sm:$0xff] %v8452_v12  ;;  %v8454_v8 = vpop.f32.mrb[110].mxu1  ;;  %v8456_v53 = vpop.f32.mrb[111].mxu0  ;;  %5805 = vmatmul.mubr.msk.f32.gmra.mrb[216].mxu0 %vm666_vm1, %v663_v14 }
 0x1fa   : > { %11457 = vst [vmem:[#allocation211_spill] sm:$0xff] %v8454_v8  ;;  %11458 = vst [vmem:[#allocation212_spill] sm:$0xff] %v8456_v53  ;;  %v8459_v37 = vpop.f32.mrb[111].mxu1  ;;  %5844 = vmatmul.mubr.msk.f32.gmra.mrb[216].mxu1 %vm666_vm1, %v663_v14  ;;  %2348 = vmatprep.mubr.f32.mxu0 %v11328_v24  ;;  %v665_v14 = vld [vmem:[%s10905_s3 + $0x120] sm:$0x1] }
 0x1fb   : > { %11459 = vst [vmem:[#allocation213_spill] sm:$0xff] %v8459_v37  ;;  %2635 = vmatprep.mubr.f32.mxu1 %v11328_v24 }
 0x1fc   : > { %v8467_v57 = vpop.f32.mrb[112].mxu0 }
 0x1fd   : > { %11460 = vst [vmem:[#allocation214_spill] sm:$0xff] %v8467_v57  ;;  %v8469_v12 = vpop.f32.mrb[112].mxu1  ;;  %v8471_v8 = vpop.f32.mrb[113].mxu0  ;;  %5806 = vmatmul.mubr.msk.f32.gmra.mrb[218].mxu0 %vm666_vm1, %v664_v38 }
 0x1fe   : > { %11461 = vst [vmem:[#allocation215_spill] sm:$0xff] %v8469_v12  ;;  %11462 = vst [vmem:[#allocation216_spill] sm:$0xff] %v8471_v8  ;;  %v8474_v53 = vpop.f32.mrb[113].mxu1  ;;  %5845 = vmatmul.mubr.msk.f32.gmra.mrb[218].mxu1 %vm666_vm1, %v664_v38  ;;  %2354 = vmatprep.mubr.f32.mxu0 %v11328_v24 }
 0x1ff   : > { %11463 = vst [vmem:[#allocation217_spill] sm:$0xff] %v8474_v53  ;;  %2641 = vmatprep.mubr.f32.mxu1 %v11328_v24 }
 0x200   : > { %v8482_v37 = vpop.f32.mrb[114].mxu0 }
 0x201   : > { %11464 = vst [vmem:[#allocation218_spill] sm:$0xff] %v8482_v37  ;;  %v8484_v57 = vpop.f32.mrb[114].mxu1  ;;  %v8486_v12 = vpop.f32.mrb[115].mxu0  ;;  %5807 = vmatmul.mubr.msk.f32.gmra.mrb[220].mxu0 %vm666_vm1, %v665_v14 }
 0x202   : > { %11465 = vst [vmem:[#allocation219_spill] sm:$0xff] %v8484_v57  ;;  %11466 = vst [vmem:[#allocation220_spill] sm:$0xff] %v8486_v12  ;;  %v8489_v8 = vpop.f32.mrb[115].mxu1  ;;  %5846 = vmatmul.mubr.msk.f32.gmra.mrb[220].mxu1 %vm666_vm1, %v665_v14  ;;  %2712 = vmatprep.mubr.f32.mxu0 %v11328_v24 }
 0x203   : > { %11467 = vst [vmem:[#allocation221_spill] sm:$0xff] %v8489_v8  ;;  %2999 = vmatprep.mubr.f32.mxu1 %v11328_v24 }
 0x204   : > { %v8494_v38 = vpop.f32.mrb[116].mxu0 }
 0x205   : > { %11468 = vst [vmem:[#allocation222_spill] sm:$0xff] %v8494_v38  ;;  %v8496_v53 = vpop.f32.mrb[116].mxu1  ;;  %v8498_v13 = vpop.f32.mrb[117].mxu0  ;;  %5849 = vmatmul.mubr.msk.f32.vlgmr.msra.gmra.mrb[222].mxu0 %vm666_vm1, %v7807_v49 }
 0x206   : > { %11469 = vst [vmem:[#allocation223_spill] sm:$0xff] %v8496_v53  ;;  %11470 = vst [vmem:[#allocation224_spill] sm:$0xff] %v8498_v13  ;;  %v8502_v12 = vpop.f32.mrb[117].mxu1  ;;  %5888 = vmatmul.mubr.msk.f32.vlgmr.msra.gmra.mrb[222].mxu1 %vm666_vm1, %v7807_v49  ;;  %2718 = vmatprep.mubr.f32.mxu0 %v11328_v24 }
 0x207   : > { %11471 = vst [vmem:[#allocation225_spill] sm:$0xff] %v8502_v12  ;;  %3005 = vmatprep.mubr.f32.mxu1 %v11328_v24 }
 0x208   : > { %v8508_v14 = vpop.f32.mrb[118].mxu0 }
 0x209   : > { %11472 = vst [vmem:[#allocation226_spill] sm:$0xff] %v8508_v14  ;;  %v8510_v8 = vpop.f32.mrb[118].mxu1  ;;  %v8512_v38 = vpop.f32.mrb[119].mxu0  ;;  %5850 = vmatmul.mubr.msk.f32.gmra.mrb[224].mxu0 %vm666_vm1, %v7826_v36 }
 0x20a   : > { %11473 = vst [vmem:[#allocation227_spill] sm:$0xff] %v8510_v8  ;;  %11474 = vst [vmem:[#allocation228_spill] sm:$0xff] %v8512_v38  ;;  %v8516_v13 = vpop.f32.mrb[119].mxu1  ;;  %5889 = vmatmul.mubr.msk.f32.gmra.mrb[224].mxu1 %vm666_vm1, %v7826_v36  ;;  %2724 = vmatprep.mubr.f32.mxu0 %v11328_v24 }
 0x20b   : > { %11475 = vst [vmem:[#allocation229_spill] sm:$0xff] %v8516_v13  ;;  %3011 = vmatprep.mubr.f32.mxu1 %v11328_v24 }
 0x20c   : > { %v8522_v49 = vpop.f32.mrb[120].mxu0 }
 0x20d   : > { %11476 = vst [vmem:[#allocation230_spill] sm:$0xff] %v8522_v49  ;;  %v8524_v12 = vpop.f32.mrb[120].mxu1  ;;  %v8526_v14 = vpop.f32.mrb[121].mxu0  ;;  %5851 = vmatmul.mubr.msk.f32.gmra.mrb[226].mxu0 %vm666_vm1, %v7851_v29 }
 0x20e   : > { %11477 = vst [vmem:[#allocation231_spill] sm:$0xff] %v8524_v12  ;;  %11478 = vst [vmem:[#allocation232_spill] sm:$0xff] %v8526_v14  ;;  %v8530_v38 = vpop.f32.mrb[121].mxu1  ;;  %5890 = vmatmul.mubr.msk.f32.gmra.mrb[226].mxu1 %vm666_vm1, %v7851_v29  ;;  %2730 = vmatprep.mubr.f32.mxu0 %v11328_v24 }
 0x20f   : > { %11479 = vst [vmem:[#allocation233_spill] sm:$0xff] %v8530_v38  ;;  %3017 = vmatprep.mubr.f32.mxu1 %v11328_v24 }
 0x210   : > { %v8536_v36 = vpop.f32.mrb[122].mxu0 }
 0x211   : > { %11480 = vst [vmem:[#allocation234_spill] sm:$0xff] %v8536_v36  ;;  %v8538_v13 = vpop.f32.mrb[122].mxu1  ;;  %v8540_v49 = vpop.f32.mrb[123].mxu0  ;;  %5852 = vmatmul.mubr.msk.f32.gmra.mrb[228].mxu0 %vm666_vm1, %v7874_v54 }
 0x212   : > { %11481 = vst [vmem:[#allocation235_spill] sm:$0xff] %v8538_v13  ;;  %11482 = vst [vmem:[#allocation236_spill] sm:$0xff] %v8540_v49  ;;  %v8544_v14 = vpop.f32.mrb[123].mxu1  ;;  %5891 = vmatmul.mubr.msk.f32.gmra.mrb[228].mxu1 %vm666_vm1, %v7874_v54  ;;  %2736 = vmatprep.mubr.f32.mxu0 %v11328_v24 }
 0x213   : > { %11483 = vst [vmem:[#allocation237_spill] sm:$0xff] %v8544_v14  ;;  %3023 = vmatprep.mubr.f32.mxu1 %v11328_v24 }
 0x214   : > { %v8550_v29 = vpop.f32.mrb[124].mxu0 }
 0x215   : > { %11484 = vst [vmem:[#allocation238_spill] sm:$0xff] %v8550_v29  ;;  %v8552_v38 = vpop.f32.mrb[124].mxu1  ;;  %v8554_v36 = vpop.f32.mrb[125].mxu0  ;;  %5853 = vmatmul.mubr.msk.f32.gmra.mrb[230].mxu0 %vm666_vm1, %v7893_v41 }
 0x216   : > { %11485 = vst [vmem:[#allocation239_spill] sm:$0xff] %v8552_v38  ;;  %11486 = vst [vmem:[#allocation240_spill] sm:$0xff] %v8554_v36  ;;  %v8558_v49 = vpop.f32.mrb[125].mxu1  ;;  %5892 = vmatmul.mubr.msk.f32.gmra.mrb[230].mxu1 %vm666_vm1, %v7893_v41  ;;  %2742 = vmatprep.mubr.f32.mxu0 %v11328_v24 }
 0x217   : > { %11487 = vst [vmem:[#allocation241_spill] sm:$0xff] %v8558_v49  ;;  %3029 = vmatprep.mubr.f32.mxu1 %v11328_v24 }
 0x218   : > { %v8564_v54 = vpop.f32.mrb[126].mxu0 }
 0x219   : > { %11488 = vst [vmem:[#allocation242_spill] sm:$0xff] %v8564_v54  ;;  %v8566_v14 = vpop.f32.mrb[126].mxu1  ;;  %v8568_v29 = vpop.f32.mrb[127].mxu0  ;;  %5854 = vmatmul.mubr.msk.f32.gmra.mrb[232].mxu0 %vm666_vm1, %v7912_v39 }
 0x21a   : > { %11489 = vst [vmem:[#allocation243_spill] sm:$0xff] %v8566_v14  ;;  %11490 = vst [vmem:[#allocation244_spill] sm:$0xff] %v8568_v29  ;;  %v8572_v36 = vpop.f32.mrb[127].mxu1  ;;  %5893 = vmatmul.mubr.msk.f32.gmra.mrb[232].mxu1 %vm666_vm1, %v7912_v39  ;;  %2748 = vmatprep.mubr.f32.mxu0 %v11328_v24 }
 0x21b   : > { %11491 = vst [vmem:[#allocation245_spill] sm:$0xff] %v8572_v36  ;;  %3035 = vmatprep.mubr.f32.mxu1 %v11328_v24 }
 0x21c   : > { %v8578_v41 = vpop.f32.mrb[128].mxu0 }
 0x21d   : > { %11492 = vst [vmem:[#allocation246_spill] sm:$0xff] %v8578_v41  ;;  %v8580_v49 = vpop.f32.mrb[128].mxu1  ;;  %v8582_v54 = vpop.f32.mrb[129].mxu0  ;;  %5855 = vmatmul.mubr.msk.f32.gmra.mrb[234].mxu0 %vm666_vm1, %v7931_v45 }
 0x21e   : > { %11493 = vst [vmem:[#allocation247_spill] sm:$0xff] %v8580_v49  ;;  %11494 = vst [vmem:[#allocation248_spill] sm:$0xff] %v8582_v54  ;;  %v8586_v29 = vpop.f32.mrb[129].mxu1  ;;  %5894 = vmatmul.mubr.msk.f32.gmra.mrb[234].mxu1 %vm666_vm1, %v7931_v45  ;;  %2754 = vmatprep.mubr.f32.mxu0 %v11328_v24 }
 0x21f   : > { %11495 = vst [vmem:[#allocation249_spill] sm:$0xff] %v8586_v29  ;;  %3041 = vmatprep.mubr.f32.mxu1 %v11328_v24 }
 0x220   : > { %v8592_v39 = vpop.f32.mrb[130].mxu0 }
 0x221   : > { %11496 = vst [vmem:[#allocation250_spill] sm:$0xff] %v8592_v39  ;;  %v8594_v36 = vpop.f32.mrb[130].mxu1  ;;  %v8596_v41 = vpop.f32.mrb[131].mxu0  ;;  %5856 = vmatmul.mubr.msk.f32.gmra.mrb[236].mxu0 %vm666_vm1, %v7950_v30 }
 0x222   : > { %11497 = vst [vmem:[#allocation251_spill] sm:$0xff] %v8594_v36  ;;  %11498 = vst [vmem:[#allocation252_spill] sm:$0xff] %v8596_v41  ;;  %v8600_v54 = vpop.f32.mrb[131].mxu1  ;;  %5895 = vmatmul.mubr.msk.f32.gmra.mrb[236].mxu1 %vm666_vm1, %v7950_v30  ;;  %2760 = vmatprep.mubr.f32.mxu0 %v11328_v24 }
 0x223   : > { %11499 = vst [vmem:[#allocation253_spill] sm:$0xff] %v8600_v54  ;;  %3047 = vmatprep.mubr.f32.mxu1 %v11328_v24 }
 0x224   : > { %v8606_v45 = vpop.f32.mrb[132].mxu0 }
 0x225   : > { %11500 = vst [vmem:[#allocation254_spill] sm:$0xff] %v8606_v45  ;;  %v8608_v29 = vpop.f32.mrb[132].mxu1  ;;  %v8610_v39 = vpop.f32.mrb[133].mxu0  ;;  %5857 = vmatmul.mubr.msk.f32.gmra.mrb[238].mxu0 %vm666_vm1, %v7969_v31 }
 0x226   : > { %11501 = vst [vmem:[#allocation255_spill] sm:$0xff] %v8608_v29  ;;  %11502 = vst [vmem:[#allocation256_spill] sm:$0xff] %v8610_v39  ;;  %v8614_v41 = vpop.f32.mrb[133].mxu1  ;;  %5896 = vmatmul.mubr.msk.f32.gmra.mrb[238].mxu1 %vm666_vm1, %v7969_v31  ;;  %2766 = vmatprep.mubr.f32.mxu0 %v11328_v24 }
 0x227   : > { %11503 = vst [vmem:[#allocation257_spill] sm:$0xff] %v8614_v41  ;;  %3053 = vmatprep.mubr.f32.mxu1 %v11328_v24 }
 0x228   : > { %v8620_v30 = vpop.f32.mrb[134].mxu0 }
 0x229   : > { %11504 = vst [vmem:[#allocation258_spill] sm:$0xff] %v8620_v30  ;;  %v8622_v54 = vpop.f32.mrb[134].mxu1  ;;  %v8624_v45 = vpop.f32.mrb[135].mxu0  ;;  %5858 = vmatmul.mubr.msk.f32.gmra.mrb[240].mxu0 %vm666_vm1, %v7988_v27 }
 0x22a   : > { %11505 = vst [vmem:[#allocation259_spill] sm:$0xff] %v8622_v54  ;;  %11506 = vst [vmem:[#allocation260_spill] sm:$0xff] %v8624_v45  ;;  %v8628_v39 = vpop.f32.mrb[135].mxu1  ;;  %5897 = vmatmul.mubr.msk.f32.gmra.mrb[240].mxu1 %vm666_vm1, %v7988_v27  ;;  %2772 = vmatprep.mubr.f32.mxu0 %v11328_v24 }
 0x22b   : > { %11507 = vst [vmem:[#allocation261_spill] sm:$0xff] %v8628_v39  ;;  %3059 = vmatprep.mubr.f32.mxu1 %v11328_v24 }
 0x22c   : > { %v8634_v31 = vpop.f32.mrb[136].mxu0 }
 0x22d   : > { %11508 = vst [vmem:[#allocation262_spill] sm:$0xff] %v8634_v31  ;;  %v8636_v41 = vpop.f32.mrb[136].mxu1  ;;  %v8638_v30 = vpop.f32.mrb[137].mxu0  ;;  %5859 = vmatmul.mubr.msk.f32.gmra.mrb[242].mxu0 %vm666_vm1, %v8007_v34 }
 0x22e   : > { %11509 = vst [vmem:[#allocation263_spill] sm:$0xff] %v8636_v41  ;;  %11510 = vst [vmem:[#allocation264_spill] sm:$0xff] %v8638_v30  ;;  %v8642_v45 = vpop.f32.mrb[137].mxu1  ;;  %5898 = vmatmul.mubr.msk.f32.gmra.mrb[242].mxu1 %vm666_vm1, %v8007_v34  ;;  %2778 = vmatprep.mubr.f32.mxu0 %v11328_v24 }
 0x22f   : > { %11511 = vst [vmem:[#allocation265_spill] sm:$0xff] %v8642_v45  ;;  %3065 = vmatprep.mubr.f32.mxu1 %v11328_v24 }
 0x230   : > { %v8648_v27 = vpop.f32.mrb[138].mxu0 }
 0x231   : > { %11512 = vst [vmem:[#allocation266_spill] sm:$0xff] %v8648_v27  ;;  %v8650_v39 = vpop.f32.mrb[138].mxu1  ;;  %v8652_v31 = vpop.f32.mrb[139].mxu0  ;;  %5860 = vmatmul.mubr.msk.f32.gmra.mrb[244].mxu0 %vm666_vm1, %v8026_v26 }
 0x232   : > { %11513 = vst [vmem:[#allocation267_spill] sm:$0xff] %v8650_v39  ;;  %11514 = vst [vmem:[#allocation268_spill] sm:$0xff] %v8652_v31  ;;  %v8656_v30 = vpop.f32.mrb[139].mxu1  ;;  %5899 = vmatmul.mubr.msk.f32.gmra.mrb[244].mxu1 %vm666_vm1, %v8026_v26  ;;  %2784 = vmatprep.mubr.f32.mxu0 %v11328_v24 }
 0x233   : > { %11515 = vst [vmem:[#allocation269_spill] sm:$0xff] %v8656_v30  ;;  %3071 = vmatprep.mubr.f32.mxu1 %v11328_v24 }
 0x234   : > { %v8662_v34 = vpop.f32.mrb[140].mxu0 }
 0x235   : > { %11516 = vst [vmem:[#allocation270_spill] sm:$0xff] %v8662_v34  ;;  %v8664_v45 = vpop.f32.mrb[140].mxu1  ;;  %v8666_v27 = vpop.f32.mrb[141].mxu0  ;;  %5861 = vmatmul.mubr.msk.f32.gmra.mrb[246].mxu0 %vm666_vm1, %v8045_v25 }
 0x236   : > { %11517 = vst [vmem:[#allocation271_spill] sm:$0xff] %v8664_v45  ;;  %11518 = vst [vmem:[#allocation272_spill] sm:$0xff] %v8666_v27  ;;  %v8670_v31 = vpop.f32.mrb[141].mxu1  ;;  %5900 = vmatmul.mubr.msk.f32.gmra.mrb[246].mxu1 %vm666_vm1, %v8045_v25  ;;  %2790 = vmatprep.mubr.f32.mxu0 %v11328_v24 }
 0x237   : > { %11519 = vst [vmem:[#allocation273_spill] sm:$0xff] %v8670_v31  ;;  %3077 = vmatprep.mubr.f32.mxu1 %v11328_v24 }
 0x238   : > { %v8676_v26 = vpop.f32.mrb[142].mxu0 }
 0x239   : > { %11520 = vst [vmem:[#allocation274_spill] sm:$0xff] %v8676_v26  ;;  %v8678_v30 = vpop.f32.mrb[142].mxu1  ;;  %v8680_v34 = vpop.f32.mrb[143].mxu0  ;;  %5862 = vmatmul.mubr.msk.f32.gmra.mrb[248].mxu0 %vm666_vm1, %v8064_v23 }
 0x23a   : > { %11521 = vst [vmem:[#allocation275_spill] sm:$0xff] %v8678_v30  ;;  %11522 = vst [vmem:[#allocation276_spill] sm:$0xff] %v8680_v34  ;;  %v8684_v27 = vpop.f32.mrb[143].mxu1  ;;  %5901 = vmatmul.mubr.msk.f32.gmra.mrb[248].mxu1 %vm666_vm1, %v8064_v23  ;;  %2796 = vmatprep.mubr.f32.mxu0 %v11328_v24 }
 0x23b   : > { %11523 = vst [vmem:[#allocation277_spill] sm:$0xff] %v8684_v27  ;;  %3083 = vmatprep.mubr.f32.mxu1 %v11328_v24 }
 0x23c   : > { %v8690_v25 = vpop.f32.mrb[144].mxu0 }
 0x23d   : > { %11524 = vst [vmem:[#allocation278_spill] sm:$0xff] %v8690_v25  ;;  %v8692_v31 = vpop.f32.mrb[144].mxu1  ;;  %v8694_v26 = vpop.f32.mrb[145].mxu0  ;;  %5863 = vmatmul.mubr.msk.f32.gmra.mrb[250].mxu0 %vm666_vm1, %v8083_v22 }
 0x23e   : > { %11525 = vst [vmem:[#allocation279_spill] sm:$0xff] %v8692_v31  ;;  %11526 = vst [vmem:[#allocation280_spill] sm:$0xff] %v8694_v26  ;;  %v8698_v34 = vpop.f32.mrb[145].mxu1  ;;  %5902 = vmatmul.mubr.msk.f32.gmra.mrb[250].mxu1 %vm666_vm1, %v8083_v22  ;;  %2802 = vmatprep.mubr.f32.mxu0 %v11328_v24 }
 0x23f   : > { %11527 = vst [vmem:[#allocation281_spill] sm:$0xff] %v8698_v34  ;;  %3089 = vmatprep.mubr.f32.mxu1 %v11328_v24 }
 0x240   : > { %v8704_v23 = vpop.f32.mrb[146].mxu0 }
 0x241   : > { %11528 = vst [vmem:[#allocation282_spill] sm:$0xff] %v8704_v23  ;;  %v8706_v27 = vpop.f32.mrb[146].mxu1  ;;  %v8708_v25 = vpop.f32.mrb[147].mxu0  ;;  %5864 = vmatmul.mubr.msk.f32.gmra.mrb[252].mxu0 %vm666_vm1, %v8102_v9 }
 0x242   : > { %11529 = vst [vmem:[#allocation283_spill] sm:$0xff] %v8706_v27  ;;  %11530 = vst [vmem:[#allocation284_spill] sm:$0xff] %v8708_v25  ;;  %v8712_v26 = vpop.f32.mrb[147].mxu1  ;;  %5903 = vmatmul.mubr.msk.f32.gmra.mrb[252].mxu1 %vm666_vm1, %v8102_v9  ;;  %2808 = vmatprep.mubr.f32.mxu0 %v11328_v24 }
 0x243   : > { %11531 = vst [vmem:[#allocation285_spill] sm:$0xff] %v8712_v26  ;;  %3095 = vmatprep.mubr.f32.mxu1 %v11328_v24 }
 0x244   : > { %v2140_v22 = vpop.f32.mrb[148].mxu0 }
 0x245   : > { %v3238_v34 = vmul.f32 %v2140_v22, %v7511_v16  ;;  %v8720_v23 = vmul.f32 %v2140_v22, %v8124_v10  ;;  %v2427_v27 = vpop.f32.mrb[148].mxu1  ;;  %v2142_v25 = vpop.f32.mrb[149].mxu0  ;;  %5865 = vmatmul.mubr.msk.f32.gmra.mrb[254].mxu0 %vm666_vm1, %v8121_v11 }
 0x246   : > { %v3240_v26 = vmul.f32 %v2427_v27, %v7513_v20  ;;  %v8726_v31 = vmul.f32 %v2427_v27, %v8126_v43  ;;  %v3239_v9 = vmul.f32 %v2142_v25, %v7515_v55  ;;  %v8730_v30 = vmul.f32 %v2142_v25, %v8128_v59  ;;  %v2429_v45 = vpop.f32.mrb[149].mxu1  ;;  %5904 = vmatmul.mubr.msk.f32.gmra.mrb[254].mxu1 %vm666_vm1, %v8121_v11 }
 0x247   : > { %11532 = vst [vmem:[#allocation286_spill] sm:$0xff] %v8720_v23  ;;  %v3241_v16 = vmul.f32 %v2429_v45, %v7519_v6  ;;  %v8736_v22 = vmul.f32 %v2429_v45, %v8132_v42  ;;  %2814 = vmatprep.mubr.f32.mxu0 %v11328_v24  ;;  %3101 = vmatprep.mubr.f32.mxu1 %v11328_v24 }
 0x248   : > { %11533 = vst [vmem:[#allocation287_spill] sm:$0xff] %v8726_v31  ;;  %v2146_v20 = vpop.f32.mrb[150].mxu0  ;;  %v11564_v31 = vld [vmem:[#allocation152_spill] sm:$0xff] }
 0x249   : > { %v3242_v27 = vmul.f32 %v2146_v20, %v7525_v44  ;;  %v8742_v55 = vmul.f32 %v2146_v20, %v8143_v56  ;;  %v2433_v25 = vpop.f32.mrb[150].mxu1  ;;  %v2148_v59 = vpop.f32.mrb[151].mxu0  ;;  %5866 = vmatmul.mubr.msk.f32.gmra.mrb[0].mxu0 %vm666_vm1, %v8140_v28 }
 0x24a   : > { %v3244_v11 = vmul.f32 %v2433_v25, %v7527_v52  ;;  %v8748_v6 = vmul.f32 %v2433_v25, %v8145_v51  ;;  %v3243_v45 = vmul.f32 %v2148_v59, %v7529_v58  ;;  %v8752_v42 = vmul.f32 %v2148_v59, %v8147_v3  ;;  %v2435_v43 = vpop.f32.mrb[151].mxu1  ;;  %5905 = vmatmul.mubr.msk.f32.gmra.mrb[0].mxu1 %vm666_vm1, %v8140_v28  ;;  %v11552_v3 = vld [vmem:[#allocation147_spill] sm:$0xff] }
 0x24b   : > { %11534 = vst [vmem:[#allocation288_spill] sm:$0xff] %v8742_v55  ;;  %v6024_v44 = vpack.c.bf16 %v3242_v27, %v3238_v34  ;;  %v3245_v56 = vmul.f32 %v2435_v43, %v7533_v60  ;;  %v8760_v52 = vmul.f32 %v2435_v43, %v8151_v47  ;;  %2820 = vmatprep.mubr.f32.mxu0 %v11328_v24  ;;  %v11550_v60 = vld [vmem:[#allocation144_spill] sm:$0xff]  ;;  %v11591_v55 = vld [vmem:[#allocation162_spill] sm:$0xff] }
 0x24c   : > { %11535 = vst [vmem:[#allocation289_spill] sm:$0xff] %v8748_v6  ;;  %v6096_v25 = vpack.c.bf16 %v3244_v11, %v3240_v26  ;;  %v6022_v59 = vpack.c.bf16 %v3243_v45, %v3239_v9  ;;  %v2152_v28 = vpop.f32.mrb[152].mxu0  ;;  %3107 = vmatprep.mubr.f32.mxu1 %v11328_v24 }
 0x24d   : > { %v6094_v34 = vpack.c.bf16 %v3245_v56, %v3241_v16  ;;  %v3246_v43 = vmul.f32 %v2152_v28, %v7539_v61  ;;  %v8772_v27 = vmul.f32 %v2152_v28, %v8162_v7  ;;  %v2439_v26 = vpop.f32.mrb[152].mxu1  ;;  %v2154_v11 = vpop.f32.mrb[153].mxu0  ;;  %5867 = vmatmul.mubr.msk.f32.gmra.mrb[2].mxu0 %vm666_vm1, %v8159_v21 }
 0x24e   : > { %v3248_v9 = vmul.f32 %v2439_v26, %v7541_v62  ;;  %v8778_v45 = vmul.f32 %v2439_v26, %v8164_v35  ;;  %v3247_v56 = vmul.f32 %v2154_v11, %v7543_v63  ;;  %v8782_v16 = vmul.f32 %v2154_v11, %v8166_v46  ;;  %v2441_v58 = vpop.f32.mrb[153].mxu1  ;;  %5906 = vmatmul.mubr.msk.f32.gmra.mrb[2].mxu1 %vm666_vm1, %v8159_v21 }
 0x24f   : > { %11536 = vst [vmem:[#allocation290_spill] sm:$0xff] %v8772_v27  ;;  %v3249_v61 = vmul.f32 %v2441_v58, %v7547_v0  ;;  %v8788_v28 = vmul.f32 %v2441_v58, %v8170_v19  ;;  %6023 = vmatprep.subr.bf16.mxu0 %v6022_v59  ;;  %6095 = vmatprep.subr.bf16.mxu1 %v6094_v34 }
 0x250   : > { %11537 = vst [vmem:[#allocation291_spill] sm:$0xff] %v8778_v45  ;;  %11538 = vst [vmem:[#allocation292_spill] sm:$0xff] %v8782_v16  ;;  %6025 = vmatpush1.bf16.msra.mxu0 %v6024_v44  ;;  %6097 = vmatpush1.bf16.msra.mxu1 %v6096_v25  ;;  %v2158_v62 = vpop.f32.mrb[154].mxu0  ;;  %v11563_v16 = vld [vmem:[#allocation14_spill] sm:$0xff] }
 0x251   : > { %11539 = vst [vmem:[#allocation293_spill] sm:$0xff] %v8788_v28  ;;  %v3250_v26 = vmul.f32 %v2158_v62, %v7553_v1  ;;  %v8792_v63 = vmul.f32 %v2158_v62, %v8181_v4  ;;  %v2445_v11 = vpop.f32.mrb[154].mxu1  ;;  %2826 = vmatprep.mubr.f32.mxu0 %v11328_v24  ;;  %3113 = vmatprep.mubr.f32.mxu1 %v11328_v24  ;;  %v2160_v21 = vpop.f32.mrb[155].mxu0  ;;  %v11558_v28 = vld [vmem:[#allocation150_spill] sm:$0xff] }
 0x252   : > { %v3252_v0 = vmul.f32 %v2445_v11, %v7555_v2  ;;  %v8798_v58 = vmul.f32 %v2445_v11, %v8183_v18  ;;  %v3251_v44 = vmul.f32 %v2160_v21, %v7557_v32  ;;  %v8802_v25 = vmul.f32 %v2160_v21, %v8185_v17  ;;  %v2447_v1 = vpop.f32.mrb[155].mxu1  ;;  %5868 = vmatmul.mubr.msk.f32.gmra.mrb[4].mxu0 %vm666_vm1, %v8178_v5  ;;  %v11547_v11 = vld [vmem:[#allocation9_spill] sm:$0xff] }
 0x253   : > { %11540 = vst [vmem:[#allocation294_spill] sm:$0xff] %v8792_v63  ;;  %v6028_v59 = vpack.c.bf16 %v3250_v26, %v3246_v43  ;;  %v3253_v62 = vmul.f32 %v2447_v1, %v7561_v33  ;;  %v8810_v2 = vmul.f32 %v2447_v1, %v8189_v15  ;;  %5907 = vmatmul.mubr.msk.f32.gmra.mrb[4].mxu1 %vm666_vm1, %v8178_v5  ;;  %v11557_v63 = vld [vmem:[#allocation12_spill] sm:$0xff] }
 0x254   : > { %11541 = vst [vmem:[#allocation295_spill] sm:$0xff] %v8798_v58  ;;  %11542 = vst [vmem:[#allocation296_spill] sm:$0xff] %v8802_v25  ;;  %v6100_v32 = vpack.c.bf16 %v3252_v0, %v3248_v9  ;;  %v6026_v21 = vpack.c.bf16 %v3251_v44, %v3247_v56  ;;  %v2164_v43 = vpop.f32.mrb[156].mxu0  ;;  %2832 = vmatprep.mubr.f32.mxu0 %v11328_v24  ;;  %3119 = vmatprep.mubr.f32.mxu1 %v11328_v24  ;;  %v11545_v0 = vld [vmem:[#allocation145_spill] sm:$0xff] }
 0x255   : > { %11543 = vst [vmem:[#allocation297_spill] sm:$0xff] %v8810_v2  ;;  %v6098_v26 = vpack.c.bf16 %v3253_v62, %v3249_v61  ;;  %v3254_v1 = vmul.f32 %v2164_v43, %v7567_v50  ;;  %v8823_v34 = vmul.f32 %v2164_v43, %v8200_v40  ;;  %v2451_v5 = vpop.f32.mrb[156].mxu1  ;;  %v2166_v9 = vpop.f32.mrb[157].mxu0  ;;  %v11548_v61 = vld [vmem:[#allocation146_spill] sm:$0xff] }
 0x256   : > { %v3256_v56 = vmul.f32 %v2451_v5, %v7569_v48  ;;  %v8828_v44 = vmul.f32 %v2451_v5, %v11545_v0  ;;  %v3255_v20 = vmul.f32 %v2166_v9, %v11547_v11  ;;  %v8832_v62 = vmul.f32 %v2166_v9, %v11548_v61  ;;  %v2453_v33 = vpop.f32.mrb[157].mxu1  ;;  %5869 = vmatmul.mubr.msk.f32.gmra.mrb[6].mxu0 %vm666_vm1, %v11550_v60  ;;  %v11551_v50 = vld [vmem:[#allocation10_spill] sm:$0xff]  ;;  %v11554_v11 = vld [vmem:[#allocation11_spill] sm:$0xff]  ;;  %v11555_v9 = vld [vmem:[#allocation149_spill] sm:$0xff] }
 0x257   : > { %11544 = vst [vmem:[#allocation298_spill] sm:$0xff] %v8823_v34  ;;  %v3257_v43 = vmul.f32 %v2453_v33, %v11551_v50  ;;  %v8838_v45 = vmul.f32 %v2453_v33, %v11552_v3  ;;  %5908 = vmatmul.mubr.msk.f32.gmra.mrb[6].mxu1 %vm666_vm1, %v11550_v60  ;;  %6027 = vmatprep.subr.bf16.mxu0 %v6026_v21  ;;  %v11560_v60 = vld [vmem:[#allocation13_spill] sm:$0xff]  ;;  %v11561_v21 = vld [vmem:[#allocation151_spill] sm:$0xff]  ;;  %v11568_v34 = vld [vmem:[#allocation154_spill] sm:$0xff] }
 0x258   : > { %11546 = vst [vmem:[#allocation145_spill] sm:$0xff] %v8828_v44  ;;  %11549 = vst [vmem:[#allocation9_spill] sm:$0xff] %v8832_v62  ;;  %6099 = vmatprep.subr.bf16.mxu1 %v6098_v26  ;;  %6029 = vmatpush1.bf16.msra.mxu0 %v6028_v59  ;;  %v2170_v48 = vpop.f32.mrb[158].mxu0  ;;  %v11576_v44 = vld [vmem:[#allocation18_spill] sm:$0xff] }
 0x259   : > { %11553 = vst [vmem:[#allocation146_spill] sm:$0xff] %v8838_v45  ;;  %6101 = vmatpush1.bf16.msra.mxu1 %v6100_v32  ;;  %v3258_v5 = vmul.f32 %v2170_v48, %v11554_v11  ;;  %v8844_v58 = vmul.f32 %v2170_v48, %v11555_v9  ;;  %v2457_v27 = vpop.f32.mrb[158].mxu1  ;;  %2838 = vmatprep.mubr.f32.mxu0 %v11328_v24  ;;  %v2172_v50 = vpop.f32.mrb[159].mxu0 }
 0x25a   : > { %v3260_v33 = vmul.f32 %v2457_v27, %v11557_v63  ;;  %v8849_v2 = vmul.f32 %v2457_v27, %v11558_v28  ;;  %3125 = vmatprep.mubr.f32.mxu1 %v11328_v24  ;;  %v3259_v59 = vmul.f32 %v2172_v50, %v11560_v60  ;;  %v8854_v32 = vmul.f32 %v2172_v50, %v11561_v21  ;;  %v2459_v26 = vpop.f32.mrb[159].mxu1  ;;  %v11566_v63 = vld [vmem:[#allocation148_spill] sm:$0xff]  ;;  %v11571_v60 = vld [vmem:[#allocation155_spill] sm:$0xff] }
 0x25b   : > { %11556 = vst [vmem:[#allocation144_spill] sm:$0xff] %v8844_v58  ;;  %v6032_v11 = vpack.c.bf16 %v3258_v5, %v3254_v1  ;;  %v3261_v25 = vmul.f32 %v2459_v26, %v11563_v16  ;;  %v8860_v6 = vmul.f32 %v2459_v26, %v11564_v31  ;;  %5870 = vmatmul.mubr.msk.f32.gmra.mrb[8].mxu0 %vm666_vm1, %v11566_v63  ;;  %v11567_v26 = vld [vmem:[#allocation15_spill] sm:$0xff] }
 0x25c   : > { %11559 = vst [vmem:[#allocation10_spill] sm:$0xff] %v8849_v2  ;;  %11562 = vst [vmem:[#allocation147_spill] sm:$0xff] %v8854_v32  ;;  %v6104_v27 = vpack.c.bf16 %v3260_v33, %v3256_v56  ;;  %v6030_v23 = vpack.c.bf16 %v3259_v59, %v3255_v20  ;;  %5909 = vmatmul.mubr.msk.f32.gmra.mrb[8].mxu1 %vm666_vm1, %v11566_v63  ;;  %v2176_v1 = vpop.f32.mrb[160].mxu0  ;;  %2844 = vmatprep.mubr.f32.mxu0 %v11328_v24  ;;  %v11570_v33 = vld [vmem:[#allocation16_spill] sm:$0xff]  ;;  %v11577_v2 = vld [vmem:[#allocation157_spill] sm:$0xff] }
 0x25d   : > { %11565 = vst [vmem:[#allocation11_spill] sm:$0xff] %v8860_v6  ;;  %v6102_v5 = vpack.c.bf16 %v3261_v25, %v3257_v43  ;;  %v3262_v48 = vmul.f32 %v2176_v1, %v11567_v26  ;;  %v8874_v58 = vmul.f32 %v2176_v1, %v11568_v34  ;;  %v2463_v56 = vpop.f32.mrb[160].mxu1  ;;  %v2178_v20 = vpop.f32.mrb[161].mxu0  ;;  %3131 = vmatprep.mubr.f32.mxu1 %v11328_v24  ;;  %v11573_v25 = vld [vmem:[#allocation17_spill] sm:$0xff]  ;;  %v11574_v63 = vld [vmem:[#allocation156_spill] sm:$0xff] }
 0x25e   : > { %v3264_v59 = vmul.f32 %v2463_v56, %v11570_v33  ;;  %v8879_v50 = vmul.f32 %v2463_v56, %v11571_v60  ;;  %v3263_v43 = vmul.f32 %v2178_v20, %v11573_v25  ;;  %v8884_v16 = vmul.f32 %v2178_v20, %v11574_v63  ;;  %v2465_v26 = vpop.f32.mrb[161].mxu1  ;;  %v11579_v6 = vld [vmem:[#allocation153_spill] sm:$0xff]  ;;  %6031 = vmatprep.subr.bf16.mxu0 %v6030_v23  ;;  %v11580_v33 = vld [vmem:[#allocation19_spill] sm:$0xff]  ;;  %v11584_v63 = vld [vmem:[#allocation160_spill] sm:$0xff] }
 0x25f   : > { %11569 = vst [vmem:[#allocation149_spill] sm:$0xff] %v8874_v58  ;;  %v3265_v1 = vmul.f32 %v2465_v26, %v11576_v44  ;;  %v8888_v45 = vmul.f32 %v2465_v26, %v11577_v2  ;;  %5871 = vmatmul.mubr.msk.f32.gmra.mrb[10].mxu0 %vm666_vm1, %v11579_v6  ;;  %6103 = vmatprep.subr.bf16.mxu1 %v6102_v5  ;;  %v11581_v25 = vld [vmem:[#allocation159_spill] sm:$0xff]  ;;  %v11583_v26 = vld [vmem:[#allocation20_spill] sm:$0xff]  ;;  %v11586_v23 = vld [vmem:[#allocation21_spill] sm:$0xff] }
 0x260   : > { %11572 = vst [vmem:[#allocation12_spill] sm:$0xff] %v8879_v50  ;;  %11575 = vst [vmem:[#allocation150_spill] sm:$0xff] %v8884_v16  ;;  %5910 = vmatmul.mubr.msk.f32.gmra.mrb[10].mxu1 %vm666_vm1, %v11579_v6  ;;  %v2182_v56 = vpop.f32.mrb[162].mxu0  ;;  %6033 = vmatpush1.bf16.msra.mxu0 %v6032_v11  ;;  %v11594_v58 = vld [vmem:[#allocation164_spill] sm:$0xff] }
 0x261   : > { %11578 = vst [vmem:[#allocation13_spill] sm:$0xff] %v8888_v45  ;;  %6105 = vmatpush1.bf16.msra.mxu1 %v6104_v27  ;;  %v3266_v20 = vmul.f32 %v2182_v56, %v11580_v33  ;;  %v8896_v62 = vmul.f32 %v2182_v56, %v11581_v25  ;;  %v2469_v44 = vpop.f32.mrb[162].mxu1  ;;  %v2184_v32 = vpop.f32.mrb[163].mxu0  ;;  %2850 = vmatprep.mubr.f32.mxu0 %v11328_v24  ;;  %v11587_v56 = vld [vmem:[#allocation161_spill] sm:$0xff]  ;;  %v11589_v25 = vld [vmem:[#allocation22_spill] sm:$0xff] }
 0x262   : > { %v3268_v2 = vmul.f32 %v2469_v44, %v11583_v26  ;;  %v8900_v60 = vmul.f32 %v2469_v44, %v11584_v63  ;;  %3137 = vmatprep.mubr.f32.mxu1 %v11328_v24  ;;  %v3267_v6 = vmul.f32 %v2184_v32, %v11586_v23  ;;  %v2471_v11 = vpop.f32.mrb[163].mxu1  ;;  %v8908_v33 = vmul.f32 %v2184_v32, %v11587_v56  ;;  %v11590_v26 = vld [vmem:[#allocation158_spill] sm:$0xff]  ;;  %v11597_v63 = vld [vmem:[#allocation165_spill] sm:$0xff] }
 0x263   : > { %11582 = vst [vmem:[#allocation151_spill] sm:$0xff] %v8896_v62  ;;  %v6036_v27 = vpack.c.bf16 %v3266_v20, %v3262_v48  ;;  %v3269_v34 = vmul.f32 %v2471_v11, %v11589_v25  ;;  %5872 = vmatmul.mubr.msk.f32.gmra.mrb[12].mxu0 %vm666_vm1, %v11590_v26  ;;  %v8916_v23 = vmul.f32 %v2471_v11, %v11591_v55  ;;  %v11593_v25 = vld [vmem:[#allocation23_spill] sm:$0xff]  ;;  %v11596_v11 = vld [vmem:[#allocation24_spill] sm:$0xff]  ;;  %v11600_v32 = vld [vmem:[#allocation166_spill] sm:$0xff] }
 0x264   : > { %11585 = vst [vmem:[#allocation14_spill] sm:$0xff] %v8900_v60  ;;  %11588 = vst [vmem:[#allocation148_spill] sm:$0xff] %v8908_v33  ;;  %v6108_v44 = vpack.c.bf16 %v3268_v2, %v3264_v59  ;;  %v6034_v31 = vpack.c.bf16 %v3267_v6, %v3263_v43  ;;  %5911 = vmatmul.mubr.msk.f32.gmra.mrb[12].mxu1 %vm666_vm1, %v11590_v26  ;;  %v2188_v48 = vpop.f32.mrb[164].mxu0  ;;  %2856 = vmatprep.mubr.f32.mxu0 %v11328_v24  ;;  %v11602_v60 = vld [vmem:[#allocation26_spill] sm:$0xff]  ;;  %v11605_v33 = vld [vmem:[#allocation163_spill] sm:$0xff] }
 0x265   : > { %11592 = vst [vmem:[#allocation15_spill] sm:$0xff] %v8916_v23  ;;  %v6106_v20 = vpack.c.bf16 %v3269_v34, %v3265_v1  ;;  %v8923_v5 = vmul.f32 %v2188_v48, %v11593_v25  ;;  %v8926_v2 = vmul.f32 %v2188_v48, %v11594_v58  ;;  %v2475_v59 = vpop.f32.mrb[164].mxu1  ;;  %v2190_v43 = vpop.f32.mrb[165].mxu0  ;;  %3143 = vmatprep.mubr.f32.mxu1 %v11328_v24  ;;  %v11599_v34 = vld [vmem:[#allocation25_spill] sm:$0xff]  ;;  %v11603_v58 = vld [vmem:[#allocation167_spill] sm:$0xff]  ;;  %v11616_v23 = vld [vmem:[#allocation168_spill] sm:$0xff] }
 0x266   : > { %v3272_v26 = vmul.f32 %v2475_v59, %v11596_v11  ;;  %v8933_v50 = vmul.f32 %v2475_v59, %v11597_v63  ;;  %v3271_v1 = vmul.f32 %v2190_v43, %v11599_v34  ;;  %v2477_v25 = vpop.f32.mrb[165].mxu1  ;;  %v8938_v48 = vmul.f32 %v2190_v43, %v11600_v32  ;;  %6035 = vmatprep.subr.bf16.mxu0 %v6034_v31  ;;  %v11606_v11 = vld [vmem:[#allocation27_spill] sm:$0xff]  ;;  %v11607_v43 = vld [vmem:[#allocation169_spill] sm:$0xff]  ;;  %v11610_v63 = vld [vmem:[#allocation170_spill] sm:$0xff] }
 0x267   : > { %11595 = vst [vmem:[#allocation16_spill] sm:$0xff] %v8926_v2  ;;  %v3273_v62 = vmul.f32 %v2477_v25, %v11602_v60  ;;  %v8942_v16 = vmul.f32 %v2477_v25, %v11603_v58  ;;  %5873 = vmatmul.mubr.msk.f32.gmra.mrb[14].mxu0 %vm666_vm1, %v11605_v33  ;;  %6107 = vmatprep.subr.bf16.mxu1 %v6106_v20  ;;  %v11609_v25 = vld [vmem:[#allocation28_spill] sm:$0xff]  ;;  %v11612_v31 = vld [vmem:[#allocation29_spill] sm:$0xff]  ;;  %v11620_v2 = vld [vmem:[#allocation174_spill] sm:$0xff] }
 0x268   : > { %11598 = vst [vmem:[#allocation17_spill] sm:$0xff] %v8933_v50  ;;  %11601 = vst [vmem:[#allocation18_spill] sm:$0xff] %v8938_v48  ;;  %5912 = vmatmul.mubr.msk.f32.gmra.mrb[14].mxu1 %vm666_vm1, %v11605_v33  ;;  %v2194_v59 = vpop.f32.mrb[166].mxu0  ;;  %6037 = vmatpush1.bf16.msra.mxu0 %v6036_v27 }
 0x269   : > { %11604 = vst [vmem:[#allocation153_spill] sm:$0xff] %v8942_v16  ;;  %6109 = vmatpush1.bf16.msra.mxu1 %v6108_v44  ;;  %v3274_v34 = vmul.f32 %v2194_v59, %v11606_v11  ;;  %v8950_v6 = vmul.f32 %v2194_v59, %v11607_v43  ;;  %v2481_v60 = vpop.f32.mrb[166].mxu1  ;;  %v2196_v32 = vpop.f32.mrb[167].mxu0  ;;  %2862 = vmatprep.mubr.f32.mxu0 %v11328_v24  ;;  %v11613_v59 = vld [vmem:[#allocation171_spill] sm:$0xff]  ;;  %v11615_v43 = vld [vmem:[#allocation30_spill] sm:$0xff] }
 0x26a   : > { %v3276_v58 = vmul.f32 %v2481_v60, %v11609_v25  ;;  %v8954_v45 = vmul.f32 %v2481_v60, %v11610_v63  ;;  %3149 = vmatprep.mubr.f32.mxu1 %v11328_v24  ;;  %v3275_v33 = vmul.f32 %v2196_v32, %v11612_v31  ;;  %v2483_v27 = vpop.f32.mrb[167].mxu1  ;;  %v8963_v11 = vmul.f32 %v2196_v32, %v11613_v59  ;;  %v11617_v31 = vld [vmem:[#allocation172_spill] sm:$0xff]  ;;  %v11623_v63 = vld [vmem:[#allocation175_spill] sm:$0xff]  ;;  %v11631_v59 = vld [vmem:[#allocation173_spill] sm:$0xff] }
 0x26b   : > { %11608 = vst [vmem:[#allocation19_spill] sm:$0xff] %v8950_v6  ;;  %v6040_v44 = vpack.c.bf16 %v3274_v34, %v8923_v5  ;;  %v3277_v25 = vmul.f32 %v2483_v27, %v11615_v43  ;;  %5874 = vmatmul.mubr.msk.f32.gmra.mrb[16].mxu0 %vm666_vm1, %v11616_v23  ;;  %v8971_v56 = vmul.f32 %v2483_v27, %v11617_v31  ;;  %v11619_v43 = vld [vmem:[#allocation31_spill] sm:$0xff]  ;;  %v11622_v27 = vld [vmem:[#allocation32_spill] sm:$0xff]  ;;  %v11629_v31 = vld [vmem:[#allocation177_spill] sm:$0xff] }
 0x26c   : > { %11611 = vst [vmem:[#allocation20_spill] sm:$0xff] %v8954_v45  ;;  %11614 = vst [vmem:[#allocation21_spill] sm:$0xff] %v8963_v11  ;;  %v6112_v60 = vpack.c.bf16 %v3276_v58, %v3272_v26  ;;  %v6038_v55 = vpack.c.bf16 %v3275_v33, %v3271_v1  ;;  %5913 = vmatmul.mubr.msk.f32.gmra.mrb[16].mxu1 %vm666_vm1, %v11616_v23  ;;  %v2200_v5 = vpop.f32.mrb[168].mxu0  ;;  %2868 = vmatprep.mubr.f32.mxu0 %v11328_v24  ;;  %v11626_v32 = vld [vmem:[#allocation176_spill] sm:$0xff] }
 0x26d   : > { %11618 = vst [vmem:[#allocation22_spill] sm:$0xff] %v8971_v56  ;;  %v6110_v34 = vpack.c.bf16 %v3277_v25, %v3273_v62  ;;  %v8978_v20 = vmul.f32 %v2200_v5, %v11619_v43  ;;  %v8981_v58 = vmul.f32 %v2200_v5, %v11620_v2  ;;  %v2487_v26 = vpop.f32.mrb[168].mxu1  ;;  %v2202_v1 = vpop.f32.mrb[169].mxu0  ;;  %3155 = vmatprep.mubr.f32.mxu1 %v11328_v24  ;;  %v11625_v62 = vld [vmem:[#allocation33_spill] sm:$0xff]  ;;  %v11628_v2 = vld [vmem:[#allocation34_spill] sm:$0xff] }
 0x26e   : > { %v3280_v23 = vmul.f32 %v2487_v26, %v11622_v27  ;;  %v8988_v50 = vmul.f32 %v2487_v26, %v11623_v63  ;;  %v3279_v25 = vmul.f32 %v2202_v1, %v11625_v62  ;;  %v2489_v43 = vpop.f32.mrb[169].mxu1  ;;  %v8993_v5 = vmul.f32 %v2202_v1, %v11626_v32  ;;  %6039 = vmatprep.subr.bf16.mxu0 %v6038_v55  ;;  %v11632_v27 = vld [vmem:[#allocation35_spill] sm:$0xff]  ;;  %v11636_v63 = vld [vmem:[#allocation180_spill] sm:$0xff]  ;;  %v11638_v55 = vld [vmem:[#allocation37_spill] sm:$0xff] }
 0x26f   : > { %11621 = vst [vmem:[#allocation158_spill] sm:$0xff] %v8981_v58  ;;  %v3281_v45 = vmul.f32 %v2489_v43, %v11628_v2  ;;  %v8997_v6 = vmul.f32 %v2489_v43, %v11629_v31  ;;  %5875 = vmatmul.mubr.msk.f32.gmra.mrb[18].mxu0 %vm666_vm1, %v11631_v59  ;;  %6111 = vmatprep.subr.bf16.mxu1 %v6110_v34  ;;  %v11633_v1 = vld [vmem:[#allocation179_spill] sm:$0xff]  ;;  %v11635_v43 = vld [vmem:[#allocation36_spill] sm:$0xff]  ;;  %v11642_v56 = vld [vmem:[#allocation178_spill] sm:$0xff] }
 0x270   : > { %11624 = vst [vmem:[#allocation23_spill] sm:$0xff] %v8988_v50  ;;  %11627 = vst [vmem:[#allocation24_spill] sm:$0xff] %v8993_v5  ;;  %5914 = vmatmul.mubr.msk.f32.gmra.mrb[18].mxu1 %vm666_vm1, %v11631_v59  ;;  %v2206_v26 = vpop.f32.mrb[170].mxu0  ;;  %6041 = vmatpush1.bf16.msra.mxu0 %v6040_v44 }
 0x271   : > { %11630 = vst [vmem:[#allocation25_spill] sm:$0xff] %v8997_v6  ;;  %6113 = vmatpush1.bf16.msra.mxu1 %v6112_v60  ;;  %v3282_v62 = vmul.f32 %v2206_v26, %v11632_v27  ;;  %v9005_v33 = vmul.f32 %v2206_v26, %v11633_v1  ;;  %v2493_v2 = vpop.f32.mrb[170].mxu1  ;;  %v2208_v32 = vpop.f32.mrb[171].mxu0  ;;  %2874 = vmatprep.mubr.f32.mxu0 %v11328_v24  ;;  %v11639_v26 = vld [vmem:[#allocation181_spill] sm:$0xff]  ;;  %v11641_v1 = vld [vmem:[#allocation38_spill] sm:$0xff] }
 0x272   : > { %v3284_v31 = vmul.f32 %v2493_v2, %v11635_v43  ;;  %v9009_v16 = vmul.f32 %v2493_v2, %v11636_v63  ;;  %3161 = vmatprep.mubr.f32.mxu1 %v11328_v24  ;;  %v3283_v59 = vmul.f32 %v2208_v32, %v11638_v55  ;;  %v2495_v44 = vpop.f32.mrb[171].mxu1  ;;  %v9018_v27 = vmul.f32 %v2208_v32, %v11639_v26  ;;  %v11643_v55 = vld [vmem:[#allocation182_spill] sm:$0xff]  ;;  %v11646_v26 = vld [vmem:[#allocation184_spill] sm:$0xff]  ;;  %v11649_v63 = vld [vmem:[#allocation185_spill] sm:$0xff] }
 0x273   : > { %11634 = vst [vmem:[#allocation26_spill] sm:$0xff] %v9005_v33  ;;  %v6044_v60 = vpack.c.bf16 %v3282_v62, %v8978_v20  ;;  %v3285_v43 = vmul.f32 %v2495_v44, %v11641_v1  ;;  %5876 = vmatmul.mubr.msk.f32.gmra.mrb[20].mxu0 %vm666_vm1, %v11642_v56  ;;  %v9026_v11 = vmul.f32 %v2495_v44, %v11643_v55  ;;  %v11645_v1 = vld [vmem:[#allocation39_spill] sm:$0xff]  ;;  %v11648_v44 = vld [vmem:[#allocation40_spill] sm:$0xff]  ;;  %v11652_v32 = vld [vmem:[#allocation186_spill] sm:$0xff] }
 0x274   : > { %11637 = vst [vmem:[#allocation163_spill] sm:$0xff] %v9009_v16  ;;  %11640 = vst [vmem:[#allocation27_spill] sm:$0xff] %v9018_v27  ;;  %v6116_v2 = vpack.c.bf16 %v3284_v31, %v3280_v23  ;;  %v6042_v48 = vpack.c.bf16 %v3283_v59, %v3279_v25  ;;  %5915 = vmatmul.mubr.msk.f32.gmra.mrb[20].mxu1 %vm666_vm1, %v11642_v56  ;;  %v2212_v20 = vpop.f32.mrb[172].mxu0  ;;  %2880 = vmatprep.mubr.f32.mxu0 %v11328_v24  ;;  %v11655_v16 = vld [vmem:[#allocation187_spill] sm:$0xff] }
 0x275   : > { %11644 = vst [vmem:[#allocation28_spill] sm:$0xff] %v9026_v11  ;;  %v6114_v62 = vpack.c.bf16 %v3285_v43, %v3281_v45  ;;  %v9033_v34 = vmul.f32 %v2212_v20, %v11645_v1  ;;  %v9036_v31 = vmul.f32 %v2212_v20, %v11646_v26  ;;  %v2499_v23 = vpop.f32.mrb[172].mxu1  ;;  %v2214_v25 = vpop.f32.mrb[173].mxu0  ;;  %3167 = vmatprep.mubr.f32.mxu1 %v11328_v24  ;;  %v11651_v45 = vld [vmem:[#allocation41_spill] sm:$0xff]  ;;  %v11654_v26 = vld [vmem:[#allocation42_spill] sm:$0xff]  ;;  %v11657_v33 = vld [vmem:[#allocation183_spill] sm:$0xff] }
 0x276   : > { %v3288_v56 = vmul.f32 %v2499_v23, %v11648_v44  ;;  %v9043_v55 = vmul.f32 %v2499_v23, %v11649_v63  ;;  %v3287_v43 = vmul.f32 %v2214_v25, %v11651_v45  ;;  %v2501_v1 = vpop.f32.mrb[173].mxu1  ;;  %v9048_v20 = vmul.f32 %v2214_v25, %v11652_v32  ;;  %6043 = vmatprep.subr.bf16.mxu0 %v6042_v48  ;;  %v11658_v44 = vld [vmem:[#allocation43_spill] sm:$0xff]  ;;  %v11659_v25 = vld [vmem:[#allocation189_spill] sm:$0xff]  ;;  %v11662_v63 = vld [vmem:[#allocation190_spill] sm:$0xff] }
 0x277   : > { %11647 = vst [vmem:[#allocation29_spill] sm:$0xff] %v9036_v31  ;;  %v3289_v50 = vmul.f32 %v2501_v1, %v11654_v26  ;;  %v9052_v58 = vmul.f32 %v2501_v1, %v11655_v16  ;;  %5877 = vmatmul.mubr.msk.f32.gmra.mrb[22].mxu0 %vm666_vm1, %v11657_v33  ;;  %6115 = vmatprep.subr.bf16.mxu1 %v6114_v62  ;;  %v11661_v1 = vld [vmem:[#allocation44_spill] sm:$0xff]  ;;  %v11664_v48 = vld [vmem:[#allocation45_spill] sm:$0xff] }
 0x278   : > { %11650 = vst [vmem:[#allocation30_spill] sm:$0xff] %v9043_v55  ;;  %11653 = vst [vmem:[#allocation168_spill] sm:$0xff] %v9048_v20  ;;  %5916 = vmatmul.mubr.msk.f32.gmra.mrb[22].mxu1 %vm666_vm1, %v11657_v33  ;;  %v2218_v23 = vpop.f32.mrb[174].mxu0  ;;  %6045 = vmatpush1.bf16.msra.mxu0 %v6044_v60  ;;  %v11667_v11 = vld [vmem:[#allocation188_spill] sm:$0xff] }
 0x279   : > { %11656 = vst [vmem:[#allocation31_spill] sm:$0xff] %v9052_v58  ;;  %6117 = vmatpush1.bf16.msra.mxu1 %v6116_v2  ;;  %v3290_v45 = vmul.f32 %v2218_v23, %v11658_v44  ;;  %v9060_v59 = vmul.f32 %v2218_v23, %v11659_v25  ;;  %v2505_v26 = vpop.f32.mrb[174].mxu1  ;;  %v2220_v32 = vpop.f32.mrb[175].mxu0  ;;  %2886 = vmatprep.mubr.f32.mxu0 %v11328_v24  ;;  %v11665_v23 = vld [vmem:[#allocation191_spill] sm:$0xff]  ;;  %v11666_v25 = vld [vmem:[#allocation46_spill] sm:$0xff] }
 0x27a   : > { %v3292_v16 = vmul.f32 %v2505_v26, %v11661_v1  ;;  %v9064_v6 = vmul.f32 %v2505_v26, %v11662_v63  ;;  %3173 = vmatprep.mubr.f32.mxu1 %v11328_v24  ;;  %v3291_v33 = vmul.f32 %v2220_v32, %v11664_v48  ;;  %v2507_v60 = vpop.f32.mrb[175].mxu1  ;;  %v9073_v44 = vmul.f32 %v2220_v32, %v11665_v23  ;;  %v11668_v48 = vld [vmem:[#allocation192_spill] sm:$0xff]  ;;  %v11671_v23 = vld [vmem:[#allocation194_spill] sm:$0xff]  ;;  %v11674_v63 = vld [vmem:[#allocation195_spill] sm:$0xff] }
 0x27b   : > { %11660 = vst [vmem:[#allocation32_spill] sm:$0xff] %v9060_v59  ;;  %v6048_v2 = vpack.c.bf16 %v3290_v45, %v9033_v34  ;;  %v3293_v1 = vmul.f32 %v2507_v60, %v11666_v25  ;;  %5878 = vmatmul.mubr.msk.f32.gmra.mrb[24].mxu0 %vm666_vm1, %v11667_v11  ;;  %v9081_v27 = vmul.f32 %v2507_v60, %v11668_v48  ;;  %v11670_v25 = vld [vmem:[#allocation47_spill] sm:$0xff]  ;;  %v11673_v60 = vld [vmem:[#allocation48_spill] sm:$0xff]  ;;  %v11682_v59 = vld [vmem:[#allocation193_spill] sm:$0xff] }
 0x27c   : > { %11663 = vst [vmem:[#allocation33_spill] sm:$0xff] %v9064_v6  ;;  %v6120_v26 = vpack.c.bf16 %v3292_v16, %v3288_v56  ;;  %v6046_v5 = vpack.c.bf16 %v3291_v33, %v3287_v43  ;;  %5917 = vmatmul.mubr.msk.f32.gmra.mrb[24].mxu1 %vm666_vm1, %v11667_v11  ;;  %v2224_v34 = vpop.f32.mrb[176].mxu0  ;;  %2892 = vmatprep.mubr.f32.mxu0 %v11328_v24  ;;  %v11677_v32 = vld [vmem:[#allocation196_spill] sm:$0xff]  ;;  %v11680_v6 = vld [vmem:[#allocation197_spill] sm:$0xff] }
 0x27d   : > { %11669 = vst [vmem:[#allocation34_spill] sm:$0xff] %v9081_v27  ;;  %v6118_v45 = vpack.c.bf16 %v3293_v1, %v3289_v50  ;;  %v9088_v62 = vmul.f32 %v2224_v34, %v11670_v25  ;;  %v9091_v16 = vmul.f32 %v2224_v34, %v11671_v23  ;;  %v2511_v56 = vpop.f32.mrb[176].mxu1  ;;  %v2226_v43 = vpop.f32.mrb[177].mxu0  ;;  %3179 = vmatprep.mubr.f32.mxu1 %v11328_v24  ;;  %v11676_v50 = vld [vmem:[#allocation49_spill] sm:$0xff]  ;;  %v11679_v23 = vld [vmem:[#allocation50_spill] sm:$0xff] }
 0x27e   : > { %v3296_v11 = vmul.f32 %v2511_v56, %v11673_v60  ;;  %v9098_v48 = vmul.f32 %v2511_v56, %v11674_v63  ;;  %v3295_v1 = vmul.f32 %v2226_v43, %v11676_v50  ;;  %v2513_v25 = vpop.f32.mrb[177].mxu1  ;;  %v9103_v34 = vmul.f32 %v2226_v43, %v11677_v32  ;;  %6047 = vmatprep.subr.bf16.mxu0 %v6046_v5  ;;  %v11683_v60 = vld [vmem:[#allocation51_spill] sm:$0xff]  ;;  %v11684_v43 = vld [vmem:[#allocation198_spill] sm:$0xff]  ;;  %v11689_v5 = vld [vmem:[#allocation53_spill] sm:$0xff] }
 0x27f   : > { %11672 = vst [vmem:[#allocation173_spill] sm:$0xff] %v9091_v16  ;;  %v3297_v55 = vmul.f32 %v2513_v25, %v11679_v23  ;;  %v9107_v31 = vmul.f32 %v2513_v25, %v11680_v6  ;;  %5879 = vmatmul.mubr.msk.f32.gmra.mrb[26].mxu0 %vm666_vm1, %v11682_v59  ;;  %6119 = vmatprep.subr.bf16.mxu1 %v6118_v45  ;;  %v11686_v25 = vld [vmem:[#allocation52_spill] sm:$0xff]  ;;  %v11687_v63 = vld [vmem:[#allocation199_spill] sm:$0xff] }
 0x280   : > { %11675 = vst [vmem:[#allocation35_spill] sm:$0xff] %v9098_v48  ;;  %11678 = vst [vmem:[#allocation36_spill] sm:$0xff] %v9103_v34  ;;  %5918 = vmatmul.mubr.msk.f32.gmra.mrb[26].mxu1 %vm666_vm1, %v11682_v59  ;;  %v2230_v56 = vpop.f32.mrb[178].mxu0  ;;  %6049 = vmatpush1.bf16.msra.mxu0 %v6048_v2  ;;  %v11705_v48 = vld [vmem:[#allocation205_spill] sm:$0xff] }
 0x281   : > { %11681 = vst [vmem:[#allocation37_spill] sm:$0xff] %v9107_v31  ;;  %6121 = vmatpush1.bf16.msra.mxu1 %v6120_v26  ;;  %v3298_v50 = vmul.f32 %v2230_v56, %v11683_v60  ;;  %v9115_v33 = vmul.f32 %v2230_v56, %v11684_v43  ;;  %v2517_v23 = vpop.f32.mrb[178].mxu1  ;;  %v2232_v32 = vpop.f32.mrb[179].mxu0  ;;  %2898 = vmatprep.mubr.f32.mxu0 %v11328_v24  ;;  %v11690_v56 = vld [vmem:[#allocation200_spill] sm:$0xff]  ;;  %v11692_v43 = vld [vmem:[#allocation54_spill] sm:$0xff]  ;;  %v11711_v31 = vld [vmem:[#allocation207_spill] sm:$0xff] }
 0x282   : > { %v3300_v6 = vmul.f32 %v2517_v23, %v11686_v25  ;;  %v9119_v58 = vmul.f32 %v2517_v23, %v11687_v63  ;;  %3185 = vmatprep.mubr.f32.mxu1 %v11328_v24  ;;  %v3299_v59 = vmul.f32 %v2232_v32, %v11689_v5  ;;  %v2519_v2 = vpop.f32.mrb[179].mxu1  ;;  %v9128_v60 = vmul.f32 %v2232_v32, %v11690_v56  ;;  %v6639_v23 = vld [vmem:[%s10905_s3 + $0xf8] sm:$0xff]  ;;  %v11695_v56 = vld [vmem:[#allocation55_spill] sm:$0xff] }
 0x283   : > { %11685 = vst [vmem:[#allocation38_spill] sm:$0xff] %v9115_v33  ;;  %v6052_v26 = vpack.c.bf16 %v3298_v50, %v9088_v62  ;;  %v3301_v25 = vmul.f32 %v2519_v2, %v11692_v43  ;;  %5880 = vmatmul.mubr.msk.f32.gmra.mrb[28].mxu0 %vm666_vm1, %v6639_v23  ;;  %v11693_v62 = vld [vmem:[#allocation201_spill] sm:$0xff]  ;;  %v11696_v33 = vld [vmem:[#allocation202_spill] sm:$0xff]  ;;  %v11702_v43 = vld [vmem:[#allocation204_spill] sm:$0xff] }
 0x284   : > { %11688 = vst [vmem:[#allocation178_spill] sm:$0xff] %v9119_v58  ;;  %11691 = vst [vmem:[#allocation39_spill] sm:$0xff] %v9128_v60  ;;  %v6124_v63 = vpack.c.bf16 %v3300_v6, %v3296_v11  ;;  %v6050_v27 = vpack.c.bf16 %v3299_v59, %v3295_v1  ;;  %v9138_v50 = vmul.f32 %v2519_v2, %v11693_v62  ;;  %5919 = vmatmul.mubr.msk.f32.gmra.mrb[28].mxu1 %vm666_vm1, %v6639_v23  ;;  %v2236_v32 = vpop.f32.mrb[180].mxu0  ;;  %v11698_v59 = vld [vmem:[#allocation56_spill] sm:$0xff]  ;;  %v11699_v23 = vld [vmem:[#allocation203_spill] sm:$0xff] }
 0x285   : > { %v6122_v45 = vpack.c.bf16 %v3301_v25, %v3297_v55  ;;  %v9144_v16 = vmul.f32 %v2236_v32, %v11695_v56  ;;  %v9147_v20 = vmul.f32 %v2236_v32, %v11696_v33  ;;  %v2523_v6 = vpop.f32.mrb[180].mxu1  ;;  %2904 = vmatprep.mubr.f32.mxu0 %v11328_v24  ;;  %v2238_v11 = vpop.f32.mrb[181].mxu0  ;;  %3191 = vmatprep.mubr.f32.mxu1 %v11328_v24  ;;  %v11701_v55 = vld [vmem:[#allocation57_spill] sm:$0xff]  ;;  %v11704_v33 = vld [vmem:[#allocation58_spill] sm:$0xff] }
 0x286   : > { %11694 = vst [vmem:[#allocation40_spill] sm:$0xff] %v9138_v50  ;;  %v3304_v2 = vmul.f32 %v2523_v6, %v11698_v59  ;;  %v9154_v5 = vmul.f32 %v2523_v6, %v11699_v23  ;;  %v3303_v56 = vmul.f32 %v2238_v11, %v11701_v55  ;;  %v2525_v25 = vpop.f32.mrb[181].mxu1  ;;  %v9159_v32 = vmul.f32 %v2238_v11, %v11702_v43  ;;  %v6640_v59 = vld [vmem:[%s10905_s3 + $0x100] sm:$0xff]  ;;  %v11707_v11 = vld [vmem:[#allocation59_spill] sm:$0xff]  ;;  %v11710_v43 = vld [vmem:[#allocation60_spill] sm:$0xff] }
 0x287   : > { %11697 = vst [vmem:[#allocation41_spill] sm:$0xff] %v9147_v20  ;;  %v3305_v62 = vmul.f32 %v2525_v25, %v11704_v33  ;;  %v9163_v58 = vmul.f32 %v2525_v25, %v11705_v48  ;;  %5881 = vmatmul.mubr.msk.f32.gmra.mrb[30].mxu0 %vm666_vm1, %v6640_v59  ;;  %6051 = vmatprep.subr.bf16.mxu0 %v6050_v27  ;;  %v11708_v1 = vld [vmem:[#allocation206_spill] sm:$0xff]  ;;  %v11713_v27 = vld [vmem:[#allocation61_spill] sm:$0xff] }
 0x288   : > { %11700 = vst [vmem:[#allocation42_spill] sm:$0xff] %v9154_v5  ;;  %11703 = vst [vmem:[#allocation183_spill] sm:$0xff] %v9159_v32  ;;  %5920 = vmatmul.mubr.msk.f32.gmra.mrb[30].mxu1 %vm666_vm1, %v6640_v59  ;;  %6123 = vmatprep.subr.bf16.mxu1 %v6122_v45  ;;  %v2242_v6 = vpop.f32.mrb[182].mxu0  ;;  %v11728_v5 = vld [vmem:[#allocation213_spill] sm:$0xff] }
 0x289   : > { %11706 = vst [vmem:[#allocation43_spill] sm:$0xff] %v9163_v58  ;;  %6053 = vmatpush1.bf16.msra.mxu0 %v6052_v26  ;;  %6125 = vmatpush1.bf16.msra.mxu1 %v6124_v63  ;;  %v3306_v55 = vmul.f32 %v2242_v6, %v11707_v11  ;;  %v9172_v33 = vmul.f32 %v2242_v6, %v11708_v1  ;;  %v2529_v25 = vpop.f32.mrb[182].mxu1  ;;  %v2244_v48 = vpop.f32.mrb[183].mxu0  ;;  %v11714_v6 = vld [vmem:[#allocation208_spill] sm:$0xff]  ;;  %v11715_v1 = vld [vmem:[#allocation62_spill] sm:$0xff]  ;;  %v11734_v58 = vld [vmem:[#allocation215_spill] sm:$0xff] }
 0x28a   : > { %v3308_v23 = vmul.f32 %v2529_v25, %v11710_v43  ;;  %v9176_v50 = vmul.f32 %v2529_v25, %v11711_v31  ;;  %2910 = vmatprep.mubr.f32.mxu0 %v11328_v24  ;;  %3197 = vmatprep.mubr.f32.mxu1 %v11328_v24  ;;  %v3307_v45 = vmul.f32 %v2244_v48, %v11713_v27  ;;  %v2531_v26 = vpop.f32.mrb[183].mxu1  ;;  %v6641_v25 = vld [vmem:[%s10905_s3 + $0x108] sm:$0xff] }
 0x28b   : > { %11709 = vst [vmem:[#allocation44_spill] sm:$0xff] %v9172_v33  ;;  %v6056_v63 = vpack.c.bf16 %v3306_v55, %v9144_v16  ;;  %v9185_v11 = vmul.f32 %v2244_v48, %v11714_v6  ;;  %v3309_v43 = vmul.f32 %v2531_v26, %v11715_v1  ;;  %5882 = vmatmul.mubr.msk.f32.gmra.mrb[32].mxu0 %vm666_vm1, %v6641_v25  ;;  %v11716_v16 = vld [vmem:[#allocation209_spill] sm:$0xff]  ;;  %v11718_v6 = vld [vmem:[#allocation63_spill] sm:$0xff]  ;;  %v11719_v33 = vld [vmem:[#allocation210_spill] sm:$0xff] }
 0x28c   : > { %11712 = vst [vmem:[#allocation45_spill] sm:$0xff] %v9176_v50  ;;  %v6128_v31 = vpack.c.bf16 %v3308_v23, %v3304_v2  ;;  %v6054_v34 = vpack.c.bf16 %v3307_v45, %v3303_v56  ;;  %v9195_v55 = vmul.f32 %v2531_v26, %v11716_v16  ;;  %5921 = vmatmul.mubr.msk.f32.gmra.mrb[32].mxu1 %vm666_vm1, %v6641_v25  ;;  %v2248_v48 = vpop.f32.mrb[184].mxu0  ;;  %v11721_v45 = vld [vmem:[#allocation64_spill] sm:$0xff]  ;;  %v11722_v25 = vld [vmem:[#allocation211_spill] sm:$0xff]  ;;  %v11731_v56 = vld [vmem:[#allocation214_spill] sm:$0xff] }
 0x28d   : > { %v6126_v59 = vpack.c.bf16 %v3309_v43, %v3305_v62  ;;  %v9201_v20 = vmul.f32 %v2248_v48, %v11718_v6  ;;  %v9204_v60 = vmul.f32 %v2248_v48, %v11719_v33  ;;  %v2535_v2 = vpop.f32.mrb[184].mxu1  ;;  %2916 = vmatprep.mubr.f32.mxu0 %v11328_v24  ;;  %v2250_v23 = vpop.f32.mrb[185].mxu0  ;;  %3203 = vmatprep.mubr.f32.mxu1 %v11328_v24  ;;  %v11724_v62 = vld [vmem:[#allocation65_spill] sm:$0xff]  ;;  %v11725_v1 = vld [vmem:[#allocation212_spill] sm:$0xff]  ;;  %v11727_v33 = vld [vmem:[#allocation66_spill] sm:$0xff] }
 0x28e   : > { %11717 = vst [vmem:[#allocation46_spill] sm:$0xff] %v9195_v55  ;;  %v3312_v26 = vmul.f32 %v2535_v2, %v11721_v45  ;;  %v9211_v27 = vmul.f32 %v2535_v2, %v11722_v25  ;;  %v3311_v6 = vmul.f32 %v2250_v23, %v11724_v62  ;;  %v2537_v43 = vpop.f32.mrb[185].mxu1  ;;  %v9216_v48 = vmul.f32 %v2250_v23, %v11725_v1  ;;  %v6642_v45 = vld [vmem:[%s10905_s3 + $0x110] sm:$0xff] }
 0x28f   : > { %11720 = vst [vmem:[#allocation188_spill] sm:$0xff] %v9204_v60  ;;  %v3313_v16 = vmul.f32 %v2537_v43, %v11727_v33  ;;  %v9220_v50 = vmul.f32 %v2537_v43, %v11728_v5  ;;  %5883 = vmatmul.mubr.msk.f32.gmra.mrb[34].mxu0 %vm666_vm1, %v6642_v45  ;;  %6055 = vmatprep.subr.bf16.mxu0 %v6054_v34  ;;  %v11730_v23 = vld [vmem:[#allocation67_spill] sm:$0xff]  ;;  %v11733_v1 = vld [vmem:[#allocation68_spill] sm:$0xff]  ;;  %v11736_v34 = vld [vmem:[#allocation69_spill] sm:$0xff] }
 0x290   : > { %11723 = vst [vmem:[#allocation47_spill] sm:$0xff] %v9211_v27  ;;  %11726 = vst [vmem:[#allocation48_spill] sm:$0xff] %v9216_v48  ;;  %5922 = vmatmul.mubr.msk.f32.gmra.mrb[34].mxu1 %vm666_vm1, %v6642_v45  ;;  %6127 = vmatprep.subr.bf16.mxu1 %v6126_v59  ;;  %v2254_v2 = vpop.f32.mrb[186].mxu0  ;;  %v11757_v48 = vld [vmem:[#allocation224_spill] sm:$0xff] }
 0x291   : > { %11729 = vst [vmem:[#allocation49_spill] sm:$0xff] %v9220_v50  ;;  %6057 = vmatpush1.bf16.msra.mxu0 %v6056_v63  ;;  %6129 = vmatpush1.bf16.msra.mxu1 %v6128_v31  ;;  %v3314_v62 = vmul.f32 %v2254_v2, %v11730_v23  ;;  %v9229_v33 = vmul.f32 %v2254_v2, %v11731_v56  ;;  %v2541_v43 = vpop.f32.mrb[186].mxu1  ;;  %v2256_v5 = vpop.f32.mrb[187].mxu0  ;;  %v11737_v2 = vld [vmem:[#allocation216_spill] sm:$0xff]  ;;  %v11739_v56 = vld [vmem:[#allocation70_spill] sm:$0xff]  ;;  %v11756_v50 = vld [vmem:[#allocation77_spill] sm:$0xff] }
 0x292   : > { %v3316_v25 = vmul.f32 %v2541_v43, %v11733_v1  ;;  %v9233_v55 = vmul.f32 %v2541_v43, %v11734_v58  ;;  %2922 = vmatprep.mubr.f32.mxu0 %v11328_v24  ;;  %3209 = vmatprep.mubr.f32.mxu1 %v11328_v24  ;;  %v3315_v59 = vmul.f32 %v2256_v5, %v11736_v34  ;;  %v2543_v63 = vpop.f32.mrb[187].mxu1  ;;  %v6643_v43 = vld [vmem:[%s10905_s3 + $0x118] sm:$0xff] }
 0x293   : > { %11732 = vst [vmem:[#allocation50_spill] sm:$0xff] %v9229_v33  ;;  %v6060_v31 = vpack.c.bf16 %v3314_v62, %v9201_v20  ;;  %v9242_v23 = vmul.f32 %v2256_v5, %v11737_v2  ;;  %v3317_v1 = vmul.f32 %v2543_v63, %v11739_v56  ;;  %5884 = vmatmul.mubr.msk.f32.gmra.mrb[36].mxu0 %vm666_vm1, %v6643_v43  ;;  %v11740_v20 = vld [vmem:[#allocation217_spill] sm:$0xff]  ;;  %v11742_v2 = vld [vmem:[#allocation71_spill] sm:$0xff]  ;;  %v11747_v34 = vld [vmem:[#allocation220_spill] sm:$0xff] }
 0x294   : > { %11735 = vst [vmem:[#allocation193_spill] sm:$0xff] %v9233_v55  ;;  %v6132_v58 = vpack.c.bf16 %v3316_v25, %v3312_v26  ;;  %v6058_v32 = vpack.c.bf16 %v3315_v59, %v3311_v6  ;;  %v9252_v62 = vmul.f32 %v2543_v63, %v11740_v20  ;;  %5923 = vmatmul.mubr.msk.f32.gmra.mrb[36].mxu1 %vm666_vm1, %v6643_v43  ;;  %v2260_v5 = vpop.f32.mrb[188].mxu0  ;;  %v11744_v59 = vld [vmem:[#allocation72_spill] sm:$0xff]  ;;  %v11748_v56 = vld [vmem:[#allocation74_spill] sm:$0xff]  ;;  %v11749_v20 = vld [vmem:[#allocation221_spill] sm:$0xff] }
 0x295   : > { %11738 = vst [vmem:[#allocation51_spill] sm:$0xff] %v9242_v23  ;;  %v6130_v45 = vpack.c.bf16 %v3317_v1, %v3313_v16  ;;  %v3318_v60 = vmul.f32 %v2260_v5, %v11742_v2  ;;  %v9259_v33 = vmul.f32 %v2260_v5, %v8482_v37  ;;  %v2547_v26 = vpop.f32.mrb[188].mxu1  ;;  %2928 = vmatprep.mubr.f32.mxu0 %v11328_v24  ;;  %v2262_v25 = vpop.f32.mrb[189].mxu0  ;;  %v11746_v16 = vld [vmem:[#allocation73_spill] sm:$0xff] }
 0x296   : > { %11741 = vst [vmem:[#allocation52_spill] sm:$0xff] %v9252_v62  ;;  %v3320_v63 = vmul.f32 %v2547_v26, %v11744_v59  ;;  %v9266_v43 = vmul.f32 %v2547_v26, %v8484_v57  ;;  %3215 = vmatprep.mubr.f32.mxu1 %v11328_v24  ;;  %v3319_v1 = vmul.f32 %v2262_v25, %v11746_v16  ;;  %v2549_v2 = vpop.f32.mrb[189].mxu1  ;;  %v6644_v59 = vld [vmem:[%s10905_s3 + $0x120] sm:$0x1]  ;;  %v3227_v26 = vld [vmem:[%s10903_s1 + $0x8] sm:$0xff]  ;;  %v11754_v57 = vld [vmem:[#allocation76_spill] sm:$0xff] }
 0x297   : > { %11743 = vst [vmem:[#allocation53_spill] sm:$0xff] %v9259_v33  ;;  %v9271_v5 = vmul.f32 %v2262_v25, %v11747_v34  ;;  %v3321_v37 = vmul.f32 %v2549_v2, %v11748_v56  ;;  %v9275_v27 = vmul.f32 %v2549_v2, %v11749_v20  ;;  %5885 = vmatmul.mubr.msk.f32.gmra.mrb[38].mxu0 %vm666_vm1, %v6644_v59  ;;  %v11751_v56 = vld [vmem:[#allocation75_spill] sm:$0xff]  ;;  %v11752_v2 = vld [vmem:[#allocation222_spill] sm:$0xff] }
 0x298   : > { %11745 = vst [vmem:[#allocation54_spill] sm:$0xff] %v9266_v43  ;;  %6059 = vmatprep.subr.bf16.mxu0 %v6058_v32  ;;  %5924 = vmatmul.mubr.msk.f32.gmra.mrb[38].mxu1 %vm666_vm1, %v6644_v59  ;;  %v2266_v25 = vpop.f32.mrb[190].mxu0 }
 0x299   : > { %11750 = vst [vmem:[#allocation55_spill] sm:$0xff] %v9275_v27  ;;  %6131 = vmatprep.subr.bf16.mxu1 %v6130_v45  ;;  %6061 = vmatpush1.bf16.msra.mxu0 %v6060_v31  ;;  %v3322_v16 = vmul.f32 %v2266_v25, %v11751_v56  ;;  %v9287_v6 = vmul.f32 %v2266_v25, %v11752_v2  ;;  %v2553_v20 = vpop.f32.mrb[190].mxu1  ;;  %v2268_v34 = vpop.f32.mrb[191].mxu0  ;;  %v11758_v25 = vld [vmem:[#allocation78_spill] sm:$0xff]  ;;  %v11759_v2 = vld [vmem:[#allocation225_spill] sm:$0xff] }
 0x29a   : > { %6133 = vmatpush1.bf16.msra.mxu1 %v6132_v58  ;;  %v3324_v55 = vmul.f32 %v2553_v20, %v11754_v57  ;;  %v9291_v32 = vmul.f32 %v2553_v20, %v8496_v53  ;;  %v3323_v62 = vmul.f32 %v2268_v34, %v11756_v50  ;;  %v9295_v59 = vmul.f32 %v2268_v34, %v11757_v48  ;;  %v2555_v45 = vpop.f32.mrb[191].mxu1  ;;  %v11767_v34 = vld [vmem:[#allocation228_spill] sm:$0xff] }
 0x29b   : > { %11753 = vst [vmem:[#allocation56_spill] sm:$0xff] %v9287_v6  ;;  %3475 = vmatprep.mubr.f32.mxu0 %v3227_v26  ;;  %v6064_v58 = vpack.c.bf16 %v3322_v16, %v3318_v60  ;;  %v3325_v56 = vmul.f32 %v2555_v45, %v11758_v25  ;;  %v9301_v23 = vmul.f32 %v2555_v45, %v11759_v2  ;;  %v11761_v16 = vld [vmem:[#allocation79_spill] sm:$0xff]  ;;  %v11762_v25 = vld [vmem:[#allocation226_spill] sm:$0xff] }
 0x29c   : > { %11755 = vst [vmem:[#allocation57_spill] sm:$0xff] %v9291_v32  ;;  %3653 = vmatprep.mubr.f32.mxu1 %v3227_v26  ;;  %v6136_v57 = vpack.c.bf16 %v3324_v55, %v3320_v63  ;;  %v6062_v50 = vpack.c.bf16 %v3323_v62, %v3319_v1  ;;  %v2272_v48 = vpop.f32.mrb[192].mxu0  ;;  %v11764_v55 = vld [vmem:[#allocation80_spill] sm:$0xff]  ;;  %v11766_v62 = vld [vmem:[#allocation81_spill] sm:$0xff] }
 0x29d   : > { %11760 = vst [vmem:[#allocation58_spill] sm:$0xff] %v9301_v23  ;;  %v6134_v53 = vpack.c.bf16 %v3325_v56, %v3321_v37  ;;  %v3326_v31 = vmul.f32 %v2272_v48, %v11761_v16  ;;  %v9311_v33 = vmul.f32 %v2272_v48, %v11762_v25  ;;  %v2559_v45 = vpop.f32.mrb[192].mxu1  ;;  %v2274_v26 = vpop.f32.mrb[193].mxu0  ;;  %v11768_v56 = vld [vmem:[#allocation82_spill] sm:$0xff]  ;;  %v11769_v16 = vld [vmem:[#allocation229_spill] sm:$0xff] }
 0x29e   : > { %v3328_v63 = vmul.f32 %v2559_v45, %v11764_v55  ;;  %v9315_v20 = vmul.f32 %v2559_v45, %v8510_v8  ;;  %v3327_v1 = vmul.f32 %v2274_v26, %v11766_v62  ;;  %v9319_v2 = vmul.f32 %v2274_v26, %v11767_v34  ;;  %v2561_v37 = vpop.f32.mrb[193].mxu1  ;;  %6063 = vmatprep.subr.bf16.mxu0 %v6062_v50  ;;  %v11771_v55 = vld [vmem:[#allocation83_spill] sm:$0xff]  ;;  %v11772_v45 = vld [vmem:[#allocation230_spill] sm:$0xff]  ;;  %v11774_v26 = vld [vmem:[#allocation84_spill] sm:$0xff] }
 0x29f   : > { %11763 = vst [vmem:[#allocation59_spill] sm:$0xff] %v9311_v33  ;;  %v3329_v60 = vmul.f32 %v2561_v37, %v11768_v56  ;;  %v9323_v43 = vmul.f32 %v2561_v37, %v11769_v16  ;;  %6135 = vmatprep.subr.bf16.mxu1 %v6134_v53  ;;  %6065 = vmatpush1.bf16.msra.mxu0 %v6064_v58  ;;  %v11776_v56 = vld [vmem:[#allocation85_spill] sm:$0xff]  ;;  %v11777_v37 = vld [vmem:[#allocation232_spill] sm:$0xff] }
 0x2a0   : > { %11765 = vst [vmem:[#allocation60_spill] sm:$0xff] %v9315_v20  ;;  %6137 = vmatpush1.bf16.msra.mxu1 %v6136_v57  ;;  %v2278_v48 = vpop.f32.mrb[194].mxu0 }
 0x2a1   : > { %11770 = vst [vmem:[#allocation61_spill] sm:$0xff] %v9323_v43  ;;  %v3330_v25 = vmul.f32 %v2278_v48, %v11771_v55  ;;  %v9327_v8 = vmul.f32 %v2278_v48, %v11772_v45  ;;  %v2565_v62 = vpop.f32.mrb[194].mxu1  ;;  %v2280_v32 = vpop.f32.mrb[195].mxu0  ;;  %v11778_v55 = vld [vmem:[#allocation86_spill] sm:$0xff]  ;;  %v11779_v45 = vld [vmem:[#allocation233_spill] sm:$0xff] }
 0x2a2   : > { %v3332_v34 = vmul.f32 %v2565_v62, %v11774_v26  ;;  %v9331_v50 = vmul.f32 %v2565_v62, %v8524_v12  ;;  %v3331_v6 = vmul.f32 %v2280_v32, %v11776_v56  ;;  %v9335_v16 = vmul.f32 %v2280_v32, %v11777_v37  ;;  %v2567_v53 = vpop.f32.mrb[195].mxu1  ;;  %v11782_v12 = vld [vmem:[#allocation234_spill] sm:$0xff]  ;;  %v11787_v56 = vld [vmem:[#allocation236_spill] sm:$0xff] }
 0x2a3   : > { %11773 = vst [vmem:[#allocation62_spill] sm:$0xff] %v9327_v8  ;;  %v6068_v58 = vpack.c.bf16 %v3330_v25, %v3326_v31  ;;  %v3333_v48 = vmul.f32 %v2567_v53, %v11778_v55  ;;  %v9341_v27 = vmul.f32 %v2567_v53, %v11779_v45  ;;  %v11781_v25 = vld [vmem:[#allocation87_spill] sm:$0xff] }
 0x2a4   : > { %11775 = vst [vmem:[#allocation63_spill] sm:$0xff] %v9331_v50  ;;  %v6140_v23 = vpack.c.bf16 %v3332_v34, %v3328_v63  ;;  %v6066_v26 = vpack.c.bf16 %v3331_v6, %v3327_v1  ;;  %v2284_v32 = vpop.f32.mrb[196].mxu0  ;;  %v11784_v34 = vld [vmem:[#allocation88_spill] sm:$0xff]  ;;  %v11786_v6 = vld [vmem:[#allocation89_spill] sm:$0xff] }
 0x2a5   : > { %11780 = vst [vmem:[#allocation64_spill] sm:$0xff] %v9341_v27  ;;  %v6138_v37 = vpack.c.bf16 %v3333_v48, %v3329_v60  ;;  %v3334_v57 = vmul.f32 %v2284_v32, %v11781_v25  ;;  %v9351_v55 = vmul.f32 %v2284_v32, %v11782_v12  ;;  %v2571_v53 = vpop.f32.mrb[196].mxu1  ;;  %v2286_v45 = vpop.f32.mrb[197].mxu0  ;;  %v11788_v48 = vld [vmem:[#allocation90_spill] sm:$0xff]  ;;  %v11789_v25 = vld [vmem:[#allocation237_spill] sm:$0xff] }
 0x2a6   : > { %v3336_v63 = vmul.f32 %v2571_v53, %v11784_v34  ;;  %v9355_v62 = vmul.f32 %v2571_v53, %v8538_v13  ;;  %v3335_v1 = vmul.f32 %v2286_v45, %v11786_v6  ;;  %v9359_v20 = vmul.f32 %v2286_v45, %v11787_v56  ;;  %v2573_v60 = vpop.f32.mrb[197].mxu1  ;;  %6067 = vmatprep.subr.bf16.mxu0 %v6066_v26  ;;  %v11791_v34 = vld [vmem:[#allocation91_spill] sm:$0xff]  ;;  %v11792_v53 = vld [vmem:[#allocation238_spill] sm:$0xff]  ;;  %v11794_v45 = vld [vmem:[#allocation92_spill] sm:$0xff] }
 0x2a7   : > { %11783 = vst [vmem:[#allocation65_spill] sm:$0xff] %v9351_v55  ;;  %v3337_v31 = vmul.f32 %v2573_v60, %v11788_v48  ;;  %v9363_v50 = vmul.f32 %v2573_v60, %v11789_v25  ;;  %6139 = vmatprep.subr.bf16.mxu1 %v6138_v37  ;;  %6069 = vmatpush1.bf16.msra.mxu0 %v6068_v58  ;;  %v11796_v48 = vld [vmem:[#allocation93_spill] sm:$0xff]  ;;  %v11797_v60 = vld [vmem:[#allocation240_spill] sm:$0xff] }
 0x2a8   : > { %11785 = vst [vmem:[#allocation66_spill] sm:$0xff] %v9355_v62  ;;  %6141 = vmatpush1.bf16.msra.mxu1 %v6140_v23  ;;  %v2290_v32 = vpop.f32.mrb[198].mxu0 }
 0x2a9   : > { %11790 = vst [vmem:[#allocation67_spill] sm:$0xff] %v9363_v50  ;;  %v3338_v12 = vmul.f32 %v2290_v32, %v11791_v34  ;;  %v9367_v13 = vmul.f32 %v2290_v32, %v11792_v53  ;;  %v2577_v6 = vpop.f32.mrb[198].mxu1  ;;  %v2292_v33 = vpop.f32.mrb[199].mxu0  ;;  %v11798_v34 = vld [vmem:[#allocation94_spill] sm:$0xff]  ;;  %v11799_v53 = vld [vmem:[#allocation241_spill] sm:$0xff] }
 0x2aa   : > { %v3340_v56 = vmul.f32 %v2577_v6, %v11794_v45  ;;  %v9371_v26 = vmul.f32 %v2577_v6, %v8552_v38  ;;  %v3339_v8 = vmul.f32 %v2292_v33, %v11796_v48  ;;  %v9375_v25 = vmul.f32 %v2292_v33, %v11797_v60  ;;  %v2579_v37 = vpop.f32.mrb[199].mxu1  ;;  %v11802_v38 = vld [vmem:[#allocation242_spill] sm:$0xff]  ;;  %v11807_v48 = vld [vmem:[#allocation244_spill] sm:$0xff] }
 0x2ab   : > { %11793 = vst [vmem:[#allocation68_spill] sm:$0xff] %v9367_v13  ;;  %v6072_v23 = vpack.c.bf16 %v3338_v12, %v3334_v57  ;;  %v3341_v32 = vmul.f32 %v2579_v37, %v11798_v34  ;;  %v9381_v43 = vmul.f32 %v2579_v37, %v11799_v53  ;;  %v11801_v57 = vld [vmem:[#allocation95_spill] sm:$0xff] }
 0x2ac   : > { %11795 = vst [vmem:[#allocation69_spill] sm:$0xff] %v9371_v26  ;;  %v6144_v27 = vpack.c.bf16 %v3340_v56, %v3336_v63  ;;  %v6070_v45 = vpack.c.bf16 %v3339_v8, %v3335_v1  ;;  %v2296_v33 = vpop.f32.mrb[200].mxu0  ;;  %v11804_v56 = vld [vmem:[#allocation96_spill] sm:$0xff]  ;;  %v11806_v8 = vld [vmem:[#allocation97_spill] sm:$0xff] }
 0x2ad   : > { %11800 = vst [vmem:[#allocation70_spill] sm:$0xff] %v9381_v43  ;;  %v6142_v60 = vpack.c.bf16 %v3341_v32, %v3337_v31  ;;  %v3342_v58 = vmul.f32 %v2296_v33, %v11801_v57  ;;  %v9391_v34 = vmul.f32 %v2296_v33, %v11802_v38  ;;  %v2583_v37 = vpop.f32.mrb[200].mxu1  ;;  %v2298_v53 = vpop.f32.mrb[201].mxu0  ;;  %v11808_v32 = vld [vmem:[#allocation98_spill] sm:$0xff]  ;;  %v11809_v57 = vld [vmem:[#allocation245_spill] sm:$0xff] }
 0x2ae   : > { %v3344_v63 = vmul.f32 %v2583_v37, %v11804_v56  ;;  %v9395_v6 = vmul.f32 %v2583_v37, %v8566_v14  ;;  %v3343_v1 = vmul.f32 %v2298_v53, %v11806_v8  ;;  %v9399_v62 = vmul.f32 %v2298_v53, %v11807_v48  ;;  %v2585_v31 = vpop.f32.mrb[201].mxu1  ;;  %6071 = vmatprep.subr.bf16.mxu0 %v6070_v45  ;;  %v11811_v56 = vld [vmem:[#allocation99_spill] sm:$0xff]  ;;  %v11812_v37 = vld [vmem:[#allocation246_spill] sm:$0xff]  ;;  %v11814_v53 = vld [vmem:[#allocation100_spill] sm:$0xff] }
 0x2af   : > { %11803 = vst [vmem:[#allocation71_spill] sm:$0xff] %v9391_v34  ;;  %v3345_v12 = vmul.f32 %v2585_v31, %v11808_v32  ;;  %v9403_v26 = vmul.f32 %v2585_v31, %v11809_v57  ;;  %6143 = vmatprep.subr.bf16.mxu1 %v6142_v60  ;;  %6073 = vmatpush1.bf16.msra.mxu0 %v6072_v23  ;;  %v11816_v32 = vld [vmem:[#allocation101_spill] sm:$0xff]  ;;  %v11817_v31 = vld [vmem:[#allocation248_spill] sm:$0xff] }
 0x2b0   : > { %11805 = vst [vmem:[#allocation72_spill] sm:$0xff] %v9395_v6  ;;  %6145 = vmatpush1.bf16.msra.mxu1 %v6144_v27  ;;  %v2302_v33 = vpop.f32.mrb[202].mxu0 }
 0x2b1   : > { %11810 = vst [vmem:[#allocation73_spill] sm:$0xff] %v9403_v26  ;;  %v3346_v38 = vmul.f32 %v2302_v33, %v11811_v56  ;;  %v9407_v14 = vmul.f32 %v2302_v33, %v11812_v37  ;;  %v2589_v8 = vpop.f32.mrb[202].mxu1  ;;  %v2304_v55 = vpop.f32.mrb[203].mxu0  ;;  %v11818_v56 = vld [vmem:[#allocation102_spill] sm:$0xff]  ;;  %v11819_v37 = vld [vmem:[#allocation249_spill] sm:$0xff] }
 0x2b2   : > { %v3348_v48 = vmul.f32 %v2589_v8, %v11814_v53  ;;  %v9411_v45 = vmul.f32 %v2589_v8, %v8580_v49  ;;  %v3347_v13 = vmul.f32 %v2304_v55, %v11816_v32  ;;  %v9415_v57 = vmul.f32 %v2304_v55, %v11817_v31  ;;  %v2591_v60 = vpop.f32.mrb[203].mxu1  ;;  %v11822_v49 = vld [vmem:[#allocation250_spill] sm:$0xff]  ;;  %v11827_v32 = vld [vmem:[#allocation252_spill] sm:$0xff] }
 0x2b3   : > { %11813 = vst [vmem:[#allocation74_spill] sm:$0xff] %v9407_v14  ;;  %v6076_v27 = vpack.c.bf16 %v3346_v38, %v3342_v58  ;;  %v3349_v33 = vmul.f32 %v2591_v60, %v11818_v56  ;;  %v9421_v50 = vmul.f32 %v2591_v60, %v11819_v37  ;;  %v11821_v58 = vld [vmem:[#allocation103_spill] sm:$0xff] }
 0x2b4   : > { %11815 = vst [vmem:[#allocation75_spill] sm:$0xff] %v9411_v45  ;;  %v6148_v43 = vpack.c.bf16 %v3348_v48, %v3344_v63  ;;  %v6074_v53 = vpack.c.bf16 %v3347_v13, %v3343_v1  ;;  %v2308_v55 = vpop.f32.mrb[204].mxu0  ;;  %v11824_v48 = vld [vmem:[#allocation104_spill] sm:$0xff]  ;;  %v11826_v13 = vld [vmem:[#allocation105_spill] sm:$0xff] }
 0x2b5   : > { %11820 = vst [vmem:[#allocation76_spill] sm:$0xff] %v9421_v50  ;;  %v6146_v31 = vpack.c.bf16 %v3349_v33, %v3345_v12  ;;  %v3350_v23 = vmul.f32 %v2308_v55, %v11821_v58  ;;  %v9431_v56 = vmul.f32 %v2308_v55, %v11822_v49  ;;  %v2595_v60 = vpop.f32.mrb[204].mxu1  ;;  %v2310_v37 = vpop.f32.mrb[205].mxu0  ;;  %v11828_v33 = vld [vmem:[#allocation106_spill] sm:$0xff]  ;;  %v11829_v58 = vld [vmem:[#allocation253_spill] sm:$0xff] }
 0x2b6   : > { %v3352_v63 = vmul.f32 %v2595_v60, %v11824_v48  ;;  %v9435_v8 = vmul.f32 %v2595_v60, %v8594_v36  ;;  %v3351_v1 = vmul.f32 %v2310_v37, %v11826_v13  ;;  %v9439_v6 = vmul.f32 %v2310_v37, %v11827_v32  ;;  %v2597_v12 = vpop.f32.mrb[205].mxu1  ;;  %6075 = vmatprep.subr.bf16.mxu0 %v6074_v53  ;;  %v11831_v48 = vld [vmem:[#allocation107_spill] sm:$0xff]  ;;  %v11832_v60 = vld [vmem:[#allocation254_spill] sm:$0xff]  ;;  %v11834_v37 = vld [vmem:[#allocation108_spill] sm:$0xff] }
 0x2b7   : > { %11823 = vst [vmem:[#allocation77_spill] sm:$0xff] %v9431_v56  ;;  %v3353_v38 = vmul.f32 %v2597_v12, %v11828_v33  ;;  %v9443_v45 = vmul.f32 %v2597_v12, %v11829_v58  ;;  %6147 = vmatprep.subr.bf16.mxu1 %v6146_v31  ;;  %6077 = vmatpush1.bf16.msra.mxu0 %v6076_v27  ;;  %v11836_v33 = vld [vmem:[#allocation109_spill] sm:$0xff]  ;;  %v11837_v12 = vld [vmem:[#allocation256_spill] sm:$0xff] }
 0x2b8   : > { %11825 = vst [vmem:[#allocation78_spill] sm:$0xff] %v9435_v8  ;;  %6149 = vmatpush1.bf16.msra.mxu1 %v6148_v43  ;;  %v2314_v55 = vpop.f32.mrb[206].mxu0 }
 0x2b9   : > { %11830 = vst [vmem:[#allocation79_spill] sm:$0xff] %v9443_v45  ;;  %v3354_v49 = vmul.f32 %v2314_v55, %v11831_v48  ;;  %v9447_v36 = vmul.f32 %v2314_v55, %v11832_v60  ;;  %v2601_v13 = vpop.f32.mrb[206].mxu1  ;;  %v2316_v34 = vpop.f32.mrb[207].mxu0  ;;  %v11838_v48 = vld [vmem:[#allocation110_spill] sm:$0xff]  ;;  %v11839_v60 = vld [vmem:[#allocation257_spill] sm:$0xff] }
 0x2ba   : > { %v3356_v32 = vmul.f32 %v2601_v13, %v11834_v37  ;;  %v9451_v53 = vmul.f32 %v2601_v13, %v8608_v29  ;;  %v3355_v14 = vmul.f32 %v2316_v34, %v11836_v33  ;;  %v9455_v58 = vmul.f32 %v2316_v34, %v11837_v12  ;;  %v2603_v31 = vpop.f32.mrb[207].mxu1  ;;  %v11842_v29 = vld [vmem:[#allocation258_spill] sm:$0xff]  ;;  %v11847_v33 = vld [vmem:[#allocation260_spill] sm:$0xff] }
 0x2bb   : > { %11833 = vst [vmem:[#allocation80_spill] sm:$0xff] %v9447_v36  ;;  %v6080_v43 = vpack.c.bf16 %v3354_v49, %v3350_v23  ;;  %v3357_v55 = vmul.f32 %v2603_v31, %v11838_v48  ;;  %v9461_v26 = vmul.f32 %v2603_v31, %v11839_v60  ;;  %v11841_v23 = vld [vmem:[#allocation111_spill] sm:$0xff] }
 0x2bc   : > { %11835 = vst [vmem:[#allocation81_spill] sm:$0xff] %v9451_v53  ;;  %v6152_v50 = vpack.c.bf16 %v3356_v32, %v3352_v63  ;;  %v6078_v37 = vpack.c.bf16 %v3355_v14, %v3351_v1  ;;  %v2320_v34 = vpop.f32.mrb[208].mxu0  ;;  %v11844_v32 = vld [vmem:[#allocation112_spill] sm:$0xff]  ;;  %v11846_v14 = vld [vmem:[#allocation113_spill] sm:$0xff] }
 0x2bd   : > { %11840 = vst [vmem:[#allocation82_spill] sm:$0xff] %v9461_v26  ;;  %v6150_v12 = vpack.c.bf16 %v3357_v55, %v3353_v38  ;;  %v3358_v27 = vmul.f32 %v2320_v34, %v11841_v23  ;;  %v9471_v48 = vmul.f32 %v2320_v34, %v11842_v29  ;;  %v2607_v31 = vpop.f32.mrb[208].mxu1  ;;  %v2322_v60 = vpop.f32.mrb[209].mxu0  ;;  %v11849_v55 = vld [vmem:[#allocation114_spill] sm:$0xff]  ;;  %v11850_v23 = vld [vmem:[#allocation261_spill] sm:$0xff] }
 0x2be   : > { %v3360_v63 = vmul.f32 %v2607_v31, %v11844_v32  ;;  %v9475_v13 = vmul.f32 %v2607_v31, %v8622_v54  ;;  %v3359_v1 = vmul.f32 %v2322_v60, %v11846_v14  ;;  %v9479_v8 = vmul.f32 %v2322_v60, %v11847_v33  ;;  %v2609_v38 = vpop.f32.mrb[209].mxu1  ;;  %6079 = vmatprep.subr.bf16.mxu0 %v6078_v37  ;;  %v11852_v32 = vld [vmem:[#allocation115_spill] sm:$0xff]  ;;  %v11853_v31 = vld [vmem:[#allocation262_spill] sm:$0xff]  ;;  %v11855_v60 = vld [vmem:[#allocation116_spill] sm:$0xff] }
 0x2bf   : > { %11843 = vst [vmem:[#allocation83_spill] sm:$0xff] %v9471_v48  ;;  %v3361_v49 = vmul.f32 %v2609_v38, %v11849_v55  ;;  %v9483_v53 = vmul.f32 %v2609_v38, %v11850_v23  ;;  %6151 = vmatprep.subr.bf16.mxu1 %v6150_v12  ;;  %6081 = vmatpush1.bf16.msra.mxu0 %v6080_v43  ;;  %v11857_v55 = vld [vmem:[#allocation117_spill] sm:$0xff]  ;;  %v11858_v38 = vld [vmem:[#allocation264_spill] sm:$0xff] }
 0x2c0   : > { %11845 = vst [vmem:[#allocation84_spill] sm:$0xff] %v9475_v13  ;;  %11848 = vst [vmem:[#allocation85_spill] sm:$0xff] %v9479_v8  ;;  %6153 = vmatpush1.bf16.msra.mxu1 %v6152_v50  ;;  %v2326_v34 = vpop.f32.mrb[210].mxu0  ;;  %v11884_v8 = vld [vmem:[#allocation273_spill] sm:$0xff] }
 0x2c1   : > { %11851 = vst [vmem:[#allocation86_spill] sm:$0xff] %v9483_v53  ;;  %v3362_v29 = vmul.f32 %v2326_v34, %v11852_v32  ;;  %v9487_v54 = vmul.f32 %v2326_v34, %v11853_v31  ;;  %v2613_v14 = vpop.f32.mrb[210].mxu1  ;;  %v2328_v56 = vpop.f32.mrb[211].mxu0  ;;  %v11860_v32 = vld [vmem:[#allocation118_spill] sm:$0xff]  ;;  %v11861_v31 = vld [vmem:[#allocation265_spill] sm:$0xff] }
 0x2c2   : > { %v3364_v33 = vmul.f32 %v2613_v14, %v11855_v60  ;;  %v9491_v37 = vmul.f32 %v2613_v14, %v8636_v41  ;;  %v3363_v36 = vmul.f32 %v2328_v56, %v11857_v55  ;;  %v9495_v23 = vmul.f32 %v2328_v56, %v11858_v38  ;;  %v2615_v12 = vpop.f32.mrb[211].mxu1  ;;  %v11864_v41 = vld [vmem:[#allocation266_spill] sm:$0xff]  ;;  %v11869_v55 = vld [vmem:[#allocation268_spill] sm:$0xff] }
 0x2c3   : > { %11854 = vst [vmem:[#allocation87_spill] sm:$0xff] %v9487_v54  ;;  %v6084_v50 = vpack.c.bf16 %v3362_v29, %v3358_v27  ;;  %v3365_v34 = vmul.f32 %v2615_v12, %v11860_v32  ;;  %v9501_v45 = vmul.f32 %v2615_v12, %v11861_v31  ;;  %v11863_v27 = vld [vmem:[#allocation119_spill] sm:$0xff]  ;;  %v11883_v53 = vld [vmem:[#allocation126_spill] sm:$0xff] }
 0x2c4   : > { %11856 = vst [vmem:[#allocation88_spill] sm:$0xff] %v9491_v37  ;;  %11859 = vst [vmem:[#allocation89_spill] sm:$0xff] %v9495_v23  ;;  %v6156_v26 = vpack.c.bf16 %v3364_v33, %v3360_v63  ;;  %v6082_v60 = vpack.c.bf16 %v3363_v36, %v3359_v1  ;;  %v2332_v56 = vpop.f32.mrb[212].mxu0  ;;  %v11866_v33 = vld [vmem:[#allocation120_spill] sm:$0xff]  ;;  %v11868_v36 = vld [vmem:[#allocation121_spill] sm:$0xff] }
 0x2c5   : > { %11862 = vst [vmem:[#allocation90_spill] sm:$0xff] %v9501_v45  ;;  %v6154_v38 = vpack.c.bf16 %v3365_v34, %v3361_v49  ;;  %v3366_v43 = vmul.f32 %v2332_v56, %v11863_v27  ;;  %v9511_v32 = vmul.f32 %v2332_v56, %v11864_v41  ;;  %v2619_v12 = vpop.f32.mrb[212].mxu1  ;;  %v2334_v31 = vpop.f32.mrb[213].mxu0  ;;  %v11871_v34 = vld [vmem:[#allocation122_spill] sm:$0xff]  ;;  %v11872_v27 = vld [vmem:[#allocation269_spill] sm:$0xff] }
 0x2c6   : > { %v3368_v63 = vmul.f32 %v2619_v12, %v11866_v33  ;;  %v9515_v14 = vmul.f32 %v2619_v12, %v8650_v39  ;;  %v3367_v1 = vmul.f32 %v2334_v31, %v11868_v36  ;;  %v9519_v13 = vmul.f32 %v2334_v31, %v11869_v55  ;;  %v2621_v49 = vpop.f32.mrb[213].mxu1  ;;  %6083 = vmatprep.subr.bf16.mxu0 %v6082_v60  ;;  %v3226_v56 = vld [vmem:[%s10903_s1] sm:$0xff]  ;;  %v11874_v33 = vld [vmem:[#allocation123_spill] sm:$0xff] }
 0x2c7   : > { %11865 = vst [vmem:[#allocation91_spill] sm:$0xff] %v9511_v32  ;;  %v3369_v29 = vmul.f32 %v2621_v49, %v11871_v34  ;;  %v9523_v37 = vmul.f32 %v2621_v49, %v11872_v27  ;;  %6155 = vmatprep.subr.bf16.mxu1 %v6154_v38  ;;  %6085 = vmatpush1.bf16.msra.mxu0 %v6084_v50  ;;  %v11875_v39 = vld [vmem:[#allocation270_spill] sm:$0xff]  ;;  %v11877_v34 = vld [vmem:[#allocation124_spill] sm:$0xff]  ;;  %v11878_v50 = vld [vmem:[#allocation271_spill] sm:$0xff] }
 0x2c8   : > { %11867 = vst [vmem:[#allocation92_spill] sm:$0xff] %v9515_v14  ;;  %11870 = vst [vmem:[#allocation93_spill] sm:$0xff] %v9519_v13  ;;  %6157 = vmatpush1.bf16.msra.mxu1 %v6156_v26  ;;  %v2338_v12 = vpop.f32.mrb[214].mxu0  ;;  %v3230_v49 = vld [vmem:[%s10903_s1 + $0x20] sm:$0xff]  ;;  %v11881_v26 = vld [vmem:[#allocation272_spill] sm:$0xff] }
 0x2c9   : > { %11873 = vst [vmem:[#allocation94_spill] sm:$0xff] %v9523_v37  ;;  %v3370_v36 = vmul.f32 %v2338_v12, %v11874_v33  ;;  %v9530_v31 = vmul.f32 %v2338_v12, %v11875_v39  ;;  %v2625_v55 = vpop.f32.mrb[214].mxu1  ;;  %v2340_v60 = vpop.f32.mrb[215].mxu0  ;;  %v11880_v41 = vld [vmem:[#allocation125_spill] sm:$0xff]  ;;  %v11886_v39 = vld [vmem:[#allocation127_spill] sm:$0xff]  ;;  %v11901_v37 = vld [vmem:[#allocation134_spill] sm:$0xff] }
 0x2ca   : > { %v3372_v38 = vmul.f32 %v2625_v55, %v11877_v34  ;;  %v9537_v27 = vmul.f32 %v2625_v55, %v11878_v50  ;;  %v3371_v48 = vmul.f32 %v2340_v60, %v11880_v41  ;;  %v9541_v54 = vmul.f32 %v2340_v60, %v11881_v26  ;;  %v2627_v33 = vpop.f32.mrb[215].mxu1  ;;  %3476 = vmatmul.mubr.f32.vlgmr.msra.gmra.mrb[40].mxu0 %v3226_v56  ;;  %v11891_v55 = vld [vmem:[#allocation129_spill] sm:$0xff] }
 0x2cb   : > { %11876 = vst [vmem:[#allocation95_spill] sm:$0xff] %v9530_v31  ;;  %v6088_v12 = vpack.c.bf16 %v3370_v36, %v3366_v43  ;;  %v3373_v45 = vmul.f32 %v2627_v33, %v11883_v53  ;;  %v9547_v23 = vmul.f32 %v2627_v33, %v11884_v8  ;;  %3654 = vmatmul.mubr.f32.vlgmr.msra.gmra.mrb[40].mxu1 %v3226_v56  ;;  %v11887_v33 = vld [vmem:[#allocation274_spill] sm:$0xff]  ;;  %v11894_v14 = vld [vmem:[#allocation277_spill] sm:$0xff]  ;;  %v11900_v31 = vld [vmem:[#allocation280_spill] sm:$0xff] }
 0x2cc   : > { %11879 = vst [vmem:[#allocation96_spill] sm:$0xff] %v9537_v27  ;;  %11882 = vst [vmem:[#allocation97_spill] sm:$0xff] %v9541_v54  ;;  %v6160_v34 = vpack.c.bf16 %v3372_v38, %v3368_v63  ;;  %v6086_v41 = vpack.c.bf16 %v3371_v48, %v3367_v1  ;;  %v2344_v26 = vpop.f32.mrb[216].mxu0  ;;  %3481 = vmatprep.mubr.f32.mxu0 %v3230_v49  ;;  %3659 = vmatprep.mubr.f32.mxu1 %v3230_v49  ;;  %v3229_v48 = vld [vmem:[%s10903_s1 + $0x18] sm:$0xff] }
 0x2cd   : > { %11885 = vst [vmem:[#allocation98_spill] sm:$0xff] %v9547_v23  ;;  %v6158_v43 = vpack.c.bf16 %v3373_v45, %v3369_v29  ;;  %v9556_v53 = vmul.f32 %v2344_v26, %v11886_v39  ;;  %v9559_v8 = vmul.f32 %v2344_v26, %v11887_v33  ;;  %v2631_v63 = vpop.f32.mrb[216].mxu1  ;;  %v2346_v56 = vpop.f32.mrb[217].mxu0  ;;  %v11888_v1 = vld [vmem:[#allocation128_spill] sm:$0xff]  ;;  %v11889_v45 = vld [vmem:[#allocation275_spill] sm:$0xff]  ;;  %v11893_v33 = vld [vmem:[#allocation130_spill] sm:$0xff] }
 0x2ce   : > { %v9565_v38 = vmul.f32 %v2631_v63, %v11888_v1  ;;  %v9568_v29 = vmul.f32 %v2631_v63, %v11889_v45  ;;  %v3375_v36 = vmul.f32 %v2346_v56, %v11891_v55  ;;  %v11892_v39 = vld [vmem:[#allocation276_spill] sm:$0xff]  ;;  %v2633_v26 = vpop.f32.mrb[217].mxu1  ;;  %6087 = vmatprep.subr.bf16.mxu0 %v6086_v41  ;;  %3482 = vmatmul.mubr.f32.gmra.mrb[42].mxu0 %v3229_v48  ;;  %v11895_v55 = vld [vmem:[#allocation131_spill] sm:$0xff]  ;;  %v11902_v13 = vld [vmem:[#allocation281_spill] sm:$0xff] }
 0x2cf   : > { %v9572_v60 = vmul.f32 %v2346_v56, %v11892_v39  ;;  %v3233_v49 = vld [vmem:[%s10903_s1 + $0x38] sm:$0xff]  ;;  %v3377_v50 = vmul.f32 %v2633_v26, %v11893_v33  ;;  %v9579_v27 = vmul.f32 %v2633_v26, %v11894_v14  ;;  %6159 = vmatprep.subr.bf16.mxu1 %v6158_v43  ;;  %6089 = vmatpush1.bf16.msra.mxu0 %v6088_v12  ;;  %v11896_v56 = vld [vmem:[#allocation278_spill] sm:$0xff]  ;;  %v3232_v33 = vld [vmem:[%s10903_s1 + $0x30] sm:$0xff] }
 0x2d0   : > { %11890 = vst [vmem:[#allocation99_spill] sm:$0xff] %v9568_v29  ;;  %6161 = vmatpush1.bf16.msra.mxu1 %v6160_v34  ;;  %v2350_v63 = vpop.f32.mrb[218].mxu0  ;;  %3487 = vmatprep.mubr.f32.mxu0 %v3233_v49  ;;  %v11897_v26 = vld [vmem:[#allocation132_spill] sm:$0xff]  ;;  %v11898_v43 = vld [vmem:[#allocation279_spill] sm:$0xff]  ;;  %v11899_v34 = vld [vmem:[#allocation133_spill] sm:$0xff] }
 0x2d1   : > { %v3378_v1 = vmul.f32 %v2350_v63, %v11895_v55  ;;  %v9583_v39 = vmul.f32 %v2350_v63, %v11896_v56  ;;  %v2637_v41 = vpop.f32.mrb[218].mxu1  ;;  %3660 = vmatmul.mubr.f32.gmra.mrb[42].mxu1 %v3229_v48  ;;  %v2352_v45 = vpop.f32.mrb[219].mxu0 }
 0x2d2   : > { %v3380_v14 = vmul.f32 %v2637_v41, %v11897_v26  ;;  %v9590_v12 = vmul.f32 %v2637_v41, %v11898_v43  ;;  %v3379_v32 = vmul.f32 %v2352_v45, %v11899_v34  ;;  %v9594_v55 = vmul.f32 %v2352_v45, %v11900_v31  ;;  %v2639_v63 = vpop.f32.mrb[219].mxu1  ;;  %3665 = vmatprep.mubr.f32.mxu1 %v3233_v49  ;;  %v11906_v26 = vld [vmem:[#allocation136_spill] sm:$0xff]  ;;  %v11909_v43 = vld [vmem:[#allocation137_spill] sm:$0xff] }
 0x2d3   : > { %v6092_v48 = vpack.c.bf16 %v3378_v1, %v9556_v53  ;;  %v3381_v23 = vmul.f32 %v2639_v63, %v11901_v37  ;;  %v9601_v54 = vmul.f32 %v2639_v63, %v11902_v13  ;;  %3488 = vmatmul.mubr.f32.gmra.mrb[44].mxu0 %v3232_v33  ;;  %v3236_v53 = vld [vmem:[%s10903_s1 + $0x50] sm:$0xff] }
 0x2d4   : > { %v6164_v41 = vpack.c.bf16 %v3380_v14, %v9565_v38  ;;  %v6090_v34 = vpack.c.bf16 %v3379_v32, %v3375_v36  ;;  %v2356_v49 = vpop.f32.mrb[220].mxu0  ;;  %v11903_v63 = vld [vmem:[#allocation135_spill] sm:$0xff]  ;;  %v11904_v14 = vld [vmem:[#allocation282_spill] sm:$0xff]  ;;  %3493 = vmatprep.mubr.f32.mxu0 %v3236_v53 }
 0x2d5   : > { %v6162_v1 = vpack.c.bf16 %v3381_v23, %v3377_v50  ;;  %v3382_v56 = vmul.f32 %v2356_v49, %v11903_v63  ;;  %v9615_v38 = vmul.f32 %v2356_v49, %v11904_v14  ;;  %v2643_v32 = vpop.f32.mrb[220].mxu1  ;;  %3666 = vmatmul.mubr.f32.gmra.mrb[44].mxu1 %v3232_v33  ;;  %v2358_v36 = vpop.f32.mrb[221].mxu0  ;;  %v11907_v13 = vld [vmem:[#allocation283_spill] sm:$0xff]  ;;  %v11910_v50 = vld [vmem:[#allocation284_spill] sm:$0xff]  ;;  %v11912_v33 = vld [vmem:[#allocation138_spill] sm:$0xff] }
 0x2d6   : > { %v3384_v45 = vmul.f32 %v2643_v32, %v11906_v26  ;;  %v9619_v31 = vmul.f32 %v2643_v32, %v11907_v13  ;;  %v3383_v23 = vmul.f32 %v2358_v36, %v11909_v43  ;;  %v9623_v37 = vmul.f32 %v2358_v36, %v11910_v50  ;;  %v2645_v63 = vpop.f32.mrb[221].mxu1  ;;  %6091 = vmatprep.subr.bf16.mxu0 %v6090_v34  ;;  %v3235_v49 = vld [vmem:[%s10903_s1 + $0x48] sm:$0xff]  ;;  %v372_v36 = vld [vmem:[%s6836_s10 + $0x18] sm:$0xff] }
 0x2d7   : > { %11905 = vst [vmem:[#allocation100_spill] sm:$0xff] %v9615_v38  ;;  %v3385_v14 = vmul.f32 %v2645_v63, %v11912_v33  ;;  %v11913_v38 = vld [vmem:[#allocation285_spill] sm:$0xff]  ;;  %6163 = vmatprep.subr.bf16.mxu1 %v6162_v1  ;;  %v370_v32 = vld [vmem:[%s6836_s10 + $0x8] sm:$0xff]  ;;  %6093 = vmatpush1.bf16.msra.mxu0 %v6092_v48  ;;  %v369_v34 = vld [vmem:[%s6836_s10] sm:$0xff] }
 0x2d8   : > { %11908 = vst [vmem:[#allocation101_spill] sm:$0xff] %v9619_v31  ;;  %11911 = vst [vmem:[#allocation102_spill] sm:$0xff] %v9623_v37  ;;  %v9630_v26 = vmul.f32 %v2645_v63, %v11913_v38  ;;  %3671 = vmatprep.mubr.f32.mxu1 %v3236_v53  ;;  %v2714_v43 = vpop.f32.mrb[222].mxu0  ;;  %6165 = vmatpush1.bf16.msra.mxu1 %v6164_v41  ;;  %v371_v63 = vld [vmem:[%s6836_s10 + $0x10] sm:$0xff]  ;;  %v11915_v38 = vld [vmem:[#allocation139_spill] sm:$0xff] }
 0x2d9   : > { %v9636_v50 = vmul.f32 %v2714_v43, %v8124_v10  ;;  %v3001_v13 = vpop.f32.mrb[222].mxu1  ;;  %3494 = vmatmul.mubr.f32.gmra.mrb[46].mxu0 %v3235_v49  ;;  %v2716_v33 = vpop.f32.mrb[223].mxu0  ;;  %5925 = vmatprep.subr.msk.mxu0 %vm778_vm0, %v3383_v23  ;;  %v11916_v48 = vld [vmem:[#allocation140_spill] sm:$0xff]  ;;  %v6645_v41 = vld [vmem:[%s6836_s10 + $0x28] sm:$0xf] }
 0x2da   : > { %11914 = vst [vmem:[#allocation103_spill] sm:$0xff] %v9630_v26  ;;  %v9640_v1 = vmul.f32 %v3001_v13, %v11915_v38  ;;  %3672 = vmatmul.mubr.f32.gmra.mrb[46].mxu1 %v3235_v49  ;;  %v9644_v53 = vmul.f32 %v2716_v33, %v11916_v48  ;;  %v3003_v31 = vpop.f32.mrb[223].mxu1  ;;  %v3228_v10 = vld [vmem:[%s10903_s1 + $0x10] sm:$0xff]  ;;  %v6166_v43 = vpack.c.bf16 %v6645_v41, %v370_v32  ;;  %v11917_v13 = vld [vmem:[#allocation141_spill] sm:$0xff]  ;;  %v6647_v48 = vld [vmem:[%s6836_s10 + $0x20] sm:$0xf] }
 0x2db   : > { %5931 = vmatprep.subr.msk.mxu1 %vm778_vm0, %v3385_v14  ;;  %v9652_v38 = vmul.f32 %v3003_v31, %v11917_v13  ;;  %3564 = vmatprep.mubr.f32.mxu0 %v11328_v24  ;;  %v6646_v49 = vld [vmem:[%s6836_s10 + $0x38] sm:$0xf]  ;;  %v6169_v26 = vpack.c.bf16 %v6647_v48, %v369_v34  ;;  %v6648_v32 = vld [vmem:[%s6836_s10 + $0x30] sm:$0xf]  ;;  %v11920_v41 = vld [vmem:[#allocation142_spill] sm:$0xff] }
 0x2dc   : > { %v6172_v33 = vpack.c.bf16 %v6646_v49, %v372_v36  ;;  %5926 = vmatpush1.msk.msra.mxu0 %vm778_vm0, %v3382_v56  ;;  %3742 = vmatprep.mubr.f32.mxu1 %v11328_v24  ;;  %v2720_v14 = vpop.f32.mrb[224].mxu0  ;;  %v6175_v31 = vpack.c.bf16 %v6648_v32, %v371_v63  ;;  %v11921_v56 = vld [vmem:[#allocation143_spill] sm:$0xff] }
 0x2dd   : > { %5932 = vmatpush1.msk.msra.mxu1 %vm778_vm0, %v3384_v45  ;;  %v9667_v13 = vmul.f32 %v2720_v14, %v11920_v41  ;;  %v3007_v37 = vpop.f32.mrb[224].mxu1  ;;  %5927 = vmatmul.mubr.msk.f32.vlgmr.msra.gmra.mrb[40].mxu0 %vm3386_vm3, %v3228_v10  ;;  %v2722_v29 = vpop.f32.mrb[225].mxu0 }
 0x2de   : > { %v9671_v36 = vmul.f32 %v3007_v37, %v8145_v51  ;;  %5933 = vmatmul.mubr.msk.f32.vlgmr.msra.gmra.mrb[40].mxu1 %vm3386_vm3, %v3228_v10  ;;  %6168 = vmatprep.subr.msk.bf16.mxu0 %vm9656_vm5, %v6166_v43  ;;  %v9677_v34 = vmul.f32 %v2722_v29, %v11921_v56  ;;  %v3009_v63 = vpop.f32.mrb[225].mxu1  ;;  %v3231_v51 = vld [vmem:[%s10903_s1 + $0x28] sm:$0xff]  ;;  %v11923_v43 = vpack.c.bf16 %v8760_v52, %v8736_v22  ;;  %v11960_v37 = vld [vmem:[#allocation160_spill] sm:$0xff] }
 0x2df   : > { %6174 = vmatprep.subr.msk.bf16.mxu1 %vm9656_vm5, %v6172_v33  ;;  %v9684_v49 = vmul.f32 %v3009_v63, %v8151_v47  ;;  %6171 = vmatpush1.bf16.msk.msra.mxu0 %vm9656_vm5, %v6169_v26  ;;  %v11922_v47 = vpack.c.bf16 %v8752_v42, %v8730_v30 }
 0x2e0   : > { %6177 = vmatpush1.bf16.msk.msra.mxu1 %vm9656_vm5, %v6175_v31  ;;  %v2726_v10 = vpop.f32.mrb[226].mxu0  ;;  %3570 = vmatprep.mubr.f32.mxu0 %v11328_v24 }
 0x2e1   : > { %6179 = vmatprep.subr.bf16.mxu0 %v11922_v47  ;;  %6251 = vmatprep.subr.bf16.mxu1 %v11923_v43  ;;  %v9707_v33 = vmul.f32 %v2726_v10, %v8162_v7  ;;  %v3013_v48 = vpop.f32.mrb[226].mxu1  ;;  %v2728_v23 = vpop.f32.mrb[227].mxu0  ;;  %v3234_v7 = vld [vmem:[%s10903_s1 + $0x40] sm:$0xff] }
 0x2e2   : > { %3748 = vmatprep.mubr.f32.mxu1 %v11328_v24  ;;  %v9711_v42 = vmul.f32 %v3013_v48, %v8164_v35  ;;  %5928 = vmatmul.mubr.msk.f32.gmra.mrb[42].mxu0 %vm3386_vm3, %v3231_v51  ;;  %v9715_v30 = vmul.f32 %v2728_v23, %v8166_v46  ;;  %v3015_v14 = vpop.f32.mrb[227].mxu1 }
 0x2e3   : > { %5934 = vmatmul.mubr.msk.f32.gmra.mrb[42].mxu1 %vm3386_vm3, %v3231_v51  ;;  %v9719_v22 = vmul.f32 %v3015_v14, %v8170_v19  ;;  %3576 = vmatprep.mubr.f32.mxu0 %v11328_v24 }
 0x2e4   : > { %3754 = vmatprep.mubr.f32.mxu1 %v11328_v24  ;;  %v2732_v35 = vpop.f32.mrb[228].mxu0 }
 0x2e5   : > { %v9727_v52 = vmul.f32 %v2732_v35, %v8181_v4  ;;  %v3019_v46 = vpop.f32.mrb[228].mxu1  ;;  %v2734_v32 = vpop.f32.mrb[229].mxu0  ;;  %v11936_v4 = vld [vmem:[#allocation293_spill] sm:$0xff] }
 0x2e6   : > { %v9730_v31 = vmul.f32 %v3019_v46, %v8183_v18  ;;  %5929 = vmatmul.mubr.msk.f32.gmra.mrb[44].mxu0 %vm3386_vm3, %v3234_v7  ;;  %v9734_v19 = vmul.f32 %v2734_v32, %v8185_v17  ;;  %v3021_v41 = vpop.f32.mrb[229].mxu1  ;;  %v3237_v18 = vld [vmem:[%s10903_s1 + $0x58] sm:$0xff] }
 0x2e7   : > { %5935 = vmatmul.mubr.msk.f32.gmra.mrb[44].mxu1 %vm3386_vm3, %v3234_v7  ;;  %v9740_v63 = vmul.f32 %v3021_v41, %v8189_v15  ;;  %3582 = vmatprep.mubr.f32.mxu0 %v11328_v24  ;;  %v11953_v17 = vld [vmem:[#allocation9_spill] sm:$0xff] }
 0x2e8   : > { %3760 = vmatprep.mubr.f32.mxu1 %v11328_v24  ;;  %v2738_v51 = vpop.f32.mrb[230].mxu0 }
 0x2e9   : > { %v9754_v15 = vmul.f32 %v2738_v51, %v8200_v40  ;;  %v3025_v10 = vpop.f32.mrb[230].mxu1  ;;  %v2740_v43 = vpop.f32.mrb[231].mxu0  ;;  %v3222_v40 = vld [vmem:[%s10906_s4] sm:$0xff]  ;;  %v11925_v51 = vld [vmem:[#allocation288_spill] sm:$0xff] }
 0x2ea   : > { %v9757_v48 = vmul.f32 %v3025_v10, %v11545_v0  ;;  %5930 = vmatmul.mubr.msk.f32.gmra.mrb[46].mxu0 %vm3386_vm3, %v3237_v18  ;;  %v9761_v23 = vmul.f32 %v2740_v43, %v11548_v61  ;;  %v3027_v14 = vpop.f32.mrb[231].mxu1  ;;  %v11926_v10 = vld [vmem:[#allocation286_spill] sm:$0xff]  ;;  %v11928_v43 = vld [vmem:[#allocation152_spill] sm:$0xff] }
 0x2eb   : > { %5936 = vmatmul.mubr.msk.f32.gmra.mrb[46].mxu1 %vm3386_vm3, %v3237_v18  ;;  %v9765_v7 = vmul.f32 %v3027_v14, %v11552_v3  ;;  %3857 = vmatprep.mubr.f32.mxu0 %v11328_v24  ;;  %v11932_v18 = vld [vmem:[#allocation296_spill] sm:$0xff] }
 0x2ec   : > { %11924 = vst [vmem:[#allocation104_spill] sm:$0xff] %v9757_v48  ;;  %3946 = vmatprep.mubr.f32.mxu1 %v11328_v24  ;;  %v2744_v0 = vpop.f32.mrb[232].mxu0 }
 0x2ed   : > { %v9773_v35 = vmul.f32 %v2744_v0, %v11555_v9  ;;  %v3031_v61 = vpop.f32.mrb[232].mxu1  ;;  %v2746_v46 = vpop.f32.mrb[233].mxu0  ;;  %v11927_v9 = vpack.c.bf16 %v11925_v51, %v11926_v10  ;;  %v11929_v0 = vld [vmem:[#allocation289_spill] sm:$0xff]  ;;  %v11933_v51 = vld [vmem:[#allocation292_spill] sm:$0xff] }
 0x2ee   : > { %v9776_v32 = vmul.f32 %v3031_v61, %v11558_v28  ;;  %5939 = vmatmul.mubr.msk.f32.vlgmr.msra.gmra.mrb[40].mxu0 %vm3767_vm6, %v3222_v40  ;;  %v9780_v3 = vmul.f32 %v2746_v46, %v11561_v21  ;;  %v3033_v41 = vpop.f32.mrb[233].mxu1  ;;  %v3223_v28 = vld [vmem:[%s10906_s4 + $0x8] sm:$0xff]  ;;  %v11934_v10 = vpack.c.bf16 %v11932_v18, %v11933_v51  ;;  %v11942_v18 = vld [vmem:[#allocation156_spill] sm:$0xff] }
 0x2ef   : > { %5945 = vmatmul.mubr.msk.f32.vlgmr.msra.gmra.mrb[40].mxu1 %vm3767_vm6, %v3222_v40  ;;  %6181 = vmatpush1.bf16.msra.mxu0 %v11927_v9  ;;  %v9789_v14 = vmul.f32 %v3033_v41, %v11928_v43  ;;  %v11930_v61 = vld [vmem:[#allocation287_spill] sm:$0xff]  ;;  %v11935_v43 = vld [vmem:[#allocation297_spill] sm:$0xff]  ;;  %v11938_v21 = vld [vmem:[#allocation154_spill] sm:$0xff] }
 0x2f0   : > { %v11931_v46 = vpack.c.bf16 %v11929_v0, %v11930_v61  ;;  %6183 = vmatprep.subr.bf16.mxu0 %v11934_v10  ;;  %v2750_v41 = vpop.f32.mrb[234].mxu0  ;;  %v11937_v56 = vpack.c.bf16 %v11935_v43, %v11936_v4  ;;  %3863 = vmatprep.mubr.f32.mxu0 %v11328_v24  ;;  %v11944_v4 = vld [vmem:[#allocation294_spill] sm:$0xff]  ;;  %v11952_v9 = vld [vmem:[#allocation147_spill] sm:$0xff] }
 0x2f1   : > { %v9810_v47 = vmul.f32 %v2750_v41, %v11938_v21  ;;  %v3037_v0 = vpop.f32.mrb[234].mxu1  ;;  %v2752_v61 = vpop.f32.mrb[235].mxu0  ;;  %3952 = vmatprep.mubr.f32.mxu1 %v11328_v24  ;;  %v11947_v21 = vld [vmem:[#allocation157_spill] sm:$0xff]  ;;  %v11954_v29 = vpack.c.bf16 %v11952_v9, %v11953_v17  ;;  %v11965_v9 = vld [vmem:[#allocation298_spill] sm:$0xff] }
 0x2f2   : > { %6253 = vmatpush1.bf16.msra.mxu1 %v11931_v46  ;;  %v11940_v46 = vld [vmem:[#allocation155_spill] sm:$0xff]  ;;  %v9817_v51 = vmul.f32 %v2752_v61, %v11942_v18  ;;  %v3039_v10 = vpop.f32.mrb[235].mxu1  ;;  %5940 = vmatmul.mubr.msk.f32.gmra.mrb[42].mxu0 %vm3767_vm6, %v3223_v28 }
 0x2f3   : > { %6255 = vmatprep.subr.bf16.mxu1 %v11937_v56  ;;  %11939 = vst [vmem:[#allocation105_spill] sm:$0xff] %v9810_v47  ;;  %v9814_v40 = vmul.f32 %v3037_v0, %v11940_v46  ;;  %v11945_v56 = vld [vmem:[#allocation290_spill] sm:$0xff]  ;;  %v9825_v41 = vmul.f32 %v3039_v10, %v11947_v21  ;;  %5946 = vmatmul.mubr.msk.f32.gmra.mrb[42].mxu1 %vm3767_vm6, %v3223_v28  ;;  %v3224_v0 = vld [vmem:[%s10906_s4 + $0x10] sm:$0xff] }
 0x2f4   : > { %11943 = vst [vmem:[#allocation107_spill] sm:$0xff] %v9817_v51  ;;  %v11946_v43 = vpack.c.bf16 %v11944_v4, %v11945_v56  ;;  %v11949_v61 = vld [vmem:[#allocation295_spill] sm:$0xff]  ;;  %v2756_v45 = vpop.f32.mrb[236].mxu0  ;;  %v11956_v56 = vld [vmem:[#allocation146_spill] sm:$0xff]  ;;  %3869 = vmatprep.mubr.f32.mxu0 %v11328_v24  ;;  %3958 = vmatprep.mubr.f32.mxu1 %v11328_v24  ;;  %v11996_v51 = vld [vmem:[#allocation153_spill] sm:$0xff] }
 0x2f5   : > { %11941 = vst [vmem:[#allocation106_spill] sm:$0xff] %v9814_v40  ;;  %11948 = vst [vmem:[#allocation108_spill] sm:$0xff] %v9825_v41  ;;  %v11950_v46 = vld [vmem:[#allocation291_spill] sm:$0xff]  ;;  %v3043_v28 = vpop.f32.mrb[236].mxu1  ;;  %v2758_v26 = vpop.f32.mrb[237].mxu0 }
 0x2f6   : > { %6185 = vmatpush1.bf16.msra.mxu0 %v11946_v43  ;;  %v11951_v18 = vpack.c.bf16 %v11949_v61, %v11950_v46  ;;  %v11955_v4 = vld [vmem:[#allocation11_spill] sm:$0xff]  ;;  %v9845_v48 = vmul.f32 %v3043_v28, %v11960_v37  ;;  %v11962_v61 = vld [vmem:[#allocation161_spill] sm:$0xff]  ;;  %v3045_v17 = vpop.f32.mrb[237].mxu1 }
 0x2f7   : > { %6187 = vmatprep.subr.bf16.mxu0 %v11954_v29  ;;  %v11957_v43 = vpack.c.bf16 %v11955_v4, %v11956_v56  ;;  %v11958_v10 = vld [vmem:[#allocation159_spill] sm:$0xff]  ;;  %v9848_v46 = vmul.f32 %v2758_v26, %v11962_v61  ;;  %5941 = vmatmul.mubr.msk.f32.gmra.mrb[44].mxu0 %vm3767_vm6, %v3224_v0  ;;  %v11967_v4 = vld [vmem:[#allocation162_spill] sm:$0xff]  ;;  %v3225_v37 = vld [vmem:[%s10906_s4 + $0x18] sm:$0xff] }
 0x2f8   : > { %6257 = vmatpush1.bf16.msra.mxu1 %v11951_v18  ;;  %v9841_v21 = vmul.f32 %v2756_v45, %v11958_v10  ;;  %11961 = vst [vmem:[#allocation110_spill] sm:$0xff] %v9845_v48  ;;  %v11964_v45 = vld [vmem:[#allocation144_spill] sm:$0xff]  ;;  %v9858_v56 = vmul.f32 %v3045_v17, %v11967_v4  ;;  %v11970_v10 = vld [vmem:[#allocation145_spill] sm:$0xff]  ;;  %v11975_v4 = vld [vmem:[#allocation15_spill] sm:$0xff]  ;;  %3875 = vmatprep.mubr.f32.mxu0 %v11328_v24 }
 0x2f9   : > { %6259 = vmatprep.subr.bf16.mxu1 %v11957_v43  ;;  %11963 = vst [vmem:[#allocation111_spill] sm:$0xff] %v9848_v46  ;;  %v11966_v18 = vpack.c.bf16 %v11964_v45, %v11965_v9  ;;  %5947 = vmatmul.mubr.msk.f32.gmra.mrb[44].mxu1 %vm3767_vm6, %v3224_v0  ;;  %v11969_v43 = vld [vmem:[#allocation10_spill] sm:$0xff]  ;;  %v11972_v45 = vld [vmem:[#allocation148_spill] sm:$0xff]  ;;  %v11976_v29 = vld [vmem:[#allocation13_spill] sm:$0xff] }
 0x2fa   : > { %11959 = vst [vmem:[#allocation109_spill] sm:$0xff] %v9841_v21  ;;  %11968 = vst [vmem:[#allocation112_spill] sm:$0xff] %v9858_v56  ;;  %v11971_v28 = vpack.c.bf16 %v11969_v43, %v11970_v10  ;;  %v11973_v9 = vld [vmem:[#allocation150_spill] sm:$0xff]  ;;  %v11977_v47 = vpack.c.bf16 %v11975_v4, %v11976_v29  ;;  %v11978_v26 = vld [vmem:[#allocation164_spill] sm:$0xff]  ;;  %v3049_v43 = vpop.f32.mrb[238].mxu1  ;;  %3964 = vmatprep.mubr.f32.mxu1 %v11328_v24 }
 0x2fb   : > { %6189 = vmatpush1.bf16.msra.mxu0 %v11966_v18  ;;  %v11974_v17 = vpack.c.bf16 %v11972_v45, %v11973_v9  ;;  %v2762_v18 = vpop.f32.mrb[238].mxu0  ;;  %v11982_v45 = vld [vmem:[#allocation166_spill] sm:$0xff]  ;;  %v11984_v29 = vld [vmem:[#allocation151_spill] sm:$0xff] }
 0x2fc   : > { %6261 = vmatpush1.bf16.msra.mxu1 %v11971_v28  ;;  %v9880_v40 = vmul.f32 %v2762_v18, %v11978_v26  ;;  %v2764_v10 = vpop.f32.mrb[239].mxu0  ;;  %v11980_v28 = vld [vmem:[#allocation165_spill] sm:$0xff]  ;;  %5942 = vmatmul.mubr.msk.f32.gmra.mrb[46].mxu0 %vm3767_vm6, %v3225_v37  ;;  %v11987_v4 = vld [vmem:[#allocation167_spill] sm:$0xff]  ;;  %v11993_v48 = vld [vmem:[#allocation18_spill] sm:$0xff] }
 0x2fd   : > { %6191 = vmatprep.subr.bf16.mxu0 %v11974_v17  ;;  %6263 = vmatprep.subr.bf16.mxu1 %v11977_v47  ;;  %v9884_v61 = vmul.f32 %v3049_v43, %v11980_v28  ;;  %v9887_v9 = vmul.f32 %v2764_v10, %v11982_v45  ;;  %v3051_v17 = vpop.f32.mrb[239].mxu1  ;;  %v3972_v47 = vld [vmem:[%s10903_s1 + $0x68] sm:$0xff]  ;;  %v11985_v26 = vld [vmem:[#allocation149_spill] sm:$0xff]  ;;  %v11990_v10 = vld [vmem:[#allocation12_spill] sm:$0xff]  ;;  %v2768_v41 = vpop.f32.mrb[240].mxu0 }
 0x2fe   : > { %11979 = vst [vmem:[#allocation113_spill] sm:$0xff] %v9880_v40  ;;  %v11986_v18 = vpack.c.bf16 %v11984_v29, %v11985_v26  ;;  %v9898_v0 = vmul.f32 %v3051_v17, %v11987_v4  ;;  %5948 = vmatmul.mubr.msk.f32.gmra.mrb[46].mxu1 %vm3767_vm6, %v3225_v37  ;;  %v11989_v43 = vld [vmem:[#allocation14_spill] sm:$0xff]  ;;  %v11992_v45 = vld [vmem:[#allocation21_spill] sm:$0xff]  ;;  %v3055_v17 = vpop.f32.mrb[240].mxu1  ;;  %4219 = vmatprep.mubr.f32.mxu0 %v3972_v47 }
 0x2ff   : > { %11981 = vst [vmem:[#allocation114_spill] sm:$0xff] %v9884_v61  ;;  %11983 = vst [vmem:[#allocation115_spill] sm:$0xff] %v9887_v9  ;;  %v11991_v28 = vpack.c.bf16 %v11989_v43, %v11990_v10  ;;  %v11994_v21 = vpack.c.bf16 %v11992_v45, %v11993_v48  ;;  %v11995_v56 = vld [vmem:[#allocation22_spill] sm:$0xff]  ;;  %v11998_v29 = vld [vmem:[#allocation169_spill] sm:$0xff]  ;;  %4397 = vmatprep.mubr.f32.mxu1 %v3972_v47 }
 0x300   : > { %6193 = vmatpush1.bf16.msra.mxu0 %v11986_v18  ;;  %11988 = vst [vmem:[#allocation116_spill] sm:$0xff] %v9898_v0  ;;  %v11997_v46 = vpack.c.bf16 %v11995_v56, %v11996_v51  ;;  %v9911_v26 = vmul.f32 %v2768_v41, %v11998_v29  ;;  %v2770_v18 = vpop.f32.mrb[241].mxu0  ;;  %v12000_v37 = vld [vmem:[#allocation170_spill] sm:$0xff]  ;;  %v12002_v43 = vld [vmem:[#allocation171_spill] sm:$0xff]  ;;  %v12004_v51 = vld [vmem:[#allocation16_spill] sm:$0xff] }
 0x301   : > { %6265 = vmatpush1.bf16.msra.mxu1 %v11991_v28  ;;  %6195 = vmatprep.subr.bf16.mxu0 %v11994_v21  ;;  %v9914_v4 = vmul.f32 %v3055_v17, %v12000_v37  ;;  %v9917_v10 = vmul.f32 %v2770_v18, %v12002_v43  ;;  %v3057_v28 = vpop.f32.mrb[241].mxu1  ;;  %v12003_v21 = vld [vmem:[#allocation19_spill] sm:$0xff]  ;;  %v12006_v41 = vld [vmem:[#allocation172_spill] sm:$0xff]  ;;  %v12009_v17 = vld [vmem:[#allocation17_spill] sm:$0xff]  ;;  %v2774_v40 = vpop.f32.mrb[242].mxu0 }
 0x302   : > { %6267 = vmatprep.subr.bf16.mxu1 %v11997_v46  ;;  %11999 = vst [vmem:[#allocation117_spill] sm:$0xff] %v9911_v26  ;;  %v12005_v46 = vpack.c.bf16 %v12003_v21, %v12004_v51  ;;  %v9925_v56 = vmul.f32 %v3057_v28, %v12006_v41  ;;  %v12008_v29 = vld [vmem:[#allocation20_spill] sm:$0xff]  ;;  %v12011_v18 = vld [vmem:[#allocation27_spill] sm:$0xff]  ;;  %v12015_v51 = vld [vmem:[#allocation25_spill] sm:$0xff] }
 0x303   : > { %12001 = vst [vmem:[#allocation118_spill] sm:$0xff] %v9914_v4  ;;  %v12010_v37 = vpack.c.bf16 %v12008_v29, %v12009_v17  ;;  %v12012_v43 = vld [vmem:[#allocation24_spill] sm:$0xff]  ;;  %v12017_v41 = vld [vmem:[#allocation174_spill] sm:$0xff]  ;;  %v3061_v29 = vpop.f32.mrb[242].mxu1  ;;  %v2776_v17 = vpop.f32.mrb[243].mxu0  ;;  %v12026_v21 = vld [vmem:[#allocation177_spill] sm:$0xff] }
 0x304   : > { %6197 = vmatpush1.bf16.msra.mxu0 %v12005_v46  ;;  %12007 = vst [vmem:[#allocation119_spill] sm:$0xff] %v9925_v56  ;;  %v12013_v48 = vpack.c.bf16 %v12011_v18, %v12012_v43  ;;  %v12014_v28 = vld [vmem:[#allocation28_spill] sm:$0xff]  ;;  %v9943_v45 = vmul.f32 %v2774_v40, %v12017_v41  ;;  %v12023_v18 = vld [vmem:[#allocation26_spill] sm:$0xff]  ;;  %v12036_v56 = vld [vmem:[#allocation179_spill] sm:$0xff] }
 0x305   : > { %6269 = vmatpush1.bf16.msra.mxu1 %v12010_v37  ;;  %v12016_v46 = vpack.c.bf16 %v12014_v28, %v12015_v51  ;;  %v12019_v37 = vld [vmem:[#allocation175_spill] sm:$0xff]  ;;  %v12021_v47 = vld [vmem:[#allocation176_spill] sm:$0xff]  ;;  %v12024_v43 = vld [vmem:[#allocation158_spill] sm:$0xff] }
 0x306   : > { %6199 = vmatprep.subr.bf16.mxu0 %v12013_v48  ;;  %12018 = vst [vmem:[#allocation120_spill] sm:$0xff] %v9943_v45  ;;  %v9946_v61 = vmul.f32 %v3061_v29, %v12019_v37  ;;  %v9949_v4 = vmul.f32 %v2776_v17, %v12021_v47  ;;  %v3063_v48 = vpop.f32.mrb[243].mxu1  ;;  %v12025_v26 = vpack.c.bf16 %v12023_v18, %v12024_v43  ;;  %v12028_v28 = vld [vmem:[#allocation163_spill] sm:$0xff]  ;;  %v2780_v29 = vpop.f32.mrb[244].mxu0  ;;  %v12033_v37 = vld [vmem:[#allocation34_spill] sm:$0xff]  ;;  %v12040_v43 = vld [vmem:[#allocation181_spill] sm:$0xff] }
 0x307   : > { %6271 = vmatprep.subr.bf16.mxu1 %v12016_v46  ;;  %v9955_v0 = vmul.f32 %v3063_v48, %v12026_v21  ;;  %v12029_v51 = vld [vmem:[#allocation23_spill] sm:$0xff]  ;;  %v12031_v46 = vld [vmem:[#allocation168_spill] sm:$0xff]  ;;  %v9967_v9 = vmul.f32 %v2780_v29, %v12036_v56  ;;  %v2782_v18 = vpop.f32.mrb[245].mxu0  ;;  %v12046_v29 = vld [vmem:[#allocation33_spill] sm:$0xff] }
 0x308   : > { %12020 = vst [vmem:[#allocation121_spill] sm:$0xff] %v9946_v61  ;;  %12022 = vst [vmem:[#allocation122_spill] sm:$0xff] %v9949_v4  ;;  %6201 = vmatpush1.bf16.msra.mxu0 %v12025_v26  ;;  %v12030_v40 = vpack.c.bf16 %v12028_v28, %v12029_v51  ;;  %v12032_v41 = vpack.c.bf16 %v9073_v44, %v12031_v46  ;;  %v12034_v47 = vld [vmem:[#allocation31_spill] sm:$0xff]  ;;  %v3067_v26 = vpop.f32.mrb[244].mxu1  ;;  %v12038_v21 = vld [vmem:[#allocation180_spill] sm:$0xff]  ;;  %v9973_v28 = vmul.f32 %v2782_v18, %v12040_v43  ;;  %v2786_v45 = vpop.f32.mrb[246].mxu0 }
 0x309   : > { %12027 = vst [vmem:[#allocation123_spill] sm:$0xff] %v9955_v0  ;;  %v12035_v17 = vpack.c.bf16 %v12033_v37, %v12034_v47  ;;  %12037 = vst [vmem:[#allocation124_spill] sm:$0xff] %v9967_v9  ;;  %v9970_v48 = vmul.f32 %v3067_v26, %v12038_v21  ;;  %v3069_v51 = vpop.f32.mrb[245].mxu1  ;;  %v12042_v46 = vld [vmem:[#allocation29_spill] sm:$0xff]  ;;  %v12044_v37 = vld [vmem:[#allocation182_spill] sm:$0xff] }
 0x30a   : > { %6273 = vmatpush1.bf16.msra.mxu1 %v12030_v40  ;;  %6203 = vmatprep.subr.bf16.mxu0 %v12032_v41  ;;  %v12041_v40 = vld [vmem:[#allocation32_spill] sm:$0xff]  ;;  %v9981_v47 = vmul.f32 %v3069_v51, %v12044_v37  ;;  %v12049_v21 = vld [vmem:[#allocation39_spill] sm:$0xff]  ;;  %v12059_v18 = vld [vmem:[#allocation186_spill] sm:$0xff] }
 0x30b   : > { %6275 = vmatprep.subr.bf16.mxu1 %v12035_v17  ;;  %12039 = vst [vmem:[#allocation125_spill] sm:$0xff] %v9970_v48  ;;  %v12043_v41 = vpack.c.bf16 %v12041_v40, %v12042_v46  ;;  %v12047_v17 = vld [vmem:[#allocation30_spill] sm:$0xff]  ;;  %v12050_v43 = vld [vmem:[#allocation36_spill] sm:$0xff]  ;;  %v12053_v46 = vld [vmem:[#allocation37_spill] sm:$0xff] }
 0x30c   : > { %12045 = vst [vmem:[#allocation126_spill] sm:$0xff] %v9981_v47  ;;  %v12048_v26 = vpack.c.bf16 %v12046_v29, %v12047_v17  ;;  %v12051_v44 = vpack.c.bf16 %v12049_v21, %v12050_v43  ;;  %v12052_v51 = vld [vmem:[#allocation40_spill] sm:$0xff]  ;;  %v3073_v29 = vpop.f32.mrb[246].mxu1  ;;  %v2788_v17 = vpop.f32.mrb[247].mxu0  ;;  %v12060_v21 = vld [vmem:[#allocation38_spill] sm:$0xff]  ;;  %v12061_v43 = vld [vmem:[#allocation173_spill] sm:$0xff] }
 0x30d   : > { %6205 = vmatpush1.bf16.msra.mxu0 %v12043_v41  ;;  %v12054_v41 = vpack.c.bf16 %v12052_v51, %v12053_v46  ;;  %v12055_v37 = vld [vmem:[#allocation184_spill] sm:$0xff]  ;;  %v10005_v48 = vmul.f32 %v2788_v17, %v12059_v18  ;;  %v12062_v9 = vpack.c.bf16 %v12060_v21, %v12061_v43  ;;  %v12063_v40 = vld [vmem:[#allocation187_spill] sm:$0xff]  ;;  %v12065_v51 = vld [vmem:[#allocation178_spill] sm:$0xff] }
 0x30e   : > { %6277 = vmatpush1.bf16.msra.mxu1 %v12048_v26  ;;  %6207 = vmatprep.subr.bf16.mxu0 %v12051_v44  ;;  %v9999_v56 = vmul.f32 %v2786_v45, %v12055_v37  ;;  %v12057_v26 = vld [vmem:[#allocation185_spill] sm:$0xff]  ;;  %v3075_v44 = vpop.f32.mrb[247].mxu1  ;;  %v12066_v46 = vld [vmem:[#allocation35_spill] sm:$0xff] }
 0x30f   : > { %6279 = vmatprep.subr.bf16.mxu1 %v12054_v41  ;;  %v10002_v61 = vmul.f32 %v3073_v29, %v12057_v26  ;;  %v10011_v0 = vmul.f32 %v3075_v44, %v12063_v40  ;;  %v12067_v45 = vpack.c.bf16 %v12065_v51, %v12066_v46  ;;  %v12068_v41 = vld [vmem:[#allocation183_spill] sm:$0xff]  ;;  %v2792_v29 = vpop.f32.mrb[248].mxu0  ;;  %v12070_v26 = vld [vmem:[#allocation46_spill] sm:$0xff]  ;;  %v12073_v47 = vld [vmem:[#allocation189_spill] sm:$0xff] }
 0x310   : > { %12056 = vst [vmem:[#allocation127_spill] sm:$0xff] %v9999_v56  ;;  %v12069_v37 = vpack.c.bf16 %v9185_v11, %v12068_v41  ;;  %v12071_v18 = vld [vmem:[#allocation43_spill] sm:$0xff]  ;;  %v10023_v4 = vmul.f32 %v2792_v29, %v12073_v47  ;;  %v2794_v21 = vpop.f32.mrb[249].mxu0  ;;  %v12075_v40 = vld [vmem:[#allocation190_spill] sm:$0xff]  ;;  %v12079_v41 = vld [vmem:[#allocation41_spill] sm:$0xff] }
 0x311   : > { %12058 = vst [vmem:[#allocation128_spill] sm:$0xff] %v10002_v61  ;;  %6209 = vmatpush1.bf16.msra.mxu0 %v12062_v9  ;;  %12064 = vst [vmem:[#allocation129_spill] sm:$0xff] %v10011_v0  ;;  %v12072_v17 = vpack.c.bf16 %v12070_v26, %v12071_v18  ;;  %v3079_v9 = vpop.f32.mrb[248].mxu1  ;;  %v12077_v43 = vld [vmem:[#allocation191_spill] sm:$0xff]  ;;  %v12081_v26 = vld [vmem:[#allocation192_spill] sm:$0xff]  ;;  %v2798_v56 = vpop.f32.mrb[250].mxu0 }
 0x312   : > { %6281 = vmatpush1.bf16.msra.mxu1 %v12067_v45  ;;  %6211 = vmatprep.subr.bf16.mxu0 %v12069_v37  ;;  %12074 = vst [vmem:[#allocation130_spill] sm:$0xff] %v10023_v4  ;;  %v10026_v44 = vmul.f32 %v3079_v9, %v12075_v40  ;;  %v10029_v51 = vmul.f32 %v2794_v21, %v12077_v43  ;;  %v3081_v46 = vpop.f32.mrb[249].mxu1  ;;  %v12078_v45 = vld [vmem:[#allocation44_spill] sm:$0xff]  ;;  %v12083_v29 = vld [vmem:[#allocation45_spill] sm:$0xff]  ;;  %v12086_v40 = vld [vmem:[#allocation51_spill] sm:$0xff] }
 0x313   : > { %6283 = vmatprep.subr.bf16.mxu1 %v12072_v17  ;;  %v12080_v37 = vpack.c.bf16 %v12078_v45, %v12079_v41  ;;  %v10037_v18 = vmul.f32 %v3081_v46, %v12081_v26  ;;  %v12084_v17 = vld [vmem:[#allocation42_spill] sm:$0xff]  ;;  %v12087_v43 = vld [vmem:[#allocation48_spill] sm:$0xff]  ;;  %v12090_v41 = vld [vmem:[#allocation49_spill] sm:$0xff] }
 0x314   : > { %12076 = vst [vmem:[#allocation131_spill] sm:$0xff] %v10026_v44  ;;  %v12085_v9 = vpack.c.bf16 %v12083_v29, %v12084_v17  ;;  %v12088_v11 = vpack.c.bf16 %v12086_v40, %v12087_v43  ;;  %v12089_v46 = vld [vmem:[#allocation52_spill] sm:$0xff]  ;;  %v12092_v26 = vld [vmem:[#allocation194_spill] sm:$0xff]  ;;  %v3085_v29 = vpop.f32.mrb[250].mxu1  ;;  %v2800_v17 = vpop.f32.mrb[251].mxu0  ;;  %v12100_v45 = vld [vmem:[#allocation197_spill] sm:$0xff] }
 0x315   : > { %6213 = vmatpush1.bf16.msra.mxu0 %v12080_v37  ;;  %12082 = vst [vmem:[#allocation132_spill] sm:$0xff] %v10037_v18  ;;  %v12091_v37 = vpack.c.bf16 %v12089_v46, %v12090_v41  ;;  %v10055_v47 = vmul.f32 %v2798_v56, %v12092_v26  ;;  %v12096_v21 = vld [vmem:[#allocation196_spill] sm:$0xff]  ;;  %v12097_v40 = vld [vmem:[#allocation50_spill] sm:$0xff]  ;;  %v12101_v46 = vld [vmem:[#allocation193_spill] sm:$0xff]  ;;  %v2804_v26 = vpop.f32.mrb[252].mxu0 }
 0x316   : > { %6285 = vmatpush1.bf16.msra.mxu1 %v12085_v9  ;;  %6215 = vmatprep.subr.bf16.mxu0 %v12088_v11  ;;  %v12094_v9 = vld [vmem:[#allocation195_spill] sm:$0xff]  ;;  %v10061_v44 = vmul.f32 %v2800_v17, %v12096_v21  ;;  %v3087_v11 = vpop.f32.mrb[251].mxu1  ;;  %v12098_v43 = vld [vmem:[#allocation188_spill] sm:$0xff] }
 0x317   : > { %6287 = vmatprep.subr.bf16.mxu1 %v12091_v37  ;;  %12093 = vst [vmem:[#allocation133_spill] sm:$0xff] %v10055_v47  ;;  %v10058_v61 = vmul.f32 %v3085_v29, %v12094_v9  ;;  %v12099_v4 = vpack.c.bf16 %v12097_v40, %v12098_v43  ;;  %v10067_v0 = vmul.f32 %v3087_v11, %v12100_v45  ;;  %v12102_v41 = vld [vmem:[#allocation47_spill] sm:$0xff]  ;;  %v12105_v29 = vld [vmem:[#allocation58_spill] sm:$0xff]  ;;  %v2806_v40 = vpop.f32.mrb[253].mxu0  ;;  %v12112_v43 = vld [vmem:[#allocation200_spill] sm:$0xff] }
 0x318   : > { %v12103_v56 = vpack.c.bf16 %v12101_v46, %v12102_v41  ;;  %v12104_v37 = vpack.c.bf16 %v9295_v59, %v9271_v5  ;;  %v12106_v21 = vld [vmem:[#allocation55_spill] sm:$0xff]  ;;  %v12108_v9 = vld [vmem:[#allocation198_spill] sm:$0xff]  ;;  %v10085_v46 = vmul.f32 %v2806_v40, %v12112_v43  ;;  %v12113_v59 = vld [vmem:[#allocation56_spill] sm:$0xff]  ;;  %v2810_v43 = vpop.f32.mrb[254].mxu0 }
 0x319   : > { %12095 = vst [vmem:[#allocation134_spill] sm:$0xff] %v10058_v61  ;;  %6217 = vmatpush1.bf16.msra.mxu0 %v12099_v4  ;;  %v12107_v17 = vpack.c.bf16 %v12105_v29, %v12106_v21  ;;  %v10079_v18 = vmul.f32 %v2804_v26, %v12108_v9  ;;  %v3091_v4 = vpop.f32.mrb[252].mxu1  ;;  %v12110_v45 = vld [vmem:[#allocation199_spill] sm:$0xff]  ;;  %v12116_v29 = vld [vmem:[#allocation201_spill] sm:$0xff]  ;;  %v12118_v9 = vld [vmem:[#allocation54_spill] sm:$0xff] }
 0x31a   : > { %6289 = vmatpush1.bf16.msra.mxu1 %v12103_v56  ;;  %6219 = vmatprep.subr.bf16.mxu0 %v12104_v37  ;;  %v10082_v11 = vmul.f32 %v3091_v4, %v12110_v45  ;;  %v3093_v41 = vpop.f32.mrb[253].mxu1  ;;  %v12114_v56 = vld [vmem:[#allocation53_spill] sm:$0xff]  ;;  %v12120_v45 = vpack.c.bf16 %v9335_v16, %v9319_v2  ;;  %v12128_v40 = vld [vmem:[#allocation204_spill] sm:$0xff]  ;;  %v12129_v16 = vld [vmem:[#allocation62_spill] sm:$0xff] }
 0x31b   : > { %6291 = vmatprep.subr.bf16.mxu1 %v12107_v17  ;;  %12109 = vst [vmem:[#allocation135_spill] sm:$0xff] %v10079_v18  ;;  %v12115_v37 = vpack.c.bf16 %v12113_v59, %v12114_v56  ;;  %v10093_v21 = vmul.f32 %v3093_v41, %v12116_v29  ;;  %v12117_v17 = vld [vmem:[#allocation57_spill] sm:$0xff]  ;;  %v12121_v41 = vld [vmem:[#allocation64_spill] sm:$0xff]  ;;  %v12124_v29 = vld [vmem:[#allocation202_spill] sm:$0xff] }
 0x31c   : > { %12111 = vst [vmem:[#allocation136_spill] sm:$0xff] %v10082_v11  ;;  %v12119_v4 = vpack.c.bf16 %v12117_v17, %v12118_v9  ;;  %v12122_v56 = vld [vmem:[#allocation61_spill] sm:$0xff]  ;;  %v10111_v26 = vmul.f32 %v2810_v43, %v12124_v29  ;;  %v3097_v17 = vpop.f32.mrb[254].mxu1  ;;  %v2812_v9 = vpop.f32.mrb[255].mxu0 }
 0x31d   : > { %6221 = vmatpush1.bf16.msra.mxu0 %v12115_v37  ;;  %v12123_v37 = vpack.c.bf16 %v12121_v41, %v12122_v56  ;;  %v10117_v61 = vmul.f32 %v2812_v9, %v12128_v40  ;;  %v3099_v2 = vpop.f32.mrb[255].mxu1  ;;  %v12132_v59 = vld [vmem:[#allocation205_spill] sm:$0xff]  ;;  %v12134_v41 = vld [vmem:[#allocation63_spill] sm:$0xff]  ;;  %v12135_v56 = vld [vmem:[#allocation60_spill] sm:$0xff]  ;;  %v2816_v29 = vpop.f32.mrb[0].mxu0 }
 0x31e   : > { %6293 = vmatpush1.bf16.msra.mxu1 %v12119_v4  ;;  %6223 = vmatprep.subr.bf16.mxu0 %v12120_v45  ;;  %12125 = vst [vmem:[#allocation137_spill] sm:$0xff] %v10111_v26  ;;  %v12126_v4 = vld [vmem:[#allocation203_spill] sm:$0xff]  ;;  %v10123_v47 = vmul.f32 %v3099_v2, %v12132_v59  ;;  %v12136_v43 = vpack.c.bf16 %v12134_v41, %v12135_v56 }
 0x31f   : > { %6295 = vmatprep.subr.bf16.mxu1 %v12123_v37  ;;  %v10114_v5 = vmul.f32 %v3097_v17, %v12126_v4  ;;  %v12130_v45 = vld [vmem:[#allocation59_spill] sm:$0xff]  ;;  %v12137_v37 = vpack.c.bf16 %v9375_v25, %v9359_v20  ;;  %v12138_v17 = vld [vmem:[#allocation70_spill] sm:$0xff]  ;;  %v12146_v25 = vld [vmem:[#allocation68_spill] sm:$0xff] }
 0x320   : > { %v12131_v11 = vpack.c.bf16 %v12129_v16, %v12130_v45  ;;  %12133 = vst [vmem:[#allocation139_spill] sm:$0xff] %v10123_v47  ;;  %v12139_v40 = vld [vmem:[#allocation67_spill] sm:$0xff]  ;;  %v12141_v4 = vld [vmem:[#allocation206_spill] sm:$0xff]  ;;  %v2818_v16 = vpop.f32.mrb[1].mxu0  ;;  %v12145_v45 = vld [vmem:[#allocation208_spill] sm:$0xff] }
 0x321   : > { %12127 = vst [vmem:[#allocation138_spill] sm:$0xff] %v10114_v5  ;;  %v12140_v9 = vpack.c.bf16 %v12138_v17, %v12139_v40  ;;  %v10135_v18 = vmul.f32 %v2816_v29, %v12141_v4  ;;  %v12143_v59 = vld [vmem:[#allocation207_spill] sm:$0xff]  ;;  %v10141_v41 = vmul.f32 %v2818_v16, %v12145_v45  ;;  %v12149_v17 = vld [vmem:[#allocation209_spill] sm:$0xff]  ;;  %v12151_v4 = vld [vmem:[#allocation66_spill] sm:$0xff]  ;;  %v2822_v45 = vpop.f32.mrb[2].mxu0 }
 0x322   : > { %6225 = vmatpush1.bf16.msra.mxu0 %v12131_v11  ;;  %6297 = vmatpush1.bf16.msra.mxu1 %v12136_v43  ;;  %v3103_v11 = vpop.f32.mrb[0].mxu1  ;;  %v12147_v43 = vld [vmem:[#allocation65_spill] sm:$0xff]  ;;  %v12161_v16 = vld [vmem:[#allocation212_spill] sm:$0xff] }
 0x323   : > { %6227 = vmatprep.subr.bf16.mxu0 %v12137_v37  ;;  %6299 = vmatprep.subr.bf16.mxu1 %v12140_v9  ;;  %12142 = vst [vmem:[#allocation140_spill] sm:$0xff] %v10135_v18  ;;  %v10138_v2 = vmul.f32 %v3103_v11, %v12143_v59  ;;  %v3105_v56 = vpop.f32.mrb[1].mxu1  ;;  %v12148_v37 = vpack.c.bf16 %v12146_v25, %v12147_v43  ;;  %v12150_v9 = vld [vmem:[#allocation69_spill] sm:$0xff] }
 0x324   : > { %v10149_v40 = vmul.f32 %v3105_v56, %v12149_v17  ;;  %v12152_v11 = vpack.c.bf16 %v12150_v9, %v12151_v4  ;;  %v12153_v59 = vpack.c.bf16 %v9415_v57, %v9399_v62  ;;  %v12154_v56 = vld [vmem:[#allocation76_spill] sm:$0xff]  ;;  %v12155_v43 = vld [vmem:[#allocation73_spill] sm:$0xff]  ;;  %v12157_v17 = vld [vmem:[#allocation210_spill] sm:$0xff]  ;;  %v3109_v9 = vpop.f32.mrb[2].mxu1  ;;  %v2824_v4 = vpop.f32.mrb[3].mxu0 }
 0x325   : > { %12144 = vst [vmem:[#allocation141_spill] sm:$0xff] %v10138_v2  ;;  %v10167_v29 = vmul.f32 %v2822_v45, %v12157_v17  ;;  %v10173_v5 = vmul.f32 %v2824_v4, %v12161_v16  ;;  %v3111_v62 = vpop.f32.mrb[3].mxu1  ;;  %v12163_v57 = vld [vmem:[#allocation74_spill] sm:$0xff]  ;;  %v12166_v25 = vld [vmem:[#allocation213_spill] sm:$0xff]  ;;  %v2828_v4 = vpop.f32.mrb[4].mxu0 }
 0x326   : > { %6229 = vmatpush1.bf16.msra.mxu0 %v12148_v37  ;;  %6301 = vmatpush1.bf16.msra.mxu1 %v12152_v11  ;;  %v12156_v37 = vpack.c.bf16 %v12154_v56, %v12155_v43  ;;  %v12159_v11 = vld [vmem:[#allocation211_spill] sm:$0xff]  ;;  %v10179_v26 = vmul.f32 %v3111_v62, %v12166_v25  ;;  %v12169_v43 = vld [vmem:[#allocation72_spill] sm:$0xff]  ;;  %v12172_v17 = vld [vmem:[#allocation82_spill] sm:$0xff] }
 0x327   : > { %6231 = vmatprep.subr.bf16.mxu0 %v12153_v59  ;;  %12158 = vst [vmem:[#allocation142_spill] sm:$0xff] %v10167_v29  ;;  %v10170_v20 = vmul.f32 %v3109_v9, %v12159_v11  ;;  %12162 = vst [vmem:[#allocation288_spill] sm:$0xff] %v10173_v5  ;;  %v12164_v59 = vld [vmem:[#allocation71_spill] sm:$0xff]  ;;  %v12175_v11 = vld [vmem:[#allocation214_spill] sm:$0xff] }
 0x328   : > { %6303 = vmatprep.subr.bf16.mxu1 %v12156_v37  ;;  %v12165_v2 = vpack.c.bf16 %v12163_v57, %v12164_v59  ;;  %12167 = vst [vmem:[#allocation286_spill] sm:$0xff] %v10179_v26  ;;  %v12168_v56 = vld [vmem:[#allocation75_spill] sm:$0xff]  ;;  %v12171_v37 = vpack.c.bf16 %v9455_v58, %v9439_v6  ;;  %v10191_v18 = vmul.f32 %v2828_v4, %v12175_v11  ;;  %v2830_v57 = vpop.f32.mrb[5].mxu0  ;;  %v12179_v59 = vld [vmem:[#allocation80_spill] sm:$0xff]  ;;  %v12186_v4 = vld [vmem:[#allocation217_spill] sm:$0xff] }
 0x329   : > { %12160 = vst [vmem:[#allocation143_spill] sm:$0xff] %v10170_v20  ;;  %v12170_v45 = vpack.c.bf16 %v12168_v56, %v12169_v43  ;;  %v12173_v9 = vld [vmem:[#allocation79_spill] sm:$0xff]  ;;  %v12180_v56 = vld [vmem:[#allocation77_spill] sm:$0xff] }
 0x32a   : > { %6233 = vmatpush1.bf16.msra.mxu0 %v12165_v2  ;;  %v12174_v16 = vpack.c.bf16 %v12172_v17, %v12173_v9  ;;  %12176 = vst [vmem:[#allocation152_spill] sm:$0xff] %v10191_v18  ;;  %v3115_v2 = vpop.f32.mrb[4].mxu1  ;;  %v12177_v25 = vld [vmem:[#allocation215_spill] sm:$0xff]  ;;  %v12181_v43 = vpack.c.bf16 %v12179_v59, %v12180_v56  ;;  %v12183_v17 = vld [vmem:[#allocation81_spill] sm:$0xff]  ;;  %v12184_v9 = vld [vmem:[#allocation78_spill] sm:$0xff] }
 0x32b   : > { %6305 = vmatpush1.bf16.msra.mxu1 %v12170_v45  ;;  %6235 = vmatprep.subr.bf16.mxu0 %v12171_v37  ;;  %v10194_v62 = vmul.f32 %v3115_v2, %v12177_v25  ;;  %v12182_v45 = vld [vmem:[#allocation216_spill] sm:$0xff]  ;;  %v3117_v58 = vpop.f32.mrb[5].mxu1  ;;  %v12188_v2 = vld [vmem:[#allocation89_spill] sm:$0xff]  ;;  %v12191_v56 = vld [vmem:[#allocation90_spill] sm:$0xff]  ;;  %v2834_v37 = vpop.f32.mrb[6].mxu0 }
 0x32c   : > { %6307 = vmatprep.subr.bf16.mxu1 %v12174_v16  ;;  %v10200_v6 = vmul.f32 %v2830_v57, %v12182_v45  ;;  %v12185_v16 = vpack.c.bf16 %v12183_v17, %v12184_v9  ;;  %v10208_v11 = vmul.f32 %v3117_v58, %v12186_v4  ;;  %v12189_v25 = vld [vmem:[#allocation85_spill] sm:$0xff]  ;;  %v12194_v58 = vld [vmem:[#allocation218_spill] sm:$0xff]  ;;  %v2836_v4 = vpop.f32.mrb[7].mxu0  ;;  %v12197_v59 = vld [vmem:[#allocation83_spill] sm:$0xff] }
 0x32d   : > { %12178 = vst [vmem:[#allocation289_spill] sm:$0xff] %v10194_v62  ;;  %v12190_v47 = vpack.c.bf16 %v12188_v2, %v12189_v25  ;;  %v10223_v9 = vmul.f32 %v2834_v37, %v12194_v58  ;;  %v12196_v25 = vld [vmem:[#allocation87_spill] sm:$0xff]  ;;  %v12199_v57 = vld [vmem:[#allocation220_spill] sm:$0xff]  ;;  %v12203_v17 = vld [vmem:[#allocation221_spill] sm:$0xff] }
 0x32e   : > { %6237 = vmatpush1.bf16.msra.mxu0 %v12181_v43  ;;  %12187 = vst [vmem:[#allocation287_spill] sm:$0xff] %v10208_v11  ;;  %v12192_v43 = vld [vmem:[#allocation86_spill] sm:$0xff]  ;;  %v12198_v20 = vpack.c.bf16 %v12196_v25, %v12197_v59  ;;  %v10232_v62 = vmul.f32 %v2836_v4, %v12199_v57  ;;  %v12201_v37 = vld [vmem:[#allocation84_spill] sm:$0xff]  ;;  %v2840_v4 = vpop.f32.mrb[8].mxu0 }
 0x32f   : > { %6309 = vmatpush1.bf16.msra.mxu1 %v12185_v16  ;;  %6239 = vmatprep.subr.bf16.mxu0 %v12190_v47  ;;  %v12193_v45 = vpack.c.bf16 %v12191_v56, %v12192_v43  ;;  %v3121_v16 = vpop.f32.mrb[6].mxu1  ;;  %v12195_v47 = vld [vmem:[#allocation219_spill] sm:$0xff]  ;;  %v3971_v43 = vld [vmem:[%s10903_s1 + $0x60] sm:$0xff] }
 0x330   : > { %v10226_v2 = vmul.f32 %v3121_v16, %v12195_v47  ;;  %v3123_v56 = vpop.f32.mrb[7].mxu1  ;;  %v12204_v16 = vld [vmem:[#allocation97_spill] sm:$0xff]  ;;  %v12208_v59 = vld [vmem:[#allocation94_spill] sm:$0xff] }
 0x331   : > { %6311 = vmatprep.subr.bf16.mxu1 %v12193_v45  ;;  %v12200_v45 = vld [vmem:[#allocation88_spill] sm:$0xff]  ;;  %v10241_v29 = vmul.f32 %v3123_v56, %v12203_v17  ;;  %v12205_v47 = vld [vmem:[#allocation93_spill] sm:$0xff]  ;;  %v3127_v17 = vpop.f32.mrb[8].mxu1  ;;  %v12211_v56 = vld [vmem:[#allocation95_spill] sm:$0xff] }
 0x332   : > { %6241 = vmatpush1.bf16.msra.mxu0 %v12198_v20  ;;  %v12202_v58 = vpack.c.bf16 %v12200_v45, %v12201_v37  ;;  %v12206_v18 = vpack.c.bf16 %v12204_v16, %v12205_v47  ;;  %v12207_v20 = vld [vmem:[#allocation98_spill] sm:$0xff]  ;;  %v3974_v16 = vld [vmem:[%s10903_s1 + $0x78] sm:$0xff]  ;;  %v12214_v47 = vld [vmem:[#allocation223_spill] sm:$0xff] }
 0x333   : > { %v12209_v57 = vpack.c.bf16 %v12207_v20, %v12208_v59  ;;  %v3975_v25 = vld [vmem:[%s10903_s1 + $0x80] sm:$0xff]  ;;  %v10262_v20 = vmul.f32 %v3127_v17, %v12214_v47  ;;  %v12215_v59 = vld [vmem:[#allocation96_spill] sm:$0xff]  ;;  %v12221_v17 = vpack.c.bf16 %v9601_v54, %v9579_v27 }
 0x334   : > { %6313 = vmatpush1.bf16.msra.mxu1 %v12202_v58  ;;  %6243 = vmatprep.subr.bf16.mxu0 %v12206_v18  ;;  %v12210_v45 = vld [vmem:[#allocation222_spill] sm:$0xff]  ;;  %v12212_v58 = vld [vmem:[#allocation91_spill] sm:$0xff]  ;;  %v2842_v18 = vpop.f32.mrb[9].mxu0 }
 0x335   : > { %6315 = vmatprep.subr.bf16.mxu1 %v12209_v57  ;;  %4220 = vmatmul.mubr.f32.vlgmr.msra.gmra.mrb[40].mxu0 %v3971_v43  ;;  %v10253_v37 = vmul.f32 %v2840_v4, %v12210_v45  ;;  %v12213_v26 = vpack.c.bf16 %v12211_v56, %v12212_v58  ;;  %v12216_v57 = vld [vmem:[#allocation92_spill] sm:$0xff]  ;;  %v3129_v45 = vpop.f32.mrb[9].mxu1  ;;  %v12219_v56 = vpack.c.bf16 %v9594_v55, %v9572_v60  ;;  %v12220_v58 = vld [vmem:[#allocation225_spill] sm:$0xff]  ;;  %v2846_v60 = vpop.f32.mrb[10].mxu0  ;;  %v12222_v54 = vld [vmem:[#allocation226_spill] sm:$0xff] }
 0x336   : > { %v12217_v11 = vpack.c.bf16 %v12215_v59, %v12216_v57  ;;  %v10276_v5 = vmul.f32 %v3129_v45, %v12220_v58  ;;  %4225 = vmatprep.mubr.f32.mxu0 %v3975_v25  ;;  %v3978_v55 = vld [vmem:[%s10903_s1 + $0x98] sm:$0xff]  ;;  %v10291_v27 = vmul.f32 %v2846_v60, %v12222_v54  ;;  %v3133_v59 = vpop.f32.mrb[10].mxu1  ;;  %v12223_v57 = vpack.c.bf16 %v9583_v39, %v9559_v8  ;;  %v12224_v45 = vld [vmem:[#allocation227_spill] sm:$0xff] }
 0x337   : > { %4398 = vmatmul.mubr.f32.vlgmr.msra.gmra.mrb[40].mxu1 %v3971_v43  ;;  %6245 = vmatpush1.bf16.msra.mxu0 %v12213_v26  ;;  %v12218_v43 = vld [vmem:[#allocation224_spill] sm:$0xff]  ;;  %v12225_v58 = vld [vmem:[#allocation99_spill] sm:$0xff]  ;;  %v3135_v54 = vpop.f32.mrb[11].mxu1  ;;  %v12229_v8 = vld [vmem:[#allocation229_spill] sm:$0xff] }
 0x338   : > { %6317 = vmatpush1.bf16.msra.mxu1 %v12217_v11  ;;  %v10268_v4 = vmul.f32 %v2842_v18, %v12218_v43  ;;  %6247 = vmatprep.subr.bf16.mxu0 %v12219_v56  ;;  %v2848_v43 = vpop.f32.mrb[11].mxu0  ;;  %v10300_v56 = vmul.f32 %v3133_v59, %v12224_v45  ;;  %v12228_v11 = vld [vmem:[#allocation102_spill] sm:$0xff]  ;;  %v10311_v39 = vmul.f32 %v3135_v54, %v12229_v8  ;;  %v12234_v8 = vld [vmem:[#allocation101_spill] sm:$0xff] }
 0x339   : > { %6319 = vmatprep.subr.bf16.mxu1 %v12221_v17  ;;  %4403 = vmatprep.mubr.f32.mxu1 %v3975_v25  ;;  %v3977_v25 = vld [vmem:[%s10903_s1 + $0x90] sm:$0xff]  ;;  %v12226_v17 = vpack.c.bf16 %v9590_v12, %v12225_v58  ;;  %v2852_v59 = vpop.f32.mrb[12].mxu0  ;;  %v3139_v58 = vpop.f32.mrb[12].mxu1  ;;  %v12237_v26 = vld [vmem:[#allocation233_spill] sm:$0xff] }
 0x33a   : > { %4226 = vmatmul.mubr.f32.gmra.mrb[42].mxu0 %v3974_v16  ;;  %v3981_v12 = vld [vmem:[%s10903_s1 + $0xb0] sm:$0xff] }
 0x33b   : > { %4404 = vmatmul.mubr.f32.gmra.mrb[42].mxu1 %v3974_v16  ;;  %6249 = vmatpush1.bf16.msra.mxu0 %v12223_v57  ;;  %v12227_v16 = vld [vmem:[#allocation228_spill] sm:$0xff]  ;;  %v12230_v57 = vld [vmem:[#allocation103_spill] sm:$0xff] }
 0x33c   : > { %6321 = vmatpush1.bf16.msra.mxu1 %v12226_v17  ;;  %v10306_v60 = vmul.f32 %v2848_v43, %v12227_v16  ;;  %5949 = vmatprep.subr.msk.mxu0 %vm778_vm0, %v12228_v11  ;;  %v12231_v43 = vld [vmem:[#allocation230_spill] sm:$0xff]  ;;  %v12232_v11 = vld [vmem:[#allocation100_spill] sm:$0xff]  ;;  %v2854_v17 = vpop.f32.mrb[13].mxu0 }
 0x33d   : > { %5955 = vmatprep.subr.msk.mxu1 %vm778_vm0, %v12230_v57  ;;  %4231 = vmatprep.mubr.f32.mxu0 %v3978_v55  ;;  %v10319_v45 = vmul.f32 %v2852_v59, %v12231_v43  ;;  %v3980_v16 = vld [vmem:[%s10903_s1 + $0xa8] sm:$0xff]  ;;  %v12235_v57 = vld [vmem:[#allocation232_spill] sm:$0xff]  ;;  %v3141_v59 = vpop.f32.mrb[13].mxu1  ;;  %v12236_v43 = vpack.c.bf16 %v9677_v34, %v9644_v53  ;;  %v2858_v53 = vpop.f32.mrb[14].mxu0 }
 0x33e   : > { %4409 = vmatprep.mubr.f32.mxu1 %v3978_v55  ;;  %4232 = vmatmul.mubr.f32.gmra.mrb[44].mxu0 %v3977_v25  ;;  %v12233_v55 = vld [vmem:[#allocation231_spill] sm:$0xff]  ;;  %v10340_v47 = vmul.f32 %v3141_v59, %v12237_v26  ;;  %v12239_v26 = vld [vmem:[#allocation234_spill] sm:$0xff] }
 0x33f   : > { %4410 = vmatmul.mubr.f32.gmra.mrb[44].mxu1 %v3977_v25  ;;  %5950 = vmatpush1.msk.msra.mxu0 %vm778_vm0, %v12232_v11  ;;  %v10327_v54 = vmul.f32 %v3139_v58, %v12233_v55  ;;  %v10332_v25 = vmul.f32 %v2854_v17, %v12235_v57  ;;  %v12238_v58 = vpack.c.bf16 %v9684_v49, %v9652_v38  ;;  %v3145_v57 = vpop.f32.mrb[14].mxu1  ;;  %v2860_v38 = vpop.f32.mrb[15].mxu0  ;;  %v3973_v49 = vld [vmem:[%s10903_s1 + $0x70] sm:$0xff]  ;;  %v3976_v34 = vld [vmem:[%s10903_s1 + $0x88] sm:$0xff] }
 0x340   : > { %5956 = vmatpush1.msk.msra.mxu1 %vm778_vm0, %v12234_v8  ;;  %6323 = vmatprep.subr.bf16.mxu0 %v12236_v43  ;;  %v10352_v8 = vmul.f32 %v2858_v53, %v12239_v26  ;;  %v12240_v59 = vld [vmem:[#allocation235_spill] sm:$0xff]  ;;  %v3147_v17 = vpop.f32.mrb[15].mxu1  ;;  %v2864_v26 = vpop.f32.mrb[16].mxu0  ;;  %v12243_v11 = vpack.c.bf16 %v9667_v13, %v9636_v50  ;;  %v12247_v50 = vpack.c.bf16 %v9734_v19, %v9715_v30  ;;  %v12248_v13 = vld [vmem:[#allocation240_spill] sm:$0xff] }
 0x341   : > { %6395 = vmatprep.subr.bf16.mxu1 %v12238_v58  ;;  %4237 = vmatprep.mubr.f32.mxu0 %v3981_v12  ;;  %v10359_v43 = vmul.f32 %v3145_v57, %v12240_v59  ;;  %v12244_v57 = vld [vmem:[#allocation238_spill] sm:$0xff] }
 0x342   : > { %4415 = vmatprep.mubr.f32.mxu1 %v3981_v12  ;;  %4238 = vmatmul.mubr.f32.gmra.mrb[46].mxu0 %v3980_v16  ;;  %v12241_v12 = vld [vmem:[#allocation236_spill] sm:$0xff]  ;;  %v10374_v59 = vmul.f32 %v2864_v26, %v12244_v57  ;;  %v12249_v57 = vpack.c.bf16 %v9740_v63, %v9719_v22  ;;  %v12251_v63 = vpack.c.bf16 %v9727_v52, %v9707_v33 }
 0x343   : > { %4416 = vmatmul.mubr.f32.gmra.mrb[46].mxu1 %v3980_v16  ;;  %4308 = vmatprep.mubr.f32.mxu0 %v11328_v24  ;;  %v10362_v58 = vmul.f32 %v2860_v38, %v12241_v12  ;;  %v12242_v16 = vld [vmem:[#allocation237_spill] sm:$0xff]  ;;  %v3151_v38 = vpop.f32.mrb[16].mxu1  ;;  %v2866_v12 = vpop.f32.mrb[17].mxu0  ;;  %v12255_v33 = vpack.c.bf16 %v9780_v3, %v9761_v23  ;;  %v12256_v52 = vld [vmem:[#allocation244_spill] sm:$0xff]  ;;  %v12260_v23 = vld [vmem:[#allocation246_spill] sm:$0xff] }
 0x344   : > { %4486 = vmatprep.mubr.f32.mxu1 %v11328_v24  ;;  %v10366_v53 = vmul.f32 %v3147_v17, %v12242_v16  ;;  %v12245_v17 = vpack.c.bf16 %v9671_v36, %v9640_v1  ;;  %v12246_v16 = vld [vmem:[#allocation239_spill] sm:$0xff]  ;;  %v12250_v1 = vld [vmem:[#allocation241_spill] sm:$0xff] }
 0x345   : > { %v10383_v55 = vmul.f32 %v3151_v38, %v12246_v16  ;;  %v2870_v38 = vpop.f32.mrb[18].mxu0 }
 0x346   : > { %5951 = vmatmul.mubr.msk.f32.vlgmr.msra.gmra.mrb[40].mxu0 %vm3386_vm3, %v3973_v49 }
 0x347   : > { %5957 = vmatmul.mubr.msk.f32.vlgmr.msra.gmra.mrb[40].mxu1 %vm3386_vm3, %v3973_v49  ;;  %6325 = vmatpush1.bf16.msra.mxu0 %v12243_v11  ;;  %v10389_v11 = vmul.f32 %v2866_v12, %v12248_v13  ;;  %v3153_v49 = vpop.f32.mrb[17].mxu1  ;;  %v12252_v12 = vld [vmem:[#allocation242_spill] sm:$0xff] }
 0x348   : > { %6397 = vmatpush1.bf16.msra.mxu1 %v12245_v17  ;;  %6327 = vmatprep.subr.bf16.mxu0 %v12247_v50  ;;  %v10397_v36 = vmul.f32 %v3153_v49, %v12250_v1  ;;  %v10412_v17 = vmul.f32 %v2870_v38, %v12252_v12  ;;  %v3157_v16 = vpop.f32.mrb[18].mxu1  ;;  %v2872_v50 = vpop.f32.mrb[19].mxu0  ;;  %v3979_v13 = vld [vmem:[%s10903_s1 + $0xa0] sm:$0xff]  ;;  %v12253_v49 = vpack.c.bf16 %v9730_v31, %v9711_v42 }
 0x349   : > { %6399 = vmatprep.subr.bf16.mxu1 %v12249_v57  ;;  %4314 = vmatprep.mubr.f32.mxu0 %v11328_v24  ;;  %v12254_v57 = vld [vmem:[#allocation243_spill] sm:$0xff]  ;;  %v10428_v38 = vmul.f32 %v2872_v50, %v12256_v52  ;;  %v12258_v12 = vld [vmem:[#allocation245_spill] sm:$0xff]  ;;  %v2876_v42 = vpop.f32.mrb[20].mxu0  ;;  %v12259_v31 = vpack.c.bf16 %v9773_v35, %v9754_v15  ;;  %v12261_v50 = vld [vmem:[#allocation104_spill] sm:$0xff] }
 0x34a   : > { %4492 = vmatprep.mubr.f32.mxu1 %v11328_v24  ;;  %5952 = vmatmul.mubr.msk.f32.gmra.mrb[42].mxu0 %vm3386_vm3, %v3976_v34  ;;  %v10422_v1 = vmul.f32 %v3157_v16, %v12254_v57  ;;  %v10443_v3 = vmul.f32 %v2876_v42, %v12260_v23  ;;  %v12263_v57 = vld [vmem:[#allocation247_spill] sm:$0xff]  ;;  %v12268_v42 = vld [vmem:[#allocation112_spill] sm:$0xff] }
 0x34b   : > { %6329 = vmatpush1.bf16.msra.mxu0 %v12251_v63  ;;  %5958 = vmatmul.mubr.msk.f32.gmra.mrb[42].mxu1 %vm3386_vm3, %v3976_v34  ;;  %v3159_v63 = vpop.f32.mrb[19].mxu1  ;;  %v12257_v34 = vpack.c.bf16 %v9789_v14, %v9765_v7  ;;  %v2878_v7 = vpop.f32.mrb[21].mxu0  ;;  %v3982_v14 = vld [vmem:[%s10903_s1 + $0xb8] sm:$0xff]  ;;  %v12264_v15 = vld [vmem:[#allocation111_spill] sm:$0xff] }
 0x34c   : > { %6401 = vmatpush1.bf16.msra.mxu1 %v12253_v49  ;;  %6331 = vmatprep.subr.bf16.mxu0 %v12255_v33  ;;  %v10434_v30 = vmul.f32 %v3159_v63, %v12258_v12  ;;  %v3163_v16 = vpop.f32.mrb[20].mxu1  ;;  %v12262_v49 = vpack.c.bf16 %v9776_v32, %v12261_v50  ;;  %v12265_v35 = vld [vmem:[#allocation107_spill] sm:$0xff]  ;;  %v12267_v63 = vld [vmem:[#allocation248_spill] sm:$0xff]  ;;  %v12271_v32 = vld [vmem:[#allocation249_spill] sm:$0xff] }
 0x34d   : > { %6403 = vmatprep.subr.bf16.mxu1 %v12257_v34  ;;  %4320 = vmatprep.mubr.f32.mxu0 %v11328_v24  ;;  %v10453_v33 = vmul.f32 %v3163_v16, %v12263_v57  ;;  %v12266_v52 = vpack.c.bf16 %v12264_v15, %v12265_v35  ;;  %v10459_v34 = vmul.f32 %v2878_v7, %v12267_v63  ;;  %v3165_v12 = vpop.f32.mrb[21].mxu1  ;;  %v4528_v57 = vld [vmem:[%s10903_s1 + $0xc8] sm:$0xff]  ;;  %v12272_v35 = vld [vmem:[#allocation109_spill] sm:$0xff] }
 0x34e   : > { %4498 = vmatprep.mubr.f32.mxu1 %v11328_v24  ;;  %5953 = vmatmul.mubr.msk.f32.gmra.mrb[44].mxu0 %vm3386_vm3, %v3979_v13  ;;  %v10467_v50 = vmul.f32 %v3165_v12, %v12271_v32  ;;  %v12275_v12 = vld [vmem:[#allocation250_spill] sm:$0xff]  ;;  %v12280_v7 = vld [vmem:[#allocation251_spill] sm:$0xff] }
 0x34f   : > { %6333 = vmatpush1.bf16.msra.mxu0 %v12259_v31  ;;  %5959 = vmatmul.mubr.msk.f32.gmra.mrb[44].mxu1 %vm3386_vm3, %v3979_v13  ;;  %v12269_v31 = vld [vmem:[#allocation108_spill] sm:$0xff]  ;;  %v12277_v32 = vld [vmem:[#allocation110_spill] sm:$0xff]  ;;  %v12282_v15 = vld [vmem:[#allocation115_spill] sm:$0xff] }
 0x350   : > { %6405 = vmatpush1.bf16.msra.mxu1 %v12262_v49  ;;  %6335 = vmatprep.subr.bf16.mxu0 %v12266_v52  ;;  %v12270_v23 = vpack.c.bf16 %v12268_v42, %v12269_v31  ;;  %v2882_v49 = vpop.f32.mrb[22].mxu0  ;;  %v12273_v52 = vld [vmem:[#allocation105_spill] sm:$0xff]  ;;  %v3169_v31 = vpop.f32.mrb[22].mxu1  ;;  %v12278_v16 = vld [vmem:[#allocation106_spill] sm:$0xff]  ;;  %v12283_v22 = vpack.c.bf16 %v9917_v10, %v12282_v15 }
 0x351   : > { %4326 = vmatprep.mubr.f32.mxu0 %v11328_v24  ;;  %4504 = vmatprep.mubr.f32.mxu1 %v11328_v24  ;;  %v12274_v63 = vpack.c.bf16 %v12272_v35, %v12273_v52  ;;  %v10485_v42 = vmul.f32 %v2882_v49, %v12275_v12  ;;  %v12279_v13 = vpack.c.bf16 %v12277_v32, %v12278_v16  ;;  %v12284_v35 = vld [vmem:[#allocation252_spill] sm:$0xff]  ;;  %v3171_v49 = vpop.f32.mrb[23].mxu1  ;;  %v12290_v16 = vld [vmem:[#allocation117_spill] sm:$0xff]  ;;  %v12293_v10 = vld [vmem:[#allocation254_spill] sm:$0xff] }
 0x352   : > { %6407 = vmatprep.subr.bf16.mxu1 %v12270_v23  ;;  %5954 = vmatmul.mubr.msk.f32.gmra.mrb[46].mxu0 %vm3386_vm3, %v3982_v14  ;;  %v2884_v23 = vpop.f32.mrb[23].mxu0  ;;  %v10492_v26 = vmul.f32 %v3169_v31, %v12280_v7  ;;  %v12286_v12 = vld [vmem:[#allocation116_spill] sm:$0xff]  ;;  %v12291_v7 = vld [vmem:[#allocation113_spill] sm:$0xff]  ;;  %v3175_v15 = vpop.f32.mrb[24].mxu1  ;;  %v12295_v32 = vld [vmem:[#allocation118_spill] sm:$0xff] }
 0x353   : > { %6337 = vmatpush1.bf16.msra.mxu0 %v12274_v63  ;;  %12276 = vst [vmem:[#allocation296_spill] sm:$0xff] %v10485_v42  ;;  %5960 = vmatmul.mubr.msk.f32.gmra.mrb[46].mxu1 %vm3386_vm3, %v3982_v14  ;;  %v10498_v52 = vmul.f32 %v2884_v23, %v12284_v35  ;;  %v12285_v63 = vld [vmem:[#allocation119_spill] sm:$0xff]  ;;  %v12288_v14 = vld [vmem:[#allocation253_spill] sm:$0xff]  ;;  %v12292_v31 = vpack.c.bf16 %v12290_v16, %v12291_v7  ;;  %v12296_v35 = vld [vmem:[#allocation114_spill] sm:$0xff]  ;;  %v3177_v16 = vpop.f32.mrb[25].mxu1 }
 0x354   : > { %6409 = vmatpush1.bf16.msra.mxu1 %v12279_v13  ;;  %12281 = vst [vmem:[#allocation292_spill] sm:$0xff] %v10492_v26  ;;  %6339 = vmatprep.subr.bf16.mxu0 %v12283_v22  ;;  %v12287_v19 = vpack.c.bf16 %v12285_v63, %v12286_v12  ;;  %v10504_v18 = vmul.f32 %v3171_v49, %v12288_v14  ;;  %v2888_v13 = vpop.f32.mrb[24].mxu0  ;;  %v12300_v49 = vld [vmem:[#allocation122_spill] sm:$0xff] }
 0x355   : > { %4775 = vmatprep.mubr.f32.mxu0 %v4528_v57  ;;  %4953 = vmatprep.mubr.f32.mxu1 %v4528_v57  ;;  %v10510_v22 = vmul.f32 %v2888_v13, %v12293_v10  ;;  %v2890_v23 = vpop.f32.mrb[25].mxu0  ;;  %v12297_v24 = vpack.c.bf16 %v12295_v32, %v12296_v35  ;;  %v12301_v12 = vpack.c.bf16 %v9973_v28, %v12300_v49  ;;  %v12302_v57 = vld [vmem:[#allocation256_spill] sm:$0xff]  ;;  %v12303_v7 = vld [vmem:[#allocation126_spill] sm:$0xff]  ;;  %v12306_v32 = vld [vmem:[#allocation257_spill] sm:$0xff] }
 0x356   : > { %6411 = vmatprep.subr.bf16.mxu1 %v12287_v19  ;;  %12289 = vst [vmem:[#allocation297_spill] sm:$0xff] %v10504_v18  ;;  %v12298_v19 = vld [vmem:[#allocation255_spill] sm:$0xff]  ;;  %v10522_v14 = vmul.f32 %v2890_v23, %v12302_v57  ;;  %v2894_v35 = vpop.f32.mrb[26].mxu0  ;;  %v12308_v49 = vld [vmem:[#allocation120_spill] sm:$0xff]  ;;  %v12310_v57 = vld [vmem:[#allocation258_spill] sm:$0xff]  ;;  %v12316_v28 = vpack.c.bf16 %v10029_v51, %v10005_v48 }
 0x357   : > { %6341 = vmatpush1.bf16.msra.mxu0 %v12292_v31  ;;  %12294 = vst [vmem:[#allocation293_spill] sm:$0xff] %v10510_v22  ;;  %v10516_v63 = vmul.f32 %v3175_v15, %v12298_v19  ;;  %v12304_v31 = vld [vmem:[#allocation123_spill] sm:$0xff]  ;;  %v12307_v19 = vld [vmem:[#allocation124_spill] sm:$0xff] }
 0x358   : > { %6413 = vmatpush1.bf16.msra.mxu1 %v12297_v24  ;;  %6343 = vmatprep.subr.bf16.mxu0 %v12301_v12  ;;  %v12305_v10 = vpack.c.bf16 %v12303_v7, %v12304_v31  ;;  %v10530_v24 = vmul.f32 %v3177_v16, %v12306_v32  ;;  %v12309_v12 = vpack.c.bf16 %v12307_v19, %v12308_v49  ;;  %v3181_v31 = vpop.f32.mrb[26].mxu1  ;;  %v2896_v16 = vpop.f32.mrb[27].mxu0  ;;  %v12312_v32 = vld [vmem:[#allocation121_spill] sm:$0xff]  ;;  %v12314_v15 = vld [vmem:[#allocation259_spill] sm:$0xff]  ;;  %v12317_v23 = vld [vmem:[#allocation260_spill] sm:$0xff] }
 0x359   : > { %12299 = vst [vmem:[#allocation154_spill] sm:$0xff] %v10516_v63  ;;  %v10542_v7 = vmul.f32 %v2894_v35, %v12310_v57  ;;  %v10548_v26 = vmul.f32 %v3181_v31, %v12314_v15  ;;  %v10554_v63 = vmul.f32 %v2896_v16, %v12317_v23  ;;  %v3183_v19 = vpop.f32.mrb[27].mxu1  ;;  %v12318_v49 = vld [vmem:[#allocation132_spill] sm:$0xff]  ;;  %v12319_v35 = vld [vmem:[#allocation129_spill] sm:$0xff]  ;;  %v12325_v31 = vld [vmem:[#allocation262_spill] sm:$0xff] }
 0x35a   : > { %6415 = vmatprep.subr.bf16.mxu1 %v12305_v10  ;;  %v12311_v10 = vld [vmem:[#allocation125_spill] sm:$0xff]  ;;  %v3187_v48 = vpop.f32.mrb[28].mxu1  ;;  %v12327_v23 = vld [vmem:[#allocation128_spill] sm:$0xff]  ;;  %v12329_v18 = vld [vmem:[#allocation263_spill] sm:$0xff] }
 0x35b   : > { %6345 = vmatpush1.bf16.msra.mxu0 %v12309_v12  ;;  %v12313_v13 = vpack.c.bf16 %v12311_v10, %v12312_v32  ;;  %12315 = vst [vmem:[#allocation155_spill] sm:$0xff] %v10548_v26  ;;  %v12320_v12 = vpack.c.bf16 %v12318_v49, %v12319_v35  ;;  %v12321_v57 = vld [vmem:[#allocation261_spill] sm:$0xff]  ;;  %v2900_v10 = vpop.f32.mrb[28].mxu0  ;;  %v12323_v32 = vld [vmem:[#allocation127_spill] sm:$0xff]  ;;  %v10572_v49 = vmul.f32 %v3187_v48, %v12329_v18  ;;  %v12331_v35 = vld [vmem:[#allocation264_spill] sm:$0xff] }
 0x35c   : > { %6347 = vmatprep.subr.bf16.mxu0 %v12316_v28  ;;  %v10560_v42 = vmul.f32 %v3183_v19, %v12321_v57  ;;  %v10566_v22 = vmul.f32 %v2900_v10, %v12325_v31  ;;  %v2902_v51 = vpop.f32.mrb[29].mxu0  ;;  %v12326_v28 = vld [vmem:[#allocation131_spill] sm:$0xff]  ;;  %v12330_v19 = vpack.c.bf16 %v10085_v46, %v10061_v44  ;;  %v3189_v57 = vpop.f32.mrb[29].mxu1  ;;  %v12343_v18 = vpack.c.bf16 %v10141_v41, %v10117_v61  ;;  %v12344_v10 = vld [vmem:[#allocation268_spill] sm:$0xff] }
 0x35d   : > { %6417 = vmatpush1.bf16.msra.mxu1 %v12313_v13  ;;  %v12322_v13 = vld [vmem:[#allocation130_spill] sm:$0xff]  ;;  %v12328_v16 = vpack.c.bf16 %v12326_v28, %v12327_v23  ;;  %v2906_v46 = vpop.f32.mrb[30].mxu0  ;;  %v12334_v48 = vld [vmem:[#allocation135_spill] sm:$0xff] }
 0x35e   : > { %6419 = vmatprep.subr.bf16.mxu1 %v12320_v12  ;;  %v12324_v15 = vpack.c.bf16 %v12322_v13, %v12323_v32  ;;  %v10578_v12 = vmul.f32 %v2902_v51, %v12331_v35  ;;  %v12332_v13 = vpack.c.bf16 %v10093_v21, %v10067_v0  ;;  %v12333_v32 = vld [vmem:[#allocation265_spill] sm:$0xff]  ;;  %v12337_v23 = vld [vmem:[#allocation266_spill] sm:$0xff]  ;;  %v3193_v21 = vpop.f32.mrb[30].mxu1  ;;  %v12355_v26 = vld [vmem:[#allocation271_spill] sm:$0xff] }
 0x35f   : > { %v12335_v51 = vld [vmem:[#allocation133_spill] sm:$0xff]  ;;  %v10598_v0 = vmul.f32 %v2906_v46, %v12337_v23  ;;  %v12339_v35 = vld [vmem:[#allocation134_spill] sm:$0xff]  ;;  %v12345_v46 = vld [vmem:[#allocation139_spill] sm:$0xff] }
 0x360   : > { %6349 = vmatpush1.bf16.msra.mxu0 %v12324_v15  ;;  %v10586_v15 = vmul.f32 %v3189_v57, %v12333_v32  ;;  %v12336_v28 = vpack.c.bf16 %v12334_v48, %v12335_v51  ;;  %v3195_v48 = vpop.f32.mrb[31].mxu1  ;;  %v12346_v51 = vpack.c.bf16 %v10149_v40, %v12345_v46 }
 0x361   : > { %6421 = vmatpush1.bf16.msra.mxu1 %v12328_v16  ;;  %6351 = vmatprep.subr.bf16.mxu0 %v12330_v19  ;;  %v2908_v16 = vpop.f32.mrb[31].mxu0  ;;  %v12338_v19 = vld [vmem:[#allocation136_spill] sm:$0xff]  ;;  %v3199_v61 = vpop.f32.mrb[32].mxu1 }
 0x362   : > { %6423 = vmatprep.subr.bf16.mxu1 %v12332_v13  ;;  %v12340_v57 = vpack.c.bf16 %v12338_v19, %v12339_v35  ;;  %v12341_v13 = vld [vmem:[#allocation267_spill] sm:$0xff]  ;;  %v10610_v31 = vmul.f32 %v2908_v16, %v12344_v10  ;;  %v2912_v19 = vpop.f32.mrb[32].mxu0  ;;  %v12348_v35 = vld [vmem:[#allocation140_spill] sm:$0xff]  ;;  %v12352_v10 = vld [vmem:[#allocation141_spill] sm:$0xff]  ;;  %v10628_v40 = vmul.f32 %v3199_v61, %v12355_v26 }
 0x363   : > { %v10604_v32 = vmul.f32 %v3193_v21, %v12341_v13  ;;  %v12351_v13 = vld [vmem:[#allocation270_spill] sm:$0xff]  ;;  %v2914_v41 = vpop.f32.mrb[33].mxu0  ;;  %v12370_v26 = vld [vmem:[#allocation275_spill] sm:$0xff] }
 0x364   : > { %6353 = vmatpush1.bf16.msra.mxu0 %v12336_v28  ;;  %v12347_v28 = vld [vmem:[#allocation269_spill] sm:$0xff]  ;;  %v10622_v44 = vmul.f32 %v2912_v19, %v12351_v13  ;;  %v2918_v61 = vpop.f32.mrb[34].mxu0 }
 0x365   : > { %6425 = vmatpush1.bf16.msra.mxu1 %v12340_v57  ;;  %12342 = vst [vmem:[#allocation156_spill] sm:$0xff] %v10604_v32  ;;  %6355 = vmatprep.subr.bf16.mxu0 %v12343_v18  ;;  %v10616_v23 = vmul.f32 %v3195_v48, %v12347_v28  ;;  %v12349_v57 = vld [vmem:[#allocation137_spill] sm:$0xff]  ;;  %v12353_v18 = vld [vmem:[#allocation138_spill] sm:$0xff]  ;;  %v12356_v48 = vld [vmem:[#allocation288_spill] sm:$0xff] }
 0x366   : > { %6427 = vmatprep.subr.bf16.mxu1 %v12346_v51  ;;  %v12350_v21 = vpack.c.bf16 %v12348_v35, %v12349_v57  ;;  %v12354_v16 = vpack.c.bf16 %v12352_v10, %v12353_v18  ;;  %v12357_v46 = vpack.c.bf16 %v10200_v6, %v12356_v48  ;;  %v12358_v51 = vld [vmem:[#allocation272_spill] sm:$0xff]  ;;  %v3201_v35 = vpop.f32.mrb[33].mxu1  ;;  %v12359_v57 = vld [vmem:[#allocation287_spill] sm:$0xff]  ;;  %v12362_v10 = vld [vmem:[#allocation273_spill] sm:$0xff] }
 0x367   : > { %v10634_v28 = vmul.f32 %v2914_v41, %v12358_v51  ;;  %v4674_v18 = vmul.f32 %v3201_v35, %v12362_v10  ;;  %v12364_v48 = vld [vmem:[#allocation142_spill] sm:$0xff]  ;;  %v12368_v35 = vld [vmem:[#allocation143_spill] sm:$0xff] }
 0x368   : > { %6357 = vmatpush1.bf16.msra.mxu0 %v12350_v21  ;;  %v12360_v21 = vld [vmem:[#allocation286_spill] sm:$0xff] }
 0x369   : > { %6429 = vmatpush1.bf16.msra.mxu1 %v12354_v16  ;;  %6359 = vmatprep.subr.bf16.mxu0 %v12357_v46  ;;  %v12361_v13 = vpack.c.bf16 %v12359_v57, %v12360_v21  ;;  %v6386_v6 = vpack.c.bf16 %v10634_v28, %v10610_v31  ;;  %v6458_v41 = vpack.c.bf16 %v4674_v18, %v10616_v23  ;;  %v12363_v16 = vld [vmem:[#allocation152_spill] sm:$0xff]  ;;  %v12366_v51 = vld [vmem:[#allocation274_spill] sm:$0xff]  ;;  %v3205_v57 = vpop.f32.mrb[34].mxu1  ;;  %v2920_v21 = vpop.f32.mrb[35].mxu0 }
 0x36a   : > { %v12365_v46 = vpack.c.bf16 %v12363_v16, %v12364_v48  ;;  %v10651_v19 = vmul.f32 %v2918_v61, %v12366_v51  ;;  %v10657_v32 = vmul.f32 %v3205_v57, %v12370_v26  ;;  %v12371_v31 = vpack.c.bf16 %v10268_v4, %v10232_v62  ;;  %v12372_v23 = vld [vmem:[#allocation276_spill] sm:$0xff]  ;;  %v3207_v18 = vpop.f32.mrb[35].mxu1  ;;  %v12374_v16 = vld [vmem:[#allocation277_spill] sm:$0xff]  ;;  %v12376_v26 = vld [vmem:[#allocation278_spill] sm:$0xff] }
 0x36b   : > { %6431 = vmatprep.subr.bf16.mxu1 %v12361_v13  ;;  %v12367_v13 = vld [vmem:[#allocation289_spill] sm:$0xff]  ;;  %v4676_v28 = vmul.f32 %v2920_v21, %v12372_v23  ;;  %v12373_v61 = vpack.c.bf16 %v10276_v5, %v10241_v29  ;;  %v4678_v48 = vmul.f32 %v3207_v18, %v12374_v16  ;;  %v12375_v51 = vpack.c.bf16 %v10253_v37, %v10223_v9  ;;  %v12378_v4 = vld [vmem:[#allocation279_spill] sm:$0xff]  ;;  %v12380_v29 = vld [vmem:[#allocation280_spill] sm:$0xff] }
 0x36c   : > { %6361 = vmatpush1.bf16.msra.mxu0 %v12365_v46  ;;  %v12369_v10 = vpack.c.bf16 %v12367_v13, %v12368_v35  ;;  %v2924_v46 = vpop.f32.mrb[36].mxu0  ;;  %v3211_v13 = vpop.f32.mrb[36].mxu1  ;;  %v12377_v62 = vpack.c.bf16 %v10262_v20, %v10226_v2  ;;  %v12379_v5 = vpack.c.bf16 %v10332_v25, %v10306_v60  ;;  %v12381_v37 = vpack.c.bf16 %v10340_v47, %v10311_v39  ;;  %v12382_v23 = vld [vmem:[#allocation281_spill] sm:$0xff]  ;;  %v12384_v25 = vld [vmem:[#allocation282_spill] sm:$0xff]  ;;  %v12386_v47 = vld [vmem:[#allocation283_spill] sm:$0xff] }
 0x36d   : > { %6363 = vmatprep.subr.bf16.mxu0 %v12371_v31  ;;  %v4679_v57 = vmul.f32 %v2924_v46, %v12376_v26  ;;  %v2926_v35 = vpop.f32.mrb[37].mxu0  ;;  %v4681_v21 = vmul.f32 %v3211_v13, %v12378_v4  ;;  %v3213_v31 = vpop.f32.mrb[37].mxu1  ;;  %v12383_v60 = vpack.c.bf16 %v10319_v45, %v10291_v27  ;;  %v12389_v27 = vpack.c.bf16 %v10397_v36, %v10366_v53  ;;  %v12390_v45 = vld [vmem:[#allocation285_spill] sm:$0xff]  ;;  %v12401_v36 = vld [vmem:[#allocation296_spill] sm:$0xff] }
 0x36e   : > { %6433 = vmatpush1.bf16.msra.mxu1 %v12369_v10  ;;  %v4680_v10 = vmul.f32 %v2926_v35, %v12380_v29  ;;  %v4682_v18 = vmul.f32 %v3213_v31, %v12382_v23  ;;  %v12391_v35 = vpack.c.bf16 %v10374_v59, %v10352_v8  ;;  %v12395_v53 = vpack.c.bf16 %v10443_v3, %v10412_v17  ;;  %v5103_v4 = vld [vmem:[%s10908_s6] sm:$0xff]  ;;  %v5104_v29 = vld [vmem:[%s10908_s6 + $0x8] sm:$0xff] }
 0x36f   : > { %6435 = vmatprep.subr.bf16.mxu1 %v12373_v61  ;;  %v6392_v9 = vpack.c.bf16 %v4679_v57, %v10651_v19  ;;  %v6464_v2 = vpack.c.bf16 %v4681_v21, %v10657_v32  ;;  %v2930_v61 = vpop.f32.mrb[38].mxu0  ;;  %v12385_v19 = vpack.c.bf16 %v10327_v54, %v10300_v56  ;;  %v12387_v32 = vpack.c.bf16 %v10389_v11, %v10362_v58  ;;  %v12400_v11 = vld [vmem:[#allocation293_spill] sm:$0xff]  ;;  %v5105_v21 = vld [vmem:[%s10908_s6 + $0x10] sm:$0xff] }
 0x370   : > { %6365 = vmatpush1.bf16.msra.mxu0 %v12375_v51  ;;  %v6390_v20 = vpack.c.bf16 %v4680_v10, %v4676_v28  ;;  %v6462_v16 = vpack.c.bf16 %v4682_v18, %v4678_v48  ;;  %v4683_v46 = vmul.f32 %v2930_v61, %v12384_v25  ;;  %v3217_v51 = vpop.f32.mrb[38].mxu1  ;;  %v2932_v26 = vpop.f32.mrb[39].mxu0  ;;  %v12388_v28 = vld [vmem:[#allocation284_spill] sm:$0xff]  ;;  %v12392_v56 = vpack.c.bf16 %v10383_v55, %v10359_v43  ;;  %v12398_v43 = vld [vmem:[#allocation297_spill] sm:$0xff] }
 0x371   : > { %6367 = vmatprep.subr.bf16.mxu0 %v12379_v5  ;;  %v4685_v39 = vmul.f32 %v3217_v51, %v12386_v47  ;;  %v4684_v48 = vmul.f32 %v2932_v26, %v12388_v28  ;;  %v3219_v57 = vpop.f32.mrb[39].mxu1  ;;  %v12393_v54 = vpack.c.bf16 %v10459_v34, %v10428_v38  ;;  %v12394_v58 = vpack.c.bf16 %v10467_v50, %v10434_v30  ;;  %v12403_v38 = vld [vmem:[#allocation154_spill] sm:$0xff]  ;;  %v12404_v34 = vld [vmem:[#allocation292_spill] sm:$0xff]  ;;  %v5335_v31 = vld [vmem:[#allocation2] sm:$0x1] }
 0x372   : > { %6437 = vmatpush1.bf16.msra.mxu1 %v12377_v62  ;;  %v4686_v13 = vmul.f32 %v3219_v57, %v12390_v45  ;;  %v12396_v8 = vpack.c.bf16 %v10453_v33, %v10422_v1  ;;  %v12397_v55 = vpack.c.bf16 %v10522_v14, %v10498_v52  ;;  %v12399_v59 = vpack.c.bf16 %v10530_v24, %v12398_v43  ;;  %v4527_v50 = vld [vmem:[%s10903_s1 + $0xc0] sm:$0xff]  ;;  %v12409_v52 = vld [vmem:[#allocation155_spill] sm:$0xff]  ;;  %v12412_v24 = vld [vmem:[#allocation156_spill] sm:$0xff] }
 0x373   : > { %6439 = vmatprep.subr.bf16.mxu1 %v12381_v37  ;;  %v12402_v30 = vpack.c.bf16 %v12400_v11, %v12401_v36  ;;  %v12405_v17 = vpack.c.bf16 %v12403_v38, %v12404_v34  ;;  %v12406_v1 = vpack.c.bf16 %v10578_v12, %v10554_v63  ;;  %v12407_v3 = vpack.c.bf16 %v10586_v15, %v10560_v42  ;;  %v4531_v42 = vld [vmem:[%s10903_s1 + $0xe0] sm:$0xff]  ;;  %v4530_v63 = vld [vmem:[%s10903_s1 + $0xd8] sm:$0xff]  ;;  %v4533_v12 = vld [vmem:[%s10903_s1 + $0xf0] sm:$0xff] }
 0x374   : > { %6369 = vmatpush1.bf16.msra.mxu0 %v12383_v60  ;;  %v12408_v33 = vpack.c.bf16 %v10566_v22, %v10542_v7  ;;  %v12410_v14 = vpack.c.bf16 %v10572_v49, %v12409_v52  ;;  %v12411_v22 = vpack.c.bf16 %v10622_v44, %v10598_v0  ;;  %v12413_v7 = vpack.c.bf16 %v10628_v40, %v12412_v24  ;;  %v4534_v49 = vld [vmem:[%s10903_s1 + $0xf8] sm:$0xff]  ;;  %v4537_v15 = vld [vmem:[%s10903_s1 + $0x110] sm:$0xff]  ;;  %v4536_v44 = vld [vmem:[%s10903_s1 + $0x108] sm:$0xff] }
 0x375   : > { %6371 = vmatprep.subr.bf16.mxu0 %v12387_v32  ;;  %v12414_v0 = vmov 0.0   ;;  %v4529_v40 = vld [vmem:[%s10903_s1 + $0xd0] sm:$0xff]  ;;  %v4538_v62 = vld [vmem:[%s10903_s1 + $0x118] sm:$0xff]  ;;  %v6715_v5 = vmov 0  }
 0x376   : > { %6441 = vmatpush1.bf16.msra.mxu1 %v12385_v19  ;;  %6637 = vset.pattern.permute.xlu0 %v6715_v5  ;;  %v5106_v10 = vld [vmem:[%s10908_s6 + $0x18] sm:$0xff]  ;;  %v5101_v52 = vld [vmem:[%s10907_s5 + $0x10] sm:$0xff] }
 0x377   : > { %6443 = vmatprep.subr.bf16.mxu1 %v12389_v27  ;;  %6638 = vset.pattern.permute.xlu1 %v6715_v5 }
 0x378   : > { %6373 = vmatpush1.bf16.msra.mxu0 %v12391_v35  ;;  %5109 = vperm.xlu0 %6637, %v5103_v4  }
 0x379   : > { %6375 = vmatprep.subr.bf16.mxu0 %v12393_v54  ;;  %5119 = vperm.xlu1 %6638, %v5105_v21  }
 0x37a   : > { %6445 = vmatpush1.bf16.msra.mxu1 %v12392_v56 }
 0x37b   : > { %6447 = vmatprep.subr.bf16.mxu1 %v12394_v58 }
 0x37c   : > { %6377 = vmatpush1.bf16.msra.mxu0 %v12395_v53  ;;  %5114 = vperm.xlu0 %6637, %v5104_v29  }
 0x37d   : > { %6379 = vmatprep.subr.bf16.mxu0 %v12397_v55  ;;  %5124 = vperm.xlu1 %6638, %v5106_v10  }
 0x37e   : > { %6449 = vmatpush1.bf16.msra.mxu1 %v12396_v8 }
 0x37f   : > { %6451 = vmatprep.subr.bf16.mxu1 %v12399_v59 }
 0x380   : > { %6381 = vmatpush1.bf16.msra.mxu0 %v12402_v30  ;;  %5338 = vperm.xlu0 %6637, %v5335_v31  }
 0x381   : > { %6383 = vmatprep.subr.bf16.mxu0 %v12406_v1 }
 0x382   : > { %6453 = vmatpush1.bf16.msra.mxu1 %v12405_v17 }
 0x383   : > { %6455 = vmatprep.subr.bf16.mxu1 %v12407_v3 }
 0x384   : > { %6385 = vmatpush1.bf16.msra.mxu0 %v12408_v33  ;;  %v5099_v33 = vld [vmem:[%s10907_s5] sm:$0xff] }
 0x385   : > { %6387 = vmatprep.subr.bf16.mxu0 %v6386_v6  ;;  %v4532_v6 = vld [vmem:[%s10903_s1 + $0xe8] sm:$0xff] }
 0x386   : > { %6457 = vmatpush1.bf16.msra.mxu1 %v12410_v14  ;;  %v5102_v14 = vld [vmem:[%s10907_s5 + $0x18] sm:$0xff] }
 0x387   : > { %6459 = vmatprep.subr.bf16.mxu1 %v6458_v41  ;;  %4776 = vmatmul.mubr.f32.vlgmr.msra.gmra.mrb[40].mxu0 %v4527_v50  ;;  %v4535_v41 = vld [vmem:[%s10903_s1 + $0x100] sm:$0xff] }
 0x388   : > { %6389 = vmatpush1.bf16.msra.mxu0 %v12411_v22  ;;  %4781 = vmatprep.mubr.f32.mxu0 %v4531_v42 }
 0x389   : > { %4954 = vmatmul.mubr.f32.vlgmr.msra.gmra.mrb[40].mxu1 %v4527_v50  ;;  %6391 = vmatprep.subr.bf16.mxu0 %v6390_v20  ;;  %v5100_v50 = vld [vmem:[%s10907_s5 + $0x8] sm:$0xff] }
 0x38a   : > { %6461 = vmatpush1.bf16.msra.mxu1 %v12413_v7  ;;  %4959 = vmatprep.mubr.f32.mxu1 %v4531_v42 }
 0x38b   : > { %6463 = vmatprep.subr.bf16.mxu1 %v6462_v16  ;;  %4782 = vmatmul.mubr.f32.gmra.mrb[42].mxu0 %v4530_v63 }
 0x38c   : > { %6393 = vmatpush1.bf16.msra.mxu0 %v6392_v9  ;;  %4787 = vmatprep.mubr.f32.mxu0 %v4534_v49 }
 0x38d   : > { %4960 = vmatmul.mubr.f32.gmra.mrb[42].mxu1 %v4530_v63  ;;  %5961 = vmatprep.subr.msk.mxu0 %vm778_vm0, %v4684_v48 }
 0x38e   : > { %6465 = vmatpush1.bf16.msra.mxu1 %v6464_v2  ;;  %4965 = vmatprep.mubr.f32.mxu1 %v4534_v49 }
 0x38f   : > { %5967 = vmatprep.subr.msk.mxu1 %vm778_vm0, %v4686_v13  ;;  %4788 = vmatmul.mubr.f32.gmra.mrb[44].mxu0 %v4533_v12 }
 0x390   : > { %5962 = vmatpush1.msk.msra.mxu0 %vm778_vm0, %v4683_v46  ;;  %4793 = vmatprep.mubr.f32.mxu0 %v4537_v15 }
 0x391   : > { %4966 = vmatmul.mubr.f32.gmra.mrb[44].mxu1 %v4533_v12 }
 0x392   : > { %5968 = vmatpush1.msk.msra.mxu1 %vm778_vm0, %v4685_v39  ;;  %4971 = vmatprep.mubr.f32.mxu1 %v4537_v15 }
 0x393   : > { %4794 = vmatmul.mubr.f32.gmra.mrb[46].mxu0 %v4536_v44 }
 0x394   : > { %4864 = vmatprep.mubr.f32.mxu0 %v12414_v0 }
 0x395   : > { %4972 = vmatmul.mubr.f32.gmra.mrb[46].mxu1 %v4536_v44 }
 0x396   : > { %5042 = vmatprep.mubr.f32.mxu1 %v12414_v0 }
 0x397   : > { %5963 = vmatmul.mubr.msk.f32.vlgmr.msra.gmra.mrb[40].mxu0 %vm3386_vm3, %v4529_v40 }
 0x398   : > { %4870 = vmatprep.mubr.f32.mxu0 %v12414_v0 }
 0x399   : > { %5969 = vmatmul.mubr.msk.f32.vlgmr.msra.gmra.mrb[40].mxu1 %vm3386_vm3, %v4529_v40 }
 0x39a   : > { %5048 = vmatprep.mubr.f32.mxu1 %v12414_v0 }
 0x39b   : > { %5964 = vmatmul.mubr.msk.f32.gmra.mrb[42].mxu0 %vm3386_vm3, %v4532_v6 }
 0x39c   : > { %4876 = vmatprep.mubr.f32.mxu0 %v12414_v0 }
 0x39d   : > { %5970 = vmatmul.mubr.msk.f32.gmra.mrb[42].mxu1 %vm3386_vm3, %v4532_v6 }
 0x39e   : > { %5054 = vmatprep.mubr.f32.mxu1 %v12414_v0 }
 0x39f   : > { %5965 = vmatmul.mubr.msk.f32.gmra.mrb[44].mxu0 %vm3386_vm3, %v4535_v41 }
 0x3a0   : > { %4882 = vmatprep.mubr.f32.mxu0 %v12414_v0 }
 0x3a1   : > { %5971 = vmatmul.mubr.msk.f32.gmra.mrb[44].mxu1 %vm3386_vm3, %v4535_v41 }
 0x3a2   : > { %5060 = vmatprep.mubr.f32.mxu1 %v12414_v0 }
 0x3a3   : > { %5966 = vmatmul.mubr.msk.f32.gmra.mrb[46].mxu0 %vm3386_vm3, %v4538_v62 }
 0x3a4   : > { %5204 = vmatprep.mubr.f32.mxu0 %v12414_v0 }
 0x3a5   : > { %5972 = vmatmul.mubr.msk.f32.gmra.mrb[46].mxu1 %vm3386_vm3, %v4538_v62 }
 0x3a6   : > { %5293 = vmatprep.mubr.f32.mxu1 %v12414_v0 }
 0x3f7   : > { %v5110_v42 = vpop.permute.xlu0 %5109 }
 0x3f8   : > { %v5120_v21 = vpop.permute.xlu1 %5119 }
 0x3fb   : > { %v5115_v40 = vpop.permute.xlu0 %5114 }
 0x46a   : > { %v4866_v9 = vpop.f32.mrb[40].mxu0 }
 0x46b   : > { %v4868_v23 = vpop.f32.mrb[41].mxu0  ;;  %v5083_v20 = vmax.f32 %v4866_v9, 0.0 }
 0x46c   : > { %v5044_v37 = vpop.f32.mrb[40].mxu1  ;;  %v5084_v46 = vmax.f32 %v4868_v23, 0.0 }
 0x46d   : > { %v5046_v18 = vpop.f32.mrb[41].mxu1  ;;  %v5085_v25 = vmax.f32 %v5044_v37, 0.0 }
 0x46e   : > { %v4872_v2 = vpop.f32.mrb[42].mxu0  ;;  %v5086_v47 = vmax.f32 %v5046_v18, 0.0 }
 0x46f   : > { %v5087_v61 = vmax.f32 %v4872_v2, 0.0  ;;  %v4874_v60 = vpop.f32.mrb[43].mxu0 }
 0x470   : > { %v5050_v16 = vpop.f32.mrb[42].mxu1  ;;  %v5088_v26 = vmax.f32 %v4874_v60, 0.0 }
 0x471   : > { %v5089_v51 = vmax.f32 %v5050_v16, 0.0  ;;  %v5052_v19 = vpop.f32.mrb[43].mxu1  ;;  %v6468_v39 = vpack.c.bf16 %v5087_v61, %v5083_v20 }
 0x472   : > { %v5090_v32 = vmax.f32 %v5052_v19, 0.0  ;;  %v6466_v48 = vpack.c.bf16 %v5088_v26, %v5084_v46  ;;  %v4878_v57 = vpop.f32.mrb[44].mxu0 }
 0x473   : > { %v6476_v28 = vpack.c.bf16 %v5089_v51, %v5085_v25  ;;  %v4880_v13 = vpop.f32.mrb[45].mxu0  ;;  %v5091_v54 = vmax.f32 %v4878_v57, 0.0  ;;  %v5125_v57 = vpop.permute.xlu1 %5124 }
 0x474   : > { %v6474_v27 = vpack.c.bf16 %v5090_v32, %v5086_v47  ;;  %v5056_v45 = vpop.f32.mrb[44].mxu1  ;;  %6467 = vmatprep.subr.bf16.mxu0 %v6466_v48  ;;  %v5092_v43 = vmax.f32 %v4880_v13, 0.0 }
 0x475   : > { %v5058_v35 = vpop.f32.mrb[45].mxu1  ;;  %6469 = vmatpush1.bf16.msra.mxu0 %v6468_v39  ;;  %v5093_v55 = vmax.f32 %v5056_v45, 0.0 }
 0x476   : > { %6475 = vmatprep.subr.bf16.mxu1 %v6474_v27  ;;  %v4884_v56 = vpop.f32.mrb[46].mxu0  ;;  %v5094_v30 = vmax.f32 %v5058_v35, 0.0 }
 0x477   : > { %6477 = vmatpush1.bf16.msra.mxu1 %v6476_v28  ;;  %v5095_v58 = vmax.f32 %v4884_v56, 0.0  ;;  %v4886_v8 = vpop.f32.mrb[47].mxu0 }
 0x478   : > { %v5062_v53 = vpop.f32.mrb[46].mxu1  ;;  %v5096_v11 = vmax.f32 %v4886_v8, 0.0 }
 0x479   : > { %v5097_v59 = vmax.f32 %v5062_v53, 0.0  ;;  %v5064_v36 = vpop.f32.mrb[47].mxu1  ;;  %v6472_v38 = vpack.c.bf16 %v5095_v58, %v5091_v54 }
 0x47a   : > { %v5098_v34 = vmax.f32 %v5064_v36, 0.0  ;;  %v6470_v1 = vpack.c.bf16 %v5096_v11, %v5092_v43 }
 0x47b   : > { %v6480_v17 = vpack.c.bf16 %v5097_v59, %v5093_v55 }
 0x47c   : > { %v6478_v3 = vpack.c.bf16 %v5098_v34, %v5094_v30  ;;  %6471 = vmatprep.subr.bf16.mxu0 %v6470_v1 }
 0x47d   : > { %6473 = vmatpush1.bf16.msra.mxu0 %v6472_v38 }
 0x47e   : > { %6479 = vmatprep.subr.bf16.mxu1 %v6478_v3 }
 0x47f   : > { %6481 = vmatpush1.bf16.msra.mxu1 %v6480_v17 }
 0x480   : > { %5973 = vmatmul.mubr.msk.f32.vlgmr.msra.gmra.mrb[48].mxu0 %vm5127_vm7, %v5099_v33 }
 0x481   : > { %5210 = vmatprep.mubr.f32.mxu0 %v12414_v0 }
 0x482   : > { %5977 = vmatmul.mubr.msk.f32.vlgmr.msra.gmra.mrb[48].mxu1 %vm5127_vm7, %v5099_v33  ;;  %v5334_v33 = vld [vmem:[%s10909_s7] sm:$0x1] }
 0x483   : > { %5299 = vmatprep.mubr.f32.mxu1 %v12414_v0 }
 0x484   : > { %5974 = vmatmul.mubr.msk.f32.gmra.mrb[50].mxu0 %vm5127_vm7, %v5100_v50 }
 0x485   : > { %5216 = vmatprep.mubr.f32.mxu0 %v12414_v0 }
 0x486   : > { %5978 = vmatmul.mubr.msk.f32.gmra.mrb[50].mxu1 %vm5127_vm7, %v5100_v50  ;;  %v6716_v50 = vmov 1966171168  }
 0x487   : > { %5305 = vmatprep.mubr.f32.mxu1 %v12414_v0 }
 0x488   : > { %5975 = vmatmul.mubr.msk.f32.gmra.mrb[52].mxu0 %vm5127_vm7, %v5101_v52 }
 0x489   : > { %5222 = vmatprep.mubr.f32.mxu0 %v12414_v0 }
 0x48a   : > { %5979 = vmatmul.mubr.msk.f32.gmra.mrb[52].mxu1 %vm5127_vm7, %v5101_v52  ;;  %v5497_v52 = vunpack.c.l.s4 %v6716_v50 }
 0x48b   : > { %5311 = vmatprep.mubr.f32.mxu1 %v12414_v0 }
 0x48c   : > { %5976 = vmatmul.mubr.msk.f32.gmra.mrb[54].mxu0 %vm5127_vm7, %v5102_v14 }
 0x48d   : > { %5412 = vmatprep.mubr.f32.mxu0 %v12414_v0 }
 0x48e   : > { %5980 = vmatmul.mubr.msk.f32.gmra.mrb[54].mxu1 %vm5127_vm7, %v5102_v14  ;;  %v5339_v14 = vpop.permute.xlu0 %5338 }
 0x48f   : > { %5483 = vmatprep.mubr.f32.mxu1 %v12414_v0 }
 0x553   : > { %v5206_v22 = vpop.f32.mrb[48].mxu0 }
 0x554   : > { %v5208_v24 = vpop.f32.mrb[49].mxu0  ;;  %v5207_v49 = vadd.f32 %v5206_v22, %v5110_v42  ;;  %v12415_v22 = vld [vmem:[#allocation8_spill] sm:$0xff] }
 0x555   : > { %v5295_v63 = vpop.f32.mrb[48].mxu1  ;;  %v5209_v15 = vadd.f32 %v5208_v24, %v5110_v42 }
 0x556   : > { %v5297_v7 = vpop.f32.mrb[49].mxu1  ;;  %v5296_v12 = vadd.f32 %v5295_v63, %v5110_v42  ;;  %v5318_v31 = vmax.f32 %v5207_v49, 0.0  ;;  %v5344_v63 = vrot.slane %v5339_v14, %v12415_v22 }
 0x557   : > { %v5212_v44 = vpop.f32.mrb[50].mxu0  ;;  %v5298_v6 = vadd.f32 %v5297_v7, %v5110_v42  ;;  %v5319_v23 = vmax.f32 %v5209_v15, 0.0  ;;  %v5498_v42 = vunpack.c.0.s8 %v5497_v52 }
 0x558   : > { %v5213_v62 = vadd.f32 %v5212_v44, %v5115_v40  ;;  %v5214_v4 = vpop.f32.mrb[51].mxu0  ;;  %v5320_v37 = vmax.f32 %v5296_v12, 0.0 }
 0x559   : > { %v5301_v41 = vpop.f32.mrb[50].mxu1  ;;  %v5215_v29 = vadd.f32 %v5214_v4, %v5115_v40  ;;  %v5321_v61 = vmax.f32 %v5298_v6, 0.0 }
 0x55a   : > { %v5302_v5 = vadd.f32 %v5301_v41, %v5115_v40  ;;  %v5303_v10 = vpop.f32.mrb[51].mxu1  ;;  %v5322_v0 = vmax.f32 %v5213_v62, 0.0 }
 0x55b   : > { %v5304_v9 = vadd.f32 %v5303_v10, %v5115_v40  ;;  %v5323_v2 = vmax.f32 %v5215_v29, 0.0  ;;  %v5218_v20 = vpop.f32.mrb[52].mxu0  ;;  %v12416_v40 = vld [vmem:[#allocation7_spill] sm:$0xff] }
 0x55c   : > { %v5324_v18 = vmax.f32 %v5302_v5, 0.0  ;;  %v5220_v25 = vpop.f32.mrb[53].mxu0  ;;  %v6484_v46 = vpack.c.bf16 %v5322_v0, %v5318_v31  ;;  %v5219_v39 = vadd.f32 %v5218_v20, %v5120_v21  ;;  %v5501_v6 = vsub.s32 %v5498_v42, %v12416_v40 }
 0x55d   : > { %v5325_v16 = vmax.f32 %v5304_v9, 0.0  ;;  %v5307_v60 = vpop.f32.mrb[52].mxu1  ;;  %v6482_v51 = vpack.c.bf16 %v5323_v2, %v5319_v23  ;;  %v5221_v28 = vadd.f32 %v5220_v25, %v5120_v21  ;;  %v12417_v31 = vlaneseq }
 0x55e   : > { %v5309_v26 = vpop.f32.mrb[53].mxu1  ;;  %v6492_v19 = vpack.c.bf16 %v5324_v18, %v5320_v37  ;;  %v5308_v32 = vadd.f32 %v5307_v60, %v5120_v21  ;;  %v5326_v53 = vmax.f32 %v5219_v39, 0.0 }
 0x55f   : > { %v6490_v47 = vpack.c.bf16 %v5325_v16, %v5321_v61  ;;  %v5224_v48 = vpop.f32.mrb[54].mxu0  ;;  %6483 = vmatprep.subr.bf16.mxu0 %v6482_v51  ;;  %v5310_v27 = vadd.f32 %v5309_v26, %v5120_v21  ;;  %v5327_v59 = vmax.f32 %v5221_v28, 0.0  ;;  %vm5521_vm8 = vcmp.lt.s32.totalorder %v12417_v31, 512 }
 0x560   : > { %v5225_v13 = vadd.f32 %v5224_v48, %v5125_v57  ;;  %v5226_v35 = vpop.f32.mrb[55].mxu0  ;;  %6485 = vmatpush1.bf16.msra.mxu0 %v6484_v46  ;;  %v5328_v43 = vmax.f32 %v5308_v32, 0.0 }
 0x561   : > { %v5313_v45 = vpop.f32.mrb[54].mxu1  ;;  %6491 = vmatprep.subr.bf16.mxu1 %v6490_v47  ;;  %v5227_v54 = vadd.f32 %v5226_v35, %v5125_v57  ;;  %v5329_v30 = vmax.f32 %v5310_v27, 0.0 }
 0x562   : > { %v5314_v56 = vadd.f32 %v5313_v45, %v5125_v57  ;;  %v5315_v58 = vpop.f32.mrb[55].mxu1  ;;  %6493 = vmatpush1.bf16.msra.mxu1 %v6492_v19  ;;  %v5330_v8 = vmax.f32 %v5225_v13, 0.0 }
 0x563   : > { %v5316_v55 = vadd.f32 %v5315_v58, %v5125_v57  ;;  %v5331_v36 = vmax.f32 %v5227_v54, 0.0 }
 0x564   : > { %v5332_v11 = vmax.f32 %v5314_v56, 0.0  ;;  %v6488_v38 = vpack.c.bf16 %v5330_v8, %v5326_v53 }
 0x565   : > { %v5333_v34 = vmax.f32 %v5316_v55, 0.0  ;;  %v6486_v1 = vpack.c.bf16 %v5331_v36, %v5327_v59 }
 0x566   : > { %v6496_v17 = vpack.c.bf16 %v5332_v11, %v5328_v43 }
 0x567   : > { %v6494_v3 = vpack.c.bf16 %v5333_v34, %v5329_v30  ;;  %6487 = vmatprep.subr.bf16.mxu0 %v6486_v1 }
 0x568   : > { %6489 = vmatpush1.bf16.msra.mxu0 %v6488_v38 }
 0x569   : > { %6495 = vmatprep.subr.bf16.mxu1 %v6494_v3 }
 0x56a   : > { %6497 = vmatpush1.bf16.msra.mxu1 %v6496_v17 }
 0x56b   : > { %5981 = vmatmul.mubr.msk.f32.vlgmr.msra.gmra.mrb[56].mxu0 %vm5127_vm7, %v5334_v33 }
 0x56d   : > { %5982 = vmatmul.mubr.msk.f32.vlgmr.msra.gmra.mrb[56].mxu1 %vm5127_vm7, %v5334_v33 }
 0x63e   : > { %v5414_v24 = vpop.f32.mrb[56].mxu0 }
 0x63f   : > { %v5415_v7 = vadd.f32 %v5414_v24, %v5344_v63  ;;  %v5416_v12 = vpop.f32.mrb[57].mxu0 }
 0x640   : > { %v5485_v49 = vpop.f32.mrb[56].mxu1  ;;  %v5417_v44 = vadd.f32 %v5416_v12, %v5344_v63 }
 0x641   : > { %v5486_v15 = vadd.f32 %v5485_v49, %v5344_v63  ;;  %v5487_v41 = vpop.f32.mrb[57].mxu1 }
 0x642   : > { %v5488_v62 = vadd.f32 %v5487_v41, %v5344_v63  ;;  %v5494_v4 = vcombine.low %v5415_v7, %v5417_v44 }
 0x644   : > { %v5495_v21 = vcombine.low %v5486_v15, %v5488_v62  ;;  %v5502_v5 = vrot.slane %v5494_v4, %v5501_v6 }
 0x646   : > { %v5509_v29 = vrot.slane %v5495_v21, %v5501_v6 }
 0x648   : > { %v5510_v10 = vcombine.low %v5502_v5, %v5509_v29 }
 0x64a   : > { %v5517_v0 = vrot.slane %v5510_v10, %v5501_v6 }
 0x64c   : > { %5523 = vst.msk [vmem:[%s366_s15] sm:$0xf] %vm5521_vm8, %v5517_v0 }
 0x64d   : > { %6662 = shalt.err (!%p6659_p5)
}
 0x64e   : > { %s6663_s29 = scalar_lea.hbm %s10858_s22, 64  ;;  %s6667_s30 = scalar_lea.hbm %s10911_s9, 128 }
 0x64f   : > { %p6664_p7 = scmp.ne.s32.totalorder %s10858_s22, %s6663_s29  ;;  %p6668_p12 = scmp.lt.u32.totalorder %s10858_s22, %s10911_s9 }
 0x650   : > { %p6669_p13 = scmp.lt.u32.totalorder %s6667_s30, %s6663_s29  ;;  %p6671_p1 = scmp.lt.u32.totalorder %s6663_s29, %s10858_s22 }
 0x651   : > { %p6665_p10 = pnand %p6664_p7, %p6809_p6 }
 0x652   : > { %p6670_p0 = por %p6669_p13, %p6668_p12 }
 0x653   : > { %p6666_p11 = pneg %p6665_p10 }
 0x654   : > { %p6672_p2 = por %p6671_p1, %p6670_p0 }
 0x656   : > { %p6673_p3 = pnand %p6672_p2, %p6666_p11 }
 0x658   : > { %6676 = shalt.err (!%p6673_p3)
}
 0x659   : > { %6594 = dma.vmem_to_hbm [thread:$0]  (%p6809_p6), %s10860_s17, 64, %s10858_s22, %s5525_s23  }
 0x65a PF: > { %s5551_s18 = sand.u32 1, %s6699_s11   ;;  %p6597_p4 = pnand %p5606_p9, %p6813_p8 }
 0x65b   : > { %s5552_s24 = scalar_lea.sflag [#allocation5], %s5551_s18 }
 0x65c   : > { %6694 = dma.done.wait (!%p6597_p4), %s5552_s24, 64  }
 0x65d   : > { %6696 = vsyncadd (!%p6597_p4), %s5552_s24, 4294967232  ;;  %p21_p5 = scmp.ge.s32.totalorder %s6794_s16, 4   ;;  %s12418_s11 = smov %s6703_s12 }
 0x65e   : > { %s12419_s12 = smov %s6707_s13  ;;  %s12420_s13 = smov %s6807_s19 }
 0x65f   : > { %s12421_s14 = smov %s6794_s16  ;;  %23 = sbr.rel (!%p21_p5) target bundleno = 6 (0x6), region = 119 }
 0x666   :  { %5557 = vsyncpa [#allocation5], 1 }
 0x667   :  { %5559 = vsyncpa [#allocation5 + $0x1], 1 }

</bundles_post_ra>
